<compile_context>
chip_gen: v6e
topology: v6e:2x2x1
jax: 0.10.0
libtpu: 0.0.40
codegen_flags: <defaults>
</compile_context>

<pallas_src>
import functools

import jax
import jax.numpy as jnp
from jax.experimental import pallas as pl
from jax.experimental.pallas import tpu as pltpu


def _round_up(x, m):
    return (x + m - 1) // m * m


# --------------------------------------------------------------------------
# Kernel 1: tiled matmul + bias (+ tanh) (+ fused BatchNorm partial statistics)
# --------------------------------------------------------------------------

def _mm_stats_kernel(a_ref, b_ref, bias_ref, o_ref, stats_ref, *, m_true, tm):
    acc = jnp.dot(a_ref[...], b_ref[...], preferred_element_type=jnp.float32)
    acc = acc + bias_ref[...]
    o_ref[...] = acc.astype(o_ref.dtype)

    # Partial BatchNorm statistics for this row tile (padded rows masked out so
    # they do not pollute the batch mean / variance).
    if m_true % tm == 0:
        masked = acc
    else:
        row = (jax.lax.broadcasted_iota(jnp.int32, acc.shape, 0)
               + pl.program_id(0) * tm)
        masked = jnp.where(row < m_true, acc, 0.0)
    s1 = jnp.sum(masked, axis=0, keepdims=True)            # (1, Np) sum
    s2 = jnp.sum(masked * acc, axis=0, keepdims=True)      # (1, Np) sum of x^2
    pad = jnp.zeros((6, acc.shape[1]), jnp.float32)
    stats_ref[...] = jnp.concatenate([s1, s2, pad], axis=0)


def _mm_plain_kernel(a_ref, b_ref, bias_ref, o_ref, *, activation):
    acc = jnp.dot(a_ref[...], b_ref[...], preferred_element_type=jnp.float32)
    acc = acc + bias_ref[...]
    if activation == "tanh":
        acc = jnp.tanh(acc)
    o_ref[...] = acc.astype(o_ref.dtype)


def conv_matmul(a, b, bias, *, activation="none", with_stats=False,
                out_dtype=jnp.float32, tm_max=512):
    """y = a @ b + bias (+tanh). a:(M,K), b:(K,N). bf16 MXU, f32 accumulate.

    Returns (y_padded, s1, s2): y_padded is (Mp, Np); s1/s2 are per-channel sum
    and sum-of-squares over the M true rows (None when with_stats=False)."""
    M, K = a.shape
    _, N = b.shape
    Np = _round_up(N, 128)
    tm = min(tm_max, _round_up(M, 8))
    Mp = _round_up(M, tm)
    n_tiles = Mp // tm

    a_p = jnp.pad(a.astype(jnp.bfloat16), ((0, Mp - M), (0, 0)))
    b_p = jnp.pad(b.astype(jnp.bfloat16), ((0, 0), (0, Np - N)))
    bias_p = jnp.pad(bias.reshape(1, N).astype(jnp.float32),
                     ((0, 0), (0, Np - N)))

    in_specs = [
        pl.BlockSpec((tm, K), lambda i: (i, 0)),
        pl.BlockSpec((K, Np), lambda i: (0, 0)),      # weight resident in VMEM
        pl.BlockSpec((1, Np), lambda i: (0, 0)),
    ]
    cparams = pltpu.CompilerParams(dimension_semantics=("parallel",))

    if with_stats:
        kernel = functools.partial(_mm_stats_kernel, m_true=M, tm=tm)
        y, stats = pl.pallas_call(
            kernel,
            out_shape=(jax.ShapeDtypeStruct((Mp, Np), out_dtype),
                       jax.ShapeDtypeStruct((n_tiles * 8, Np), jnp.float32)),
            grid=(n_tiles,),
            in_specs=in_specs,
            out_specs=(pl.BlockSpec((tm, Np), lambda i: (i, 0)),
                       pl.BlockSpec((8, Np), lambda i: (i, 0))),
            compiler_params=cparams,
        )(a_p, b_p, bias_p)
        stats = stats.reshape(n_tiles, 8, Np)
        s1 = jnp.sum(stats[:, 0, :N], axis=0)
        s2 = jnp.sum(stats[:, 1, :N], axis=0)
        return y, s1, s2

    kernel = functools.partial(_mm_plain_kernel, activation=activation)
    y = pl.pallas_call(
        kernel,
        out_shape=jax.ShapeDtypeStruct((Mp, Np), out_dtype),
        grid=(n_tiles,),
        in_specs=in_specs,
        out_specs=pl.BlockSpec((tm, Np), lambda i: (i, 0)),
        compiler_params=cparams,
    )(a_p, b_p, bias_p)
    return y, None, None


# --------------------------------------------------------------------------
# Kernel 2: BatchNorm normalize + ReLU (row-tiled, scale/shift precomputed)
# --------------------------------------------------------------------------

def _bn_relu_kernel(x_ref, scale_ref, shift_ref, o_ref):
    y = x_ref[...].astype(jnp.float32) * scale_ref[...] + shift_ref[...]
    o_ref[...] = jnp.maximum(y, 0.0).astype(o_ref.dtype)


def bn_relu_apply(x2d, scale, shift, *, out_dtype=jnp.bfloat16, tm_max=1024):
    """relu(x * scale + shift) over (M, C), tiled over rows."""
    M, C = x2d.shape
    tm = min(tm_max, _round_up(M, 8))
    Mp = _round_up(M, tm)
    x_p = jnp.pad(x2d, ((0, Mp - M), (0, 0)))
    out = pl.pallas_call(
        _bn_relu_kernel,
        out_shape=jax.ShapeDtypeStruct((Mp, C), out_dtype),
        grid=(Mp // tm,),
        in_specs=[
            pl.BlockSpec((tm, C), lambda i: (i, 0)),
            pl.BlockSpec((1, C), lambda i: (0, 0)),
            pl.BlockSpec((1, C), lambda i: (0, 0)),
        ],
        out_specs=pl.BlockSpec((tm, C), lambda i: (i, 0)),
        compiler_params=pltpu.CompilerParams(
            dimension_semantics=("parallel",)),
    )(x_p, scale.reshape(1, C).astype(jnp.float32),
      shift.reshape(1, C).astype(jnp.float32))
    return out[:M]


# --------------------------------------------------------------------------
# ConvTranspose2d: phase decomposition (stride 2) / dilate+im2col (general)
# --------------------------------------------------------------------------

def _im2col(xp, K):
    N, Hp, Wp, C = xp.shape
    Ho, Wo = Hp - K + 1, Wp - K + 1
    patches = [xp[:, kh:kh + Ho, kw:kw + Wo, :]
               for kh in range(K) for kw in range(K)]
    cols = jnp.stack(patches, axis=3)                     # (N, Ho, Wo, K*K, C)
    return cols.reshape(N * Ho * Wo, K * K * C), Ho, Wo


def _weight_to_matrix(w):
    # w: (Cin, Cout, K, K) -- PyTorch ConvTranspose2d layout; flip -> conv.
    Cin, Cout, K, _ = w.shape
    wf = w[:, :, ::-1, ::-1]
    wm = jnp.transpose(wf, (2, 3, 0, 1))                  # (kh, kw, Cin, Cout)
    return wm.reshape(K * K * Cin, Cout)


def conv_transpose2d(x, w, b, stride, padding, *, activation="none",
                     with_stats=False, out_dtype=jnp.bfloat16):
    """ConvTranspose2d over NHWC x. Returns (y_nhwc, s1, s2, count)."""
    N, H, W, Cin = x.shape
    Cout, K = w.shape[1], w.shape[2]

    if stride == 2 and K == 4 and padding == 1:
        # Phase decomposition: each output-pixel parity (py, px) is a 2x2
        # stride-1 conv of the 1-padded input against a sub-kernel of w.
        xp = jnp.pad(x, ((0, 0), (1, 1), (1, 1), (0, 0)))
        phases = [[None, None], [None, None]]
        s1_tot = None
        s2_tot = None
        for py in (0, 1):
            for px in (0, 1):
                xs = xp[:, py:py + H + 1, px:px + W + 1, :]
                cols, _, _ = _im2col(xs, 2)               # (N*H*W, 4*Cin)
                taps = [w[:, :, 3 - 2 * ty - py, 3 - 2 * tx - px]
                        for ty in (0, 1) for tx in (0, 1)]
                wmat = jnp.stack(taps, axis=0).reshape(4 * Cin, Cout)
                y, s1, s2 = conv_matmul(cols, wmat, b, activation=activation,
                                        with_stats=with_stats,
                                        out_dtype=out_dtype)
                phases[py][px] = y[:N * H * W, :Cout].reshape(N, H, W, Cout)
                if with_stats:
                    s1_tot = s1 if s1_tot is None else s1_tot + s1
                    s2_tot = s2 if s2_tot is None else s2_tot + s2
        # Interleave the four parities into the (2H, 2W) output grid.
        out = jnp.stack([jnp.stack([phases[py][0], phases[py][1]], axis=3)
                         for py in (0, 1)], axis=2)       # (N, H, 2, W, 2, C)
        out = out.reshape(N, 2 * H, 2 * W, Cout)
        return out, s1_tot, s2_tot, N * 2 * H * 2 * W

    # General path: zero-dilate by stride, pad by K-1-padding, KxK im2col.
    if stride > 1:
        xd = jnp.zeros((N, (H - 1) * stride + 1, (W - 1) * stride + 1, Cin),
                       x.dtype).at[:, ::stride, ::stride, :].set(x)
    else:
        xd = x
    pad = K - 1 - padding
    xpad = jnp.pad(xd, ((0, 0), (pad, pad), (pad, pad), (0, 0)))
    cols, Ho, Wo = _im2col(xpad, K)
    wmat = _weight_to_matrix(w)
    y, s1, s2 = conv_matmul(cols, wmat, b, activation=activation,
                            with_stats=with_stats, out_dtype=out_dtype)
    out = y[:N * Ho * Wo, :Cout].reshape(N, Ho, Wo, Cout)
    return out, s1, s2, N * Ho * Wo


# --------------------------------------------------------------------------
# Generator
# --------------------------------------------------------------------------

def _bn_scale_shift(s1, s2, count, gamma, beta, eps=1e-5):
    # Training-mode (biased) batch statistics, as a fresh nn.BatchNorm2d uses.
    # TODO(synk): running_mean/running_var updates are training side-effects
    # and are not materialized (they do not affect the forward output).
    cnt = jnp.float32(count)
    mean = s1 / cnt
    var = jnp.maximum(s2 / cnt - mean * mean, 0.0)
    inv = jax.lax.rsqrt(var + eps)
    scale = gamma * inv
    shift = beta - mean * scale
    return scale, shift


def make_layer_specs(channels_noise, channels_img, features_g):
    # (cin, cout, stride, padding, has_bn_relu) for the 5 ConvTranspose2d layers
    return (
        (channels_noise,  features_g * 16, 1, 0, True),
        (features_g * 16, features_g * 8,  2, 1, True),
        (features_g * 8,  features_g * 4,  2, 1, True),
        (features_g * 4,  features_g * 2,  2, 1, True),
        (features_g * 2,  channels_img,    2, 1, False),
    )


def init_params(key, layer_specs):
    params = []
    for cin, cout, _, _, has_bn in layer_specs:
        key, kw, kb, kg, ke = jax.random.split(key, 5)
        p = dict(
            w=0.02 * jax.random.normal(kw, (cin, cout, 4, 4), jnp.float32),
            b=0.02 * jax.random.normal(kb, (cout,), jnp.float32),
        )
        if has_bn:
            p["gamma"] = 1.0 + 0.02 * jax.random.normal(kg, (cout,), jnp.float32)
            p["beta"] = 0.02 * jax.random.normal(ke, (cout,), jnp.float32)
        params.append(p)
    return params


def generator_forward(x_nchw, params, *, layer_specs):
    x = jnp.transpose(x_nchw, (0, 2, 3, 1)).astype(jnp.bfloat16)   # NCHW->NHWC
    n_layers = len(layer_specs)
    for i, (spec, p) in enumerate(zip(layer_specs, params)):
        _, cout, stride, padding, has_bn = spec
        is_last = i == n_layers - 1
        if has_bn:
            y, s1, s2, count = conv_transpose2d(
                x, p["w"], p["b"], stride, padding,
                activation="none", with_stats=True, out_dtype=jnp.bfloat16)
            scale, shift = _bn_scale_shift(s1, s2, count, p["gamma"], p["beta"])
            Nb, Ho, Wo, C = y.shape
            y2d = bn_relu_apply(y.reshape(Nb * Ho * Wo, C), scale, shift,
                                out_dtype=jnp.bfloat16)
            x = y2d.reshape(Nb, Ho, Wo, C)
        else:
            y, _, _, _ = conv_transpose2d(
                x, p["w"], p["b"], stride, padding,
                activation="tanh" if is_last else "none",
                with_stats=False, out_dtype=jnp.float32)
            x = y
    return jnp.transpose(x, (0, 3, 1, 2))                 # NHWC -> NCHW


if __name__ == "__main__":
    key = jax.random.PRNGKey(0)
    k_params, k_x = jax.random.split(key)

    channels_noise, channels_img, features_g = 8, 3, 4
    specs = make_layer_specs(channels_noise, channels_img, features_g)
    params = init_params(k_params, specs)

    # DCGAN generator input: (N, channels_noise, 1, 1), NCHW like PyTorch.
    x = jax.random.normal(k_x, (2, channels_noise, 1, 1), jnp.float32)

    fwd = jax.jit(functools.partial(generator_forward, layer_specs=specs))
    out = jax.block_until_ready(fwd(x, params))

    assert out.shape == (2, channels_img, 64, 64), out.shape
    assert out.dtype == jnp.float32
    assert bool(jnp.all(jnp.isfinite(out)))
    assert bool(jnp.all(jnp.abs(out) <= 1.0 + 1e-5))      # tanh output range
    print("KERNEL_OK")
</pallas_src>

<mosaic_0001>
module attributes {stable_mosaic.version = 11 : i64} {
  func.func @_bn_relu_kernel(%arg0: i32, %arg1: memref<32x64xbf16, #tpu.memory_space<vmem>>, %arg2: memref<1x64xf32, #tpu.memory_space<vmem>>, %arg3: memref<1x64xf32, #tpu.memory_space<vmem>>, %arg4: memref<32x64xbf16, #tpu.memory_space<vmem>>) attributes {dimension_semantics = [#tpu.dimension_semantics<parallel>], iteration_bounds = array<i64: 1>, scalar_prefetch = 0 : i64, scratch_operands = 0 : i64, tpu.core_type = #tpu.core_type<tc>, window_params = [{transform_indices = @transform_0, window_bounds = array<i64: 32, 64>}, {pipeline_mode = #tpu.pipeline_mode<synchronous>, transform_indices = @transform_1, window_bounds = array<i64: 1, 64>}, {pipeline_mode = #tpu.pipeline_mode<synchronous>, transform_indices = @transform_2, window_bounds = array<i64: 1, 64>}, {transform_indices = @transform_3, window_bounds = array<i64: 32, 64>}]} {
    %c0 = arith.constant 0 : index
    %c0_0 = arith.constant 0 : index
    %0 = vector.load %arg1[%c0, %c0_0] : memref<32x64xbf16, #tpu.memory_space<vmem>>, vector<32x64xbf16>
    %1 = arith.extf %0 : vector<32x64xbf16> to vector<32x64xf32>
    %c0_1 = arith.constant 0 : index
    %c0_2 = arith.constant 0 : index
    %2 = vector.load %arg2[%c0_1, %c0_2] : memref<1x64xf32, #tpu.memory_space<vmem>>, vector<1x64xf32>
    %3 = vector.broadcast %2 : vector<1x64xf32> to vector<32x64xf32>
    %4 = arith.mulf %1, %3 : vector<32x64xf32>
    %c0_3 = arith.constant 0 : index
    %c0_4 = arith.constant 0 : index
    %5 = vector.load %arg3[%c0_3, %c0_4] : memref<1x64xf32, #tpu.memory_space<vmem>>, vector<1x64xf32>
    %6 = vector.broadcast %5 : vector<1x64xf32> to vector<32x64xf32>
    %7 = arith.addf %4, %6 : vector<32x64xf32>
    %cst = arith.constant 0.000000e+00 : f32
    %8 = vector.broadcast %cst : f32 to vector<32x64xf32>
    %9 = arith.maximumf %7, %8 : vector<32x64xf32>
    %10 = arith.truncf %9 : vector<32x64xf32> to vector<32x64xbf16>
    %c0_5 = arith.constant 0 : index
    %c0_6 = arith.constant 0 : index
    %11 = vector.load %arg4[%c0_5, %c0_6] : memref<32x64xbf16, #tpu.memory_space<vmem>>, vector<32x64xbf16>
    tpu.vector_store %arg4[%c0_5, %c0_6], %10 {strides = array<i32>} : memref<32x64xbf16, #tpu.memory_space<vmem>>, vector<32x64xbf16>,
    return
  }
  func.func @transform_0(%arg0: i32) -> (i32, i32) {
    %c0_i32 = arith.constant 0 : i32
    %c0_i32_0 = arith.constant 0 : i32
    return %arg0, %c0_i32 : i32, i32
  }
  func.func @transform_1(%arg0: i32) -> (i32, i32) {
    %c0_i32 = arith.constant 0 : i32
    %c0_i32_0 = arith.constant 0 : i32
    %c0_i32_1 = arith.constant 0 : i32
    return %c0_i32, %c0_i32_0 : i32, i32
  }
  func.func @transform_2(%arg0: i32) -> (i32, i32) {
    %c0_i32 = arith.constant 0 : i32
    %c0_i32_0 = arith.constant 0 : i32
    %c0_i32_1 = arith.constant 0 : i32
    return %c0_i32, %c0_i32_0 : i32, i32
  }
  func.func @transform_3(%arg0: i32) -> (i32, i32) {
    %c0_i32 = arith.constant 0 : i32
    %c0_i32_0 = arith.constant 0 : i32
    return %arg0, %c0_i32 : i32, i32
  }
}

module attributes {stable_mosaic.version = 11 : i64} {
  func.func @_mm_stats_kernel(%arg0: i32, %arg1: memref<32x128xbf16, #tpu.memory_space<vmem>>, %arg2: memref<128x128xbf16, #tpu.memory_space<vmem>>, %arg3: memref<1x128xf32, #tpu.memory_space<vmem>>, %arg4: memref<32x128xbf16, #tpu.memory_space<vmem>>, %arg5: memref<8x128xf32, #tpu.memory_space<vmem>>) attributes {dimension_semantics = [#tpu.dimension_semantics<parallel>], iteration_bounds = array<i64: 1>, scalar_prefetch = 0 : i64, scratch_operands = 0 : i64, tpu.core_type = #tpu.core_type<tc>, window_params = [{transform_indices = @transform_0, window_bounds = array<i64: 32, 128>}, {pipeline_mode = #tpu.pipeline_mode<synchronous>, transform_indices = @transform_1, window_bounds = array<i64: 128, 128>}, {pipeline_mode = #tpu.pipeline_mode<synchronous>, transform_indices = @transform_2, window_bounds = array<i64: 1, 128>}, {transform_indices = @transform_3, window_bounds = array<i64: 32, 128>}, {transform_indices = @transform_4, window_bounds = array<i64: 8, 128>}]} {
    %c0 = arith.constant 0 : index
    %c0_0 = arith.constant 0 : index
    %0 = vector.load %arg1[%c0, %c0_0] : memref<32x128xbf16, #tpu.memory_space<vmem>>, vector<32x128xbf16>
    %c0_1 = arith.constant 0 : index
    %c0_2 = arith.constant 0 : index
    %1 = vector.load %arg2[%c0_1, %c0_2] : memref<128x128xbf16, #tpu.memory_space<vmem>>, vector<128x128xbf16>
    %cst = arith.constant dense<0.000000e+00> : vector<32x128xf32>
    %2 = tpu.matmul %0, %1, %cst {dimension_numbers = #tpu.dot_dimension_numbers<[1], [0], [0], [1], [0, 0, 1, 1], [], []>} : vector<32x128xbf16>, vector<128x128xbf16>, vector<32x128xf32> -> vector<32x128xf32>
    %c0_3 = arith.constant 0 : index
    %c0_4 = arith.constant 0 : index
    %3 = vector.load %arg3[%c0_3, %c0_4] : memref<1x128xf32, #tpu.memory_space<vmem>>, vector<1x128xf32>
    %4 = vector.broadcast %3 : vector<1x128xf32> to vector<32x128xf32>
    %5 = arith.addf %2, %4 : vector<32x128xf32>
    %6 = arith.truncf %5 : vector<32x128xf32> to vector<32x128xbf16>
    %c0_5 = arith.constant 0 : index
    %c0_6 = arith.constant 0 : index
    %7 = vector.load %arg4[%c0_5, %c0_6] : memref<32x128xbf16, #tpu.memory_space<vmem>>, vector<32x128xbf16>
    tpu.vector_store %arg4[%c0_5, %c0_6], %6 {strides = array<i32>} : memref<32x128xbf16, #tpu.memory_space<vmem>>, vector<32x128xbf16>,
    %cst_7 = arith.constant dense<0.000000e+00> : vector<128xf32>
    %8 = vector.multi_reduction <add>, %5, %cst_7 [0] : vector<32x128xf32> to vector<128xf32>
    %9 = vector.shape_cast %8 : vector<128xf32> to vector<1x128xf32>
    %10 = arith.mulf %5, %5 : vector<32x128xf32>
    %cst_8 = arith.constant dense<0.000000e+00> : vector<128xf32>
    %11 = vector.multi_reduction <add>, %10, %cst_8 [0] : vector<32x128xf32> to vector<128xf32>
    %12 = vector.shape_cast %11 : vector<128xf32> to vector<1x128xf32>
    %cst_9 = arith.constant 0.000000e+00 : f32
    %13 = vector.broadcast %cst_9 : f32 to vector<6x128xf32>
    %14 = tpu.concatenate %9, %12, %13 in 0 : vector<1x128xf32>, vector<1x128xf32>, vector<6x128xf32> -> vector<8x128xf32>
    %c0_10 = arith.constant 0 : index
    %c0_11 = arith.constant 0 : index
    %15 = vector.load %arg5[%c0_10, %c0_11] : memref<8x128xf32, #tpu.memory_space<vmem>>, vector<8x128xf32>
    tpu.vector_store %arg5[%c0_10, %c0_11], %14 {strides = array<i32>} : memref<8x128xf32, #tpu.memory_space<vmem>>, vector<8x128xf32>,
    return
  }
  func.func @transform_0(%arg0: i32) -> (i32, i32) {
    %c0_i32 = arith.constant 0 : i32
    %c0_i32_0 = arith.constant 0 : i32
    return %arg0, %c0_i32 : i32, i32
  }
  func.func @transform_1(%arg0: i32) -> (i32, i32) {
    %c0_i32 = arith.constant 0 : i32
    %c0_i32_0 = arith.constant 0 : i32
    %c0_i32_1 = arith.constant 0 : i32
    return %c0_i32, %c0_i32_0 : i32, i32
  }
  func.func @transform_2(%arg0: i32) -> (i32, i32) {
    %c0_i32 = arith.constant 0 : i32
    %c0_i32_0 = arith.constant 0 : i32
    %c0_i32_1 = arith.constant 0 : i32
    return %c0_i32, %c0_i32_0 : i32, i32
  }
  func.func @transform_3(%arg0: i32) -> (i32, i32) {
    %c0_i32 = arith.constant 0 : i32
    %c0_i32_0 = arith.constant 0 : i32
    return %arg0, %c0_i32 : i32, i32
  }
  func.func @transform_4(%arg0: i32) -> (i32, i32) {
    %c0_i32 = arith.constant 0 : i32
    %c0_i32_0 = arith.constant 0 : i32
    return %arg0, %c0_i32 : i32, i32
  }
}

module attributes {stable_mosaic.version = 11 : i64} {
  func.func @_mm_stats_kernel(%arg0: i32, %arg1: memref<32x256xbf16, #tpu.memory_space<vmem>>, %arg2: memref<256x128xbf16, #tpu.memory_space<vmem>>, %arg3: memref<1x128xf32, #tpu.memory_space<vmem>>, %arg4: memref<32x128xbf16, #tpu.memory_space<vmem>>, %arg5: memref<8x128xf32, #tpu.memory_space<vmem>>) attributes {dimension_semantics = [#tpu.dimension_semantics<parallel>], iteration_bounds = array<i64: 1>, scalar_prefetch = 0 : i64, scratch_operands = 0 : i64, tpu.core_type = #tpu.core_type<tc>, window_params = [{transform_indices = @transform_0, window_bounds = array<i64: 32, 256>}, {pipeline_mode = #tpu.pipeline_mode<synchronous>, transform_indices = @transform_1, window_bounds = array<i64: 256, 128>}, {pipeline_mode = #tpu.pipeline_mode<synchronous>, transform_indices = @transform_2, window_bounds = array<i64: 1, 128>}, {transform_indices = @transform_3, window_bounds = array<i64: 32, 128>}, {transform_indices = @transform_4, window_bounds = array<i64: 8, 128>}]} {
    %c0 = arith.constant 0 : index
    %c0_0 = arith.constant 0 : index
    %0 = vector.load %arg1[%c0, %c0_0] : memref<32x256xbf16, #tpu.memory_space<vmem>>, vector<32x256xbf16>
    %c0_1 = arith.constant 0 : index
    %c0_2 = arith.constant 0 : index
    %1 = vector.load %arg2[%c0_1, %c0_2] : memref<256x128xbf16, #tpu.memory_space<vmem>>, vector<256x128xbf16>
    %cst = arith.constant dense<0.000000e+00> : vector<32x128xf32>
    %2 = tpu.matmul %0, %1, %cst {dimension_numbers = #tpu.dot_dimension_numbers<[1], [0], [0], [1], [0, 0, 1, 1], [], []>} : vector<32x256xbf16>, vector<256x128xbf16>, vector<32x128xf32> -> vector<32x128xf32>
    %c0_3 = arith.constant 0 : index
    %c0_4 = arith.constant 0 : index
    %3 = vector.load %arg3[%c0_3, %c0_4] : memref<1x128xf32, #tpu.memory_space<vmem>>, vector<1x128xf32>
    %4 = vector.broadcast %3 : vector<1x128xf32> to vector<32x128xf32>
    %5 = arith.addf %2, %4 : vector<32x128xf32>
    %6 = arith.truncf %5 : vector<32x128xf32> to vector<32x128xbf16>
    %c0_5 = arith.constant 0 : index
    %c0_6 = arith.constant 0 : index
    %7 = vector.load %arg4[%c0_5, %c0_6] : memref<32x128xbf16, #tpu.memory_space<vmem>>, vector<32x128xbf16>
    tpu.vector_store %arg4[%c0_5, %c0_6], %6 {strides = array<i32>} : memref<32x128xbf16, #tpu.memory_space<vmem>>, vector<32x128xbf16>,
    %cst_7 = arith.constant dense<0.000000e+00> : vector<128xf32>
    %8 = vector.multi_reduction <add>, %5, %cst_7 [0] : vector<32x128xf32> to vector<128xf32>
    %9 = vector.shape_cast %8 : vector<128xf32> to vector<1x128xf32>
    %10 = arith.mulf %5, %5 : vector<32x128xf32>
    %cst_8 = arith.constant dense<0.000000e+00> : vector<128xf32>
    %11 = vector.multi_reduction <add>, %10, %cst_8 [0] : vector<32x128xf32> to vector<128xf32>
    %12 = vector.shape_cast %11 : vector<128xf32> to vector<1x128xf32>
    %cst_9 = arith.constant 0.000000e+00 : f32
    %13 = vector.broadcast %cst_9 : f32 to vector<6x128xf32>
    %14 = tpu.concatenate %9, %12, %13 in 0 : vector<1x128xf32>, vector<1x128xf32>, vector<6x128xf32> -> vector<8x128xf32>
    %c0_10 = arith.constant 0 : index
    %c0_11 = arith.constant 0 : index
    %15 = vector.load %arg5[%c0_10, %c0_11] : memref<8x128xf32, #tpu.memory_space<vmem>>, vector<8x128xf32>
    tpu.vector_store %arg5[%c0_10, %c0_11], %14 {strides = array<i32>} : memref<8x128xf32, #tpu.memory_space<vmem>>, vector<8x128xf32>,
    return
  }
  func.func @transform_0(%arg0: i32) -> (i32, i32) {
    %c0_i32 = arith.constant 0 : i32
    %c0_i32_0 = arith.constant 0 : i32
    return %arg0, %c0_i32 : i32, i32
  }
  func.func @transform_1(%arg0: i32) -> (i32, i32) {
    %c0_i32 = arith.constant 0 : i32
    %c0_i32_0 = arith.constant 0 : i32
    %c0_i32_1 = arith.constant 0 : i32
    return %c0_i32, %c0_i32_0 : i32, i32
  }
  func.func @transform_2(%arg0: i32) -> (i32, i32) {
    %c0_i32 = arith.constant 0 : i32
    %c0_i32_0 = arith.constant 0 : i32
    %c0_i32_1 = arith.constant 0 : i32
    return %c0_i32, %c0_i32_0 : i32, i32
  }
  func.func @transform_3(%arg0: i32) -> (i32, i32) {
    %c0_i32 = arith.constant 0 : i32
    %c0_i32_0 = arith.constant 0 : i32
    return %arg0, %c0_i32 : i32, i32
  }
  func.func @transform_4(%arg0: i32) -> (i32, i32) {
    %c0_i32 = arith.constant 0 : i32
    %c0_i32_0 = arith.constant 0 : i32
    return %arg0, %c0_i32 : i32, i32
  }
}

module attributes {stable_mosaic.version = 11 : i64} {
  func.func @_bn_relu_kernel(%arg0: i32, %arg1: memref<128x32xbf16, #tpu.memory_space<vmem>>, %arg2: memref<1x32xf32, #tpu.memory_space<vmem>>, %arg3: memref<1x32xf32, #tpu.memory_space<vmem>>, %arg4: memref<128x32xbf16, #tpu.memory_space<vmem>>) attributes {dimension_semantics = [#tpu.dimension_semantics<parallel>], iteration_bounds = array<i64: 1>, scalar_prefetch = 0 : i64, scratch_operands = 0 : i64, tpu.core_type = #tpu.core_type<tc>, window_params = [{transform_indices = @transform_0, window_bounds = array<i64: 128, 32>}, {pipeline_mode = #tpu.pipeline_mode<synchronous>, transform_indices = @transform_1, window_bounds = array<i64: 1, 32>}, {pipeline_mode = #tpu.pipeline_mode<synchronous>, transform_indices = @transform_2, window_bounds = array<i64: 1, 32>}, {transform_indices = @transform_3, window_bounds = array<i64: 128, 32>}]} {
    %c0 = arith.constant 0 : index
    %c0_0 = arith.constant 0 : index
    %0 = vector.load %arg1[%c0, %c0_0] : memref<128x32xbf16, #tpu.memory_space<vmem>>, vector<128x32xbf16>
    %1 = arith.extf %0 : vector<128x32xbf16> to vector<128x32xf32>
    %c0_1 = arith.constant 0 : index
    %c0_2 = arith.constant 0 : index
    %2 = vector.load %arg2[%c0_1, %c0_2] : memref<1x32xf32, #tpu.memory_space<vmem>>, vector<1x32xf32>
    %3 = vector.broadcast %2 : vector<1x32xf32> to vector<128x32xf32>
    %4 = arith.mulf %1, %3 : vector<128x32xf32>
    %c0_3 = arith.constant 0 : index
    %c0_4 = arith.constant 0 : index
    %5 = vector.load %arg3[%c0_3, %c0_4] : memref<1x32xf32, #tpu.memory_space<vmem>>, vector<1x32xf32>
    %6 = vector.broadcast %5 : vector<1x32xf32> to vector<128x32xf32>
    %7 = arith.addf %4, %6 : vector<128x32xf32>
    %cst = arith.constant 0.000000e+00 : f32
    %8 = vector.broadcast %cst : f32 to vector<128x32xf32>
    %9 = arith.maximumf %7, %8 : vector<128x32xf32>
    %10 = arith.truncf %9 : vector<128x32xf32> to vector<128x32xbf16>
    %c0_5 = arith.constant 0 : index
    %c0_6 = arith.constant 0 : index
    %11 = vector.load %arg4[%c0_5, %c0_6] : memref<128x32xbf16, #tpu.memory_space<vmem>>, vector<128x32xbf16>
    tpu.vector_store %arg4[%c0_5, %c0_6], %10 {strides = array<i32>} : memref<128x32xbf16, #tpu.memory_space<vmem>>, vector<128x32xbf16>,
    return
  }
  func.func @transform_0(%arg0: i32) -> (i32, i32) {
    %c0_i32 = arith.constant 0 : i32
    %c0_i32_0 = arith.constant 0 : i32
    return %arg0, %c0_i32 : i32, i32
  }
  func.func @transform_1(%arg0: i32) -> (i32, i32) {
    %c0_i32 = arith.constant 0 : i32
    %c0_i32_0 = arith.constant 0 : i32
    %c0_i32_1 = arith.constant 0 : i32
    return %c0_i32, %c0_i32_0 : i32, i32
  }
  func.func @transform_2(%arg0: i32) -> (i32, i32) {
    %c0_i32 = arith.constant 0 : i32
    %c0_i32_0 = arith.constant 0 : i32
    %c0_i32_1 = arith.constant 0 : i32
    return %c0_i32, %c0_i32_0 : i32, i32
  }
  func.func @transform_3(%arg0: i32) -> (i32, i32) {
    %c0_i32 = arith.constant 0 : i32
    %c0_i32_0 = arith.constant 0 : i32
    return %arg0, %c0_i32 : i32, i32
  }
}

module attributes {stable_mosaic.version = 11 : i64} {
  func.func @_mm_stats_kernel(%arg0: i32, %arg1: memref<128x128xbf16, #tpu.memory_space<vmem>>, %arg2: memref<128x128xbf16, #tpu.memory_space<vmem>>, %arg3: memref<1x128xf32, #tpu.memory_space<vmem>>, %arg4: memref<128x128xbf16, #tpu.memory_space<vmem>>, %arg5: memref<8x128xf32, #tpu.memory_space<vmem>>) attributes {dimension_semantics = [#tpu.dimension_semantics<parallel>], iteration_bounds = array<i64: 1>, scalar_prefetch = 0 : i64, scratch_operands = 0 : i64, tpu.core_type = #tpu.core_type<tc>, window_params = [{transform_indices = @transform_0, window_bounds = array<i64: 128, 128>}, {pipeline_mode = #tpu.pipeline_mode<synchronous>, transform_indices = @transform_1, window_bounds = array<i64: 128, 128>}, {pipeline_mode = #tpu.pipeline_mode<synchronous>, transform_indices = @transform_2, window_bounds = array<i64: 1, 128>}, {transform_indices = @transform_3, window_bounds = array<i64: 128, 128>}, {transform_indices = @transform_4, window_bounds = array<i64: 8, 128>}]} {
    %c0 = arith.constant 0 : index
    %c0_0 = arith.constant 0 : index
    %0 = vector.load %arg1[%c0, %c0_0] : memref<128x128xbf16, #tpu.memory_space<vmem>>, vector<128x128xbf16>
    %c0_1 = arith.constant 0 : index
    %c0_2 = arith.constant 0 : index
    %1 = vector.load %arg2[%c0_1, %c0_2] : memref<128x128xbf16, #tpu.memory_space<vmem>>, vector<128x128xbf16>
    %cst = arith.constant dense<0.000000e+00> : vector<128x128xf32>
    %2 = tpu.matmul %0, %1, %cst {dimension_numbers = #tpu.dot_dimension_numbers<[1], [0], [0], [1], [0, 0, 1, 1], [], []>} : vector<128x128xbf16>, vector<128x128xbf16>, vector<128x128xf32> -> vector<128x128xf32>
    %c0_3 = arith.constant 0 : index
    %c0_4 = arith.constant 0 : index
    %3 = vector.load %arg3[%c0_3, %c0_4] : memref<1x128xf32, #tpu.memory_space<vmem>>, vector<1x128xf32>
    %4 = vector.broadcast %3 : vector<1x128xf32> to vector<128x128xf32>
    %5 = arith.addf %2, %4 : vector<128x128xf32>
    %6 = arith.truncf %5 : vector<128x128xf32> to vector<128x128xbf16>
    %c0_5 = arith.constant 0 : index
    %c0_6 = arith.constant 0 : index
    %7 = vector.load %arg4[%c0_5, %c0_6] : memref<128x128xbf16, #tpu.memory_space<vmem>>, vector<128x128xbf16>
    tpu.vector_store %arg4[%c0_5, %c0_6], %6 {strides = array<i32>} : memref<128x128xbf16, #tpu.memory_space<vmem>>, vector<128x128xbf16>,
    %cst_7 = arith.constant dense<0.000000e+00> : vector<128xf32>
    %8 = vector.multi_reduction <add>, %5, %cst_7 [0] : vector<128x128xf32> to vector<128xf32>
    %9 = vector.shape_cast %8 : vector<128xf32> to vector<1x128xf32>
    %10 = arith.mulf %5, %5 : vector<128x128xf32>
    %cst_8 = arith.constant dense<0.000000e+00> : vector<128xf32>
    %11 = vector.multi_reduction <add>, %10, %cst_8 [0] : vector<128x128xf32> to vector<128xf32>
    %12 = vector.shape_cast %11 : vector<128xf32> to vector<1x128xf32>
    %cst_9 = arith.constant 0.000000e+00 : f32
    %13 = vector.broadcast %cst_9 : f32 to vector<6x128xf32>
    %14 = tpu.concatenate %9, %12, %13 in 0 : vector<1x128xf32>, vector<1x128xf32>, vector<6x128xf32> -> vector<8x128xf32>
    %c0_10 = arith.constant 0 : index
    %c0_11 = arith.constant 0 : index
    %15 = vector.load %arg5[%c0_10, %c0_11] : memref<8x128xf32, #tpu.memory_space<vmem>>, vector<8x128xf32>
    tpu.vector_store %arg5[%c0_10, %c0_11], %14 {strides = array<i32>} : memref<8x128xf32, #tpu.memory_space<vmem>>, vector<8x128xf32>,
    return
  }
  func.func @transform_0(%arg0: i32) -> (i32, i32) {
    %c0_i32 = arith.constant 0 : i32
    %c0_i32_0 = arith.constant 0 : i32
    return %arg0, %c0_i32 : i32, i32
  }
  func.func @transform_1(%arg0: i32) -> (i32, i32) {
    %c0_i32 = arith.constant 0 : i32
    %c0_i32_0 = arith.constant 0 : i32
    %c0_i32_1 = arith.constant 0 : i32
    return %c0_i32, %c0_i32_0 : i32, i32
  }
  func.func @transform_2(%arg0: i32) -> (i32, i32) {
    %c0_i32 = arith.constant 0 : i32
    %c0_i32_0 = arith.constant 0 : i32
    %c0_i32_1 = arith.constant 0 : i32
    return %c0_i32, %c0_i32_0 : i32, i32
  }
  func.func @transform_3(%arg0: i32) -> (i32, i32) {
    %c0_i32 = arith.constant 0 : i32
    %c0_i32_0 = arith.constant 0 : i32
    return %arg0, %c0_i32 : i32, i32
  }
  func.func @transform_4(%arg0: i32) -> (i32, i32) {
    %c0_i32 = arith.constant 0 : i32
    %c0_i32_0 = arith.constant 0 : i32
    return %arg0, %c0_i32 : i32, i32
  }
}

module attributes {stable_mosaic.version = 11 : i64} {
  func.func @_bn_relu_kernel(%arg0: i32, %arg1: memref<512x16xbf16, #tpu.memory_space<vmem>>, %arg2: memref<1x16xf32, #tpu.memory_space<vmem>>, %arg3: memref<1x16xf32, #tpu.memory_space<vmem>>, %arg4: memref<512x16xbf16, #tpu.memory_space<vmem>>) attributes {dimension_semantics = [#tpu.dimension_semantics<parallel>], iteration_bounds = array<i64: 1>, scalar_prefetch = 0 : i64, scratch_operands = 0 : i64, tpu.core_type = #tpu.core_type<tc>, window_params = [{transform_indices = @transform_0, window_bounds = array<i64: 512, 16>}, {pipeline_mode = #tpu.pipeline_mode<synchronous>, transform_indices = @transform_1, window_bounds = array<i64: 1, 16>}, {pipeline_mode = #tpu.pipeline_mode<synchronous>, transform_indices = @transform_2, window_bounds = array<i64: 1, 16>}, {transform_indices = @transform_3, window_bounds = array<i64: 512, 16>}]} {
    %c0 = arith.constant 0 : index
    %c0_0 = arith.constant 0 : index
    %0 = vector.load %arg1[%c0, %c0_0] : memref<512x16xbf16, #tpu.memory_space<vmem>>, vector<512x16xbf16>
    %1 = arith.extf %0 : vector<512x16xbf16> to vector<512x16xf32>
    %c0_1 = arith.constant 0 : index
    %c0_2 = arith.constant 0 : index
    %2 = vector.load %arg2[%c0_1, %c0_2] : memref<1x16xf32, #tpu.memory_space<vmem>>, vector<1x16xf32>
    %3 = vector.broadcast %2 : vector<1x16xf32> to vector<512x16xf32>
    %4 = arith.mulf %1, %3 : vector<512x16xf32>
    %c0_3 = arith.constant 0 : index
    %c0_4 = arith.constant 0 : index
    %5 = vector.load %arg3[%c0_3, %c0_4] : memref<1x16xf32, #tpu.memory_space<vmem>>, vector<1x16xf32>
    %6 = vector.broadcast %5 : vector<1x16xf32> to vector<512x16xf32>
    %7 = arith.addf %4, %6 : vector<512x16xf32>
    %cst = arith.constant 0.000000e+00 : f32
    %8 = vector.broadcast %cst : f32 to vector<512x16xf32>
    %9 = arith.maximumf %7, %8 : vector<512x16xf32>
    %10 = arith.truncf %9 : vector<512x16xf32> to vector<512x16xbf16>
    %c0_5 = arith.constant 0 : index
    %c0_6 = arith.constant 0 : index
    %11 = vector.load %arg4[%c0_5, %c0_6] : memref<512x16xbf16, #tpu.memory_space<vmem>>, vector<512x16xbf16>
    tpu.vector_store %arg4[%c0_5, %c0_6], %10 {strides = array<i32>} : memref<512x16xbf16, #tpu.memory_space<vmem>>, vector<512x16xbf16>,
    return
  }
  func.func @transform_0(%arg0: i32) -> (i32, i32) {
    %c0_i32 = arith.constant 0 : i32
    %c0_i32_0 = arith.constant 0 : i32
    return %arg0, %c0_i32 : i32, i32
  }
  func.func @transform_1(%arg0: i32) -> (i32, i32) {
    %c0_i32 = arith.constant 0 : i32
    %c0_i32_0 = arith.constant 0 : i32
    %c0_i32_1 = arith.constant 0 : i32
    return %c0_i32, %c0_i32_0 : i32, i32
  }
  func.func @transform_2(%arg0: i32) -> (i32, i32) {
    %c0_i32 = arith.constant 0 : i32
    %c0_i32_0 = arith.constant 0 : i32
    %c0_i32_1 = arith.constant 0 : i32
    return %c0_i32, %c0_i32_0 : i32, i32
  }
  func.func @transform_3(%arg0: i32) -> (i32, i32) {
    %c0_i32 = arith.constant 0 : i32
    %c0_i32_0 = arith.constant 0 : i32
    return %arg0, %c0_i32 : i32, i32
  }
}

module attributes {stable_mosaic.version = 11 : i64} {
  func.func @_mm_stats_kernel(%arg0: i32, %arg1: memref<512x64xbf16, #tpu.memory_space<vmem>>, %arg2: memref<64x128xbf16, #tpu.memory_space<vmem>>, %arg3: memref<1x128xf32, #tpu.memory_space<vmem>>, %arg4: memref<512x128xbf16, #tpu.memory_space<vmem>>, %arg5: memref<8x128xf32, #tpu.memory_space<vmem>>) attributes {dimension_semantics = [#tpu.dimension_semantics<parallel>], iteration_bounds = array<i64: 1>, scalar_prefetch = 0 : i64, scratch_operands = 0 : i64, tpu.core_type = #tpu.core_type<tc>, window_params = [{transform_indices = @transform_0, window_bounds = array<i64: 512, 64>}, {pipeline_mode = #tpu.pipeline_mode<synchronous>, transform_indices = @transform_1, window_bounds = array<i64: 64, 128>}, {pipeline_mode = #tpu.pipeline_mode<synchronous>, transform_indices = @transform_2, window_bounds = array<i64: 1, 128>}, {transform_indices = @transform_3, window_bounds = array<i64: 512, 128>}, {transform_indices = @transform_4, window_bounds = array<i64: 8, 128>}]} {
    %c0 = arith.constant 0 : index
    %c0_0 = arith.constant 0 : index
    %0 = vector.load %arg1[%c0, %c0_0] : memref<512x64xbf16, #tpu.memory_space<vmem>>, vector<512x64xbf16>
    %c0_1 = arith.constant 0 : index
    %c0_2 = arith.constant 0 : index
    %1 = vector.load %arg2[%c0_1, %c0_2] : memref<64x128xbf16, #tpu.memory_space<vmem>>, vector<64x128xbf16>
    %cst = arith.constant dense<0.000000e+00> : vector<512x128xf32>
    %2 = tpu.matmul %0, %1, %cst {dimension_numbers = #tpu.dot_dimension_numbers<[1], [0], [0], [1], [0, 0, 1, 1], [], []>} : vector<512x64xbf16>, vector<64x128xbf16>, vector<512x128xf32> -> vector<512x128xf32>
    %c0_3 = arith.constant 0 : index
    %c0_4 = arith.constant 0 : index
    %3 = vector.load %arg3[%c0_3, %c0_4] : memref<1x128xf32, #tpu.memory_space<vmem>>, vector<1x128xf32>
    %4 = vector.broadcast %3 : vector<1x128xf32> to vector<512x128xf32>
    %5 = arith.addf %2, %4 : vector<512x128xf32>
    %6 = arith.truncf %5 : vector<512x128xf32> to vector<512x128xbf16>
    %c0_5 = arith.constant 0 : index
    %c0_6 = arith.constant 0 : index
    %7 = vector.load %arg4[%c0_5, %c0_6] : memref<512x128xbf16, #tpu.memory_space<vmem>>, vector<512x128xbf16>
    tpu.vector_store %arg4[%c0_5, %c0_6], %6 {strides = array<i32>} : memref<512x128xbf16, #tpu.memory_space<vmem>>, vector<512x128xbf16>,
    %cst_7 = arith.constant dense<0.000000e+00> : vector<128xf32>
    %8 = vector.multi_reduction <add>, %5, %cst_7 [0] : vector<512x128xf32> to vector<128xf32>
    %9 = vector.shape_cast %8 : vector<128xf32> to vector<1x128xf32>
    %10 = arith.mulf %5, %5 : vector<512x128xf32>
    %cst_8 = arith.constant dense<0.000000e+00> : vector<128xf32>
    %11 = vector.multi_reduction <add>, %10, %cst_8 [0] : vector<512x128xf32> to vector<128xf32>
    %12 = vector.shape_cast %11 : vector<128xf32> to vector<1x128xf32>
    %cst_9 = arith.constant 0.000000e+00 : f32
    %13 = vector.broadcast %cst_9 : f32 to vector<6x128xf32>
    %14 = tpu.concatenate %9, %12, %13 in 0 : vector<1x128xf32>, vector<1x128xf32>, vector<6x128xf32> -> vector<8x128xf32>
    %c0_10 = arith.constant 0 : index
    %c0_11 = arith.constant 0 : index
    %15 = vector.load %arg5[%c0_10, %c0_11] : memref<8x128xf32, #tpu.memory_space<vmem>>, vector<8x128xf32>
    tpu.vector_store %arg5[%c0_10, %c0_11], %14 {strides = array<i32>} : memref<8x128xf32, #tpu.memory_space<vmem>>, vector<8x128xf32>,
    return
  }
  func.func @transform_0(%arg0: i32) -> (i32, i32) {
    %c0_i32 = arith.constant 0 : i32
    %c0_i32_0 = arith.constant 0 : i32
    return %arg0, %c0_i32 : i32, i32
  }
  func.func @transform_1(%arg0: i32) -> (i32, i32) {
    %c0_i32 = arith.constant 0 : i32
    %c0_i32_0 = arith.constant 0 : i32
    %c0_i32_1 = arith.constant 0 : i32
    return %c0_i32, %c0_i32_0 : i32, i32
  }
  func.func @transform_2(%arg0: i32) -> (i32, i32) {
    %c0_i32 = arith.constant 0 : i32
    %c0_i32_0 = arith.constant 0 : i32
    %c0_i32_1 = arith.constant 0 : i32
    return %c0_i32, %c0_i32_0 : i32, i32
  }
  func.func @transform_3(%arg0: i32) -> (i32, i32) {
    %c0_i32 = arith.constant 0 : i32
    %c0_i32_0 = arith.constant 0 : i32
    return %arg0, %c0_i32 : i32, i32
  }
  func.func @transform_4(%arg0: i32) -> (i32, i32) {
    %c0_i32 = arith.constant 0 : i32
    %c0_i32_0 = arith.constant 0 : i32
    return %arg0, %c0_i32 : i32, i32
  }
}

module attributes {stable_mosaic.version = 11 : i64} {
  func.func @_bn_relu_kernel(%arg0: i32, %arg1: memref<1024x8xbf16, #tpu.memory_space<vmem>>, %arg2: memref<1x8xf32, #tpu.memory_space<vmem>>, %arg3: memref<1x8xf32, #tpu.memory_space<vmem>>, %arg4: memref<1024x8xbf16, #tpu.memory_space<vmem>>) attributes {dimension_semantics = [#tpu.dimension_semantics<parallel>], iteration_bounds = array<i64: 2>, scalar_prefetch = 0 : i64, scratch_operands = 0 : i64, tpu.core_type = #tpu.core_type<tc>, window_params = [{transform_indices = @transform_0, window_bounds = array<i64: 1024, 8>}, {pipeline_mode = #tpu.pipeline_mode<synchronous>, transform_indices = @transform_1, window_bounds = array<i64: 1, 8>}, {pipeline_mode = #tpu.pipeline_mode<synchronous>, transform_indices = @transform_2, window_bounds = array<i64: 1, 8>}, {transform_indices = @transform_3, window_bounds = array<i64: 1024, 8>}]} {
    %c0 = arith.constant 0 : index
    %c0_0 = arith.constant 0 : index
    %0 = vector.load %arg1[%c0, %c0_0] : memref<1024x8xbf16, #tpu.memory_space<vmem>>, vector<1024x8xbf16>
    %1 = arith.extf %0 : vector<1024x8xbf16> to vector<1024x8xf32>
    %c0_1 = arith.constant 0 : index
    %c0_2 = arith.constant 0 : index
    %2 = vector.load %arg2[%c0_1, %c0_2] : memref<1x8xf32, #tpu.memory_space<vmem>>, vector<1x8xf32>
    %3 = vector.broadcast %2 : vector<1x8xf32> to vector<1024x8xf32>
    %4 = arith.mulf %1, %3 : vector<1024x8xf32>
    %c0_3 = arith.constant 0 : index
    %c0_4 = arith.constant 0 : index
    %5 = vector.load %arg3[%c0_3, %c0_4] : memref<1x8xf32, #tpu.memory_space<vmem>>, vector<1x8xf32>
    %6 = vector.broadcast %5 : vector<1x8xf32> to vector<1024x8xf32>
    %7 = arith.addf %4, %6 : vector<1024x8xf32>
    %cst = arith.constant 0.000000e+00 : f32
    %8 = vector.broadcast %cst : f32 to vector<1024x8xf32>
    %9 = arith.maximumf %7, %8 : vector<1024x8xf32>
    %10 = arith.truncf %9 : vector<1024x8xf32> to vector<1024x8xbf16>
    %c0_5 = arith.constant 0 : index
    %c0_6 = arith.constant 0 : index
    %11 = vector.load %arg4[%c0_5, %c0_6] : memref<1024x8xbf16, #tpu.memory_space<vmem>>, vector<1024x8xbf16>
    tpu.vector_store %arg4[%c0_5, %c0_6], %10 {strides = array<i32>} : memref<1024x8xbf16, #tpu.memory_space<vmem>>, vector<1024x8xbf16>,
    return
  }
  func.func @transform_0(%arg0: i32) -> (i32, i32) {
    %c0_i32 = arith.constant 0 : i32
    %c0_i32_0 = arith.constant 0 : i32
    return %arg0, %c0_i32 : i32, i32
  }
  func.func @transform_1(%arg0: i32) -> (i32, i32) {
    %c0_i32 = arith.constant 0 : i32
    %c0_i32_0 = arith.constant 0 : i32
    %c0_i32_1 = arith.constant 0 : i32
    return %c0_i32, %c0_i32_0 : i32, i32
  }
  func.func @transform_2(%arg0: i32) -> (i32, i32) {
    %c0_i32 = arith.constant 0 : i32
    %c0_i32_0 = arith.constant 0 : i32
    %c0_i32_1 = arith.constant 0 : i32
    return %c0_i32, %c0_i32_0 : i32, i32
  }
  func.func @transform_3(%arg0: i32) -> (i32, i32) {
    %c0_i32 = arith.constant 0 : i32
    %c0_i32_0 = arith.constant 0 : i32
    return %arg0, %c0_i32 : i32, i32
  }
}

module attributes {stable_mosaic.version = 11 : i64} {
  func.func @_mm_plain_kernel(%arg0: i32, %arg1: memref<512x32xbf16, #tpu.memory_space<vmem>>, %arg2: memref<32x128xbf16, #tpu.memory_space<vmem>>, %arg3: memref<1x128xf32, #tpu.memory_space<vmem>>, %arg4: memref<512x128xf32, #tpu.memory_space<vmem>>) attributes {dimension_semantics = [#tpu.dimension_semantics<parallel>], iteration_bounds = array<i64: 4>, scalar_prefetch = 0 : i64, scratch_operands = 0 : i64, tpu.core_type = #tpu.core_type<tc>, window_params = [{transform_indices = @transform_0, window_bounds = array<i64: 512, 32>}, {pipeline_mode = #tpu.pipeline_mode<synchronous>, transform_indices = @transform_1, window_bounds = array<i64: 32, 128>}, {pipeline_mode = #tpu.pipeline_mode<synchronous>, transform_indices = @transform_2, window_bounds = array<i64: 1, 128>}, {transform_indices = @transform_3, window_bounds = array<i64: 512, 128>}]} {
    %c0 = arith.constant 0 : index
    %c0_0 = arith.constant 0 : index
    %0 = vector.load %arg1[%c0, %c0_0] : memref<512x32xbf16, #tpu.memory_space<vmem>>, vector<512x32xbf16>
    %c0_1 = arith.constant 0 : index
    %c0_2 = arith.constant 0 : index
    %1 = vector.load %arg2[%c0_1, %c0_2] : memref<32x128xbf16, #tpu.memory_space<vmem>>, vector<32x128xbf16>
    %cst = arith.constant dense<0.000000e+00> : vector<512x128xf32>
    %2 = tpu.matmul %0, %1, %cst {dimension_numbers = #tpu.dot_dimension_numbers<[1], [0], [0], [1], [0, 0, 1, 1], [], []>} : vector<512x32xbf16>, vector<32x128xbf16>, vector<512x128xf32> -> vector<512x128xf32>
    %c0_3 = arith.constant 0 : index
    %c0_4 = arith.constant 0 : index
    %3 = vector.load %arg3[%c0_3, %c0_4] : memref<1x128xf32, #tpu.memory_space<vmem>>, vector<1x128xf32>
    %4 = vector.broadcast %3 : vector<1x128xf32> to vector<512x128xf32>
    %5 = arith.addf %2, %4 : vector<512x128xf32>
    %6 = math.tanh %5 : vector<512x128xf32>
    %c0_5 = arith.constant 0 : index
    %c0_6 = arith.constant 0 : index
    %7 = vector.load %arg4[%c0_5, %c0_6] : memref<512x128xf32, #tpu.memory_space<vmem>>, vector<512x128xf32>
    tpu.vector_store %arg4[%c0_5, %c0_6], %6 {strides = array<i32>} : memref<512x128xf32, #tpu.memory_space<vmem>>, vector<512x128xf32>,
    return
  }
  func.func @transform_0(%arg0: i32) -> (i32, i32) {
    %c0_i32 = arith.constant 0 : i32
    %c0_i32_0 = arith.constant 0 : i32
    return %arg0, %c0_i32 : i32, i32
  }
  func.func @transform_1(%arg0: i32) -> (i32, i32) {
    %c0_i32 = arith.constant 0 : i32
    %c0_i32_0 = arith.constant 0 : i32
    %c0_i32_1 = arith.constant 0 : i32
    return %c0_i32, %c0_i32_0 : i32, i32
  }
  func.func @transform_2(%arg0: i32) -> (i32, i32) {
    %c0_i32 = arith.constant 0 : i32
    %c0_i32_0 = arith.constant 0 : i32
    %c0_i32_1 = arith.constant 0 : i32
    return %c0_i32, %c0_i32_0 : i32, i32
  }
  func.func @transform_3(%arg0: i32) -> (i32, i32) {
    %c0_i32 = arith.constant 0 : i32
    %c0_i32_0 = arith.constant 0 : i32
    return %arg0, %c0_i32 : i32, i32
  }
}

</mosaic_0001>

<bundles_post_ra>
// kernel: generator_forward.22
= control target key start
LH: loop header
LB: loop body
LE: loop exit
PB: predicated region body
PF: predicated region fallthrough
CT: control target
= control target key end

     0   :  { %vm64_vm0 = vcmask 519168   ;;  %s136_s0 = inlined_call_operand.vmem [shape: bf16[32,64], index: 0, kind: input, shape index: {}]   ;;  %s137_s1 = inlined_call_operand.vmem [shape: f32[1,64], index: 1, kind: input, shape index: {}]   ;;  %s138_s2 = inlined_call_operand.vmem [shape: f32[1,64], index: 2, kind: input, shape index: {}]   ;;  %s139_s3 = inlined_call_operand.vmem [shape: bf16[32,64], index: 3, kind: output, shape index: {}]  }
   0x1   :  { %v84_v0 = vld [vmem:[%s136_s0] sm:$0xff]   ;;  %v91_v4 = vld [vmem:[%s136_s0 + $0x8] sm:$0xff]  }
   0x2   :  { %v73_v1 = vld [vmem:[%s137_s1] ss:$0 sm:$0xff]  ;;  %v85_v2 = vunpack.c.l.bf16 %v84_v0  ;;  %v86_v3 = vunpack.c.h.bf16 %v84_v0  ;;  %v89_v6 = vunpack.c.l.bf16 %v91_v4  ;;  %v90_v7 = vunpack.c.h.bf16 %v91_v4 }
   0x3   :  { %v74_v5 = vld [vmem:[%s138_s2] ss:$0 sm:$0xff] }
   0x4   :  { %v29_v8 = vmul.f32 %v85_v2, %v73_v1  ;;  %v30_v9 = vmul.f32 %v86_v3, %v73_v1  ;;  %v31_v10 = vmul.f32 %v89_v6, %v73_v1  ;;  %v32_v11 = vmul.f32 %v90_v7, %v73_v1 }
   0x6   :  { %v40_v12 = vadd.f32 %v74_v5, %v29_v8  ;;  %v41_v13 = vadd.f32 %v74_v5, %v30_v9  ;;  %v42_v14 = vadd.f32 %v74_v5, %v31_v10  ;;  %v43_v15 = vadd.f32 %v74_v5, %v32_v11 }
   0x8   :  { %v44_v16 = vmax.f32 %v40_v12, 0.0  ;;  %v45_v17 = vmax.f32 %v41_v13, 0.0  ;;  %v46_v18 = vmax.f32 %v42_v14, 0.0  ;;  %v47_v19 = vmax.f32 %v43_v15, 0.0 }
   0xa   :  { %v79_v20 = vpack.c.bf16 %v44_v16, %v44_v16  ;;  %v80_v21 = vpack.c.bf16 %v45_v17, %v45_v17  ;;  %v81_v22 = vpack.c.bf16 %v46_v18, %v46_v18  ;;  %v82_v23 = vpack.c.bf16 %v47_v19, %v47_v19 }
   0xc   :  { %65 = vst.msk [vmem:[%s139_s3] sm:$0xf] %vm64_vm0, %v79_v20  ;;  %66 = vst.msk [vmem:[%s139_s3 + $0x4] sm:$0xf] %vm64_vm0, %v80_v21 }
   0xd   :  { %67 = vst.msk [vmem:[%s139_s3 + $0x8] sm:$0xf] %vm64_vm0, %v81_v22  ;;  %68 = vst.msk [vmem:[%s139_s3 + $0xc] sm:$0xf] %vm64_vm0, %v82_v23 }

// kernel: generator_forward.21
= control target key start
LH: loop header
LB: loop body
LE: loop exit
PB: predicated region body
PF: predicated region fallthrough
CT: control target
= control target key end

     0   :  { %vm195_vm0 = vcmask 1040384   ;;  %vm197_vm1 = vcmask 1041408   ;;  %s345_s1 = inlined_call_operand.vmem [shape: bf16[128,128], index: 1, kind: input, shape index: {}]   ;;  %s346_s0 = inlined_call_operand.vmem [shape: bf16[32,128], index: 0, kind: input, shape index: {}]   ;;  %s347_s2 = inlined_call_operand.vmem [shape: f32[1,128], index: 2, kind: input, shape index: {}]   ;;  %s348_s3 = inlined_call_operand.vmem [shape: bf16[32,128], index: 3, kind: output, shape index: {0}]   ;;  %s349_s4 = inlined_call_operand.vmem [shape: f32[8,128], index: 4, kind: output, shape index: {1}]  }
   0x1   :  { %v268_v0 = vld [vmem:[%s345_s1 + $0x38] sm:$0xff]   ;;  %v269_v1 = vld [vmem:[%s345_s1 + $0x30] sm:$0xff]   ;;  %v270_v2 = vld [vmem:[%s345_s1 + $0x28] sm:$0xff]  }
   0x2   :  { %248 = vmatprep.subr.bf16.mxu0 %v268_v0  ;;  %v271_v3 = vld [vmem:[%s345_s1 + $0x20] sm:$0xff]   ;;  %v272_v5 = vld [vmem:[%s345_s1 + $0x18] sm:$0xff]   ;;  %v273_v6 = vld [vmem:[%s345_s1 + $0x10] sm:$0xff]  }
   0x3   :  { %249 = vmatpush3.bf16.msra.mxu0 %v268_v0  ;;  %v276_v4 = vld [vmem:[%s346_s0] sm:$0xff]   ;;  %v274_v7 = vld [vmem:[%s345_s1 + $0x8] sm:$0xff]  }
   0x4   :  { %250 = vmatprep.subr.bf16.mxu0 %v269_v1  ;;  %264 = vmatprep.mubr.bf16.mxu0 %v276_v4  ;;  %v275_v8 = vld [vmem:[%s345_s1] sm:$0xff]   ;;  %v277_v9 = vld [vmem:[%s346_s0 + $0x8] sm:$0xff]  }
   0x5   :  { %v208_v11 = vld [vmem:[%s347_s2] ss:$0 sm:$0xff] }
   0x7   :  { %251 = vmatpush3.bf16.msra.mxu0 %v269_v1 }
   0x8   :  { %252 = vmatprep.subr.bf16.mxu0 %v270_v2 }
   0xb   :  { %253 = vmatpush3.bf16.msra.mxu0 %v270_v2 }
   0xc   :  { %254 = vmatprep.subr.bf16.mxu0 %v271_v3 }
   0xf   :  { %255 = vmatpush3.bf16.msra.mxu0 %v271_v3 }
  0x10   :  { %256 = vmatprep.subr.bf16.mxu0 %v272_v5 }
  0x13   :  { %257 = vmatpush3.bf16.msra.mxu0 %v272_v5 }
  0x14   :  { %258 = vmatprep.subr.bf16.mxu0 %v273_v6 }
  0x17   :  { %259 = vmatpush3.bf16.msra.mxu0 %v273_v6 }
  0x18   :  { %260 = vmatprep.subr.bf16.mxu0 %v274_v7 }
  0x1b   :  { %261 = vmatpush3.bf16.msra.mxu0 %v274_v7 }
  0x1c   :  { %262 = vmatprep.subr.bf16.mxu0 %v275_v8 }
  0x1f   :  { %263 = vmatpush3.bf16.msra.mxu0 %v275_v8 }
  0x22   :  { %265 = vmatmul.mubr.bf16.vlgmr.msra.gmra.mxu0 %v277_v9 }
  0xe2   :  { %v266_v10 = vpop.f32.mrf.mxu0 }
  0xe3   :  { %v147_v14 = vadd.f32 %v266_v10, %v208_v11 }
  0xe4   :  { %v138_v12 = vpop.f32.mrf.mxu0 }
  0xe5   :  { %v139_v15 = vadd.f32 %v208_v11, %v138_v12  ;;  %v184_v24 = vmul.f32 %v147_v14, %v147_v14 }
  0xe6   :  { %v267_v13 = vpop.f32.mrf.mxu0 }
  0xe7   :  { %v150_v16 = vadd.f32 %v267_v13, %v208_v11  ;;  %v182_v20 = vmul.f32 %v139_v15, %v139_v15 }
  0xe8   :  { %v141_v17 = vpop.f32.mrf.mxu0 }
  0xe9   :  { %v235_v18 = vpack.c.bf16 %v150_v16, %v147_v14  ;;  %v142_v19 = vadd.f32 %v208_v11, %v141_v17  ;;  %v185_v27 = vmul.f32 %v150_v16, %v150_v16 }
  0xeb   :  { %237 = vst [vmem:[%s348_s3 + $0x8] sm:$0xff] %v235_v18   ;;  %v230_v21 = vpack.c.bf16 %v142_v19, %v139_v15  ;;  %v173_v22 = vadd.f32 %v142_v19, %v139_v15  ;;  %v183_v23 = vmul.f32 %v142_v19, %v142_v19 }
  0xed   :  { %231 = vst [vmem:[%s348_s3] sm:$0xff] %v230_v21   ;;  %v174_v25 = vadd.f32 %v173_v22, %v147_v14  ;;  %v186_v26 = vadd.f32 %v183_v23, %v182_v20 }
  0xef   :  { %v175_v28 = vadd.f32 %v174_v25, %v150_v16  ;;  %v187_v29 = vadd.f32 %v186_v26, %v184_v24 }
  0xf1   :  { %v176_v30 = vrot.slane %v175_v28, 4  ;;  %v188_v31 = vadd.f32 %v187_v29, %v185_v27 }
  0xf3   :  { %v177_v32 = vadd.f32 %v176_v30, %v175_v28  ;;  %v189_v33 = vrot.slane %v188_v31, 4 }
  0xf5   :  { %v178_v34 = vrot.slane %v177_v32, 2  ;;  %v190_v35 = vadd.f32 %v189_v33, %v188_v31 }
  0xf7   :  { %v179_v36 = vadd.f32 %v178_v34, %v177_v32  ;;  %v191_v37 = vrot.slane %v190_v35, 2 }
  0xf9   :  { %v180_v38 = vrot.slane %v179_v36, 1  ;;  %v192_v39 = vadd.f32 %v191_v37, %v190_v35 }
  0xfb   :  { %v193_v40 = vrot.slane %v192_v39, 1  ;;  %v181_v41 = vadd.f32 %v180_v38, %v179_v36 }
  0xfd   :  { %v194_v42 = vadd.f32 %v193_v40, %v192_v39 }
  0xff   :  { %v196_v43 = vsel %vm195_vm0, %v181_v41, %v194_v42 }
 0x100   :  { %v198_v44 = vsel %vm197_vm1, %v196_v43, 0.0 }
 0x101   :  { %199 = vst [vmem:[%s349_s4] sm:$0xff] %v198_v44 }

// kernel: generator_forward.23
= control target key start
LH: loop header
LB: loop body
LE: loop exit
PB: predicated region body
PF: predicated region fallthrough
CT: control target
= control target key end

     0   :  { %vm267_vm0 = vcmask 1040384   ;;  %vm269_vm1 = vcmask 1041408   ;;  %s483_s1 = inlined_call_operand.vmem [shape: bf16[256,128], index: 1, kind: input, shape index: {}]   ;;  %s484_s0 = inlined_call_operand.vmem [shape: bf16[32,256], index: 0, kind: input, shape index: {}]   ;;  %s485_s2 = inlined_call_operand.vmem [shape: f32[1,128], index: 2, kind: input, shape index: {}]   ;;  %s486_s3 = inlined_call_operand.vmem [shape: bf16[32,128], index: 3, kind: output, shape index: {0}]   ;;  %s487_s4 = inlined_call_operand.vmem [shape: f32[8,128], index: 4, kind: output, shape index: {1}]  }
   0x1   :  { %v364_v0 = vld [vmem:[%s483_s1 + $0x78] sm:$0xff]   ;;  %v366_v2 = vld [vmem:[%s483_s1 + $0x70] sm:$0xff]   ;;  %v368_v4 = vld [vmem:[%s483_s1 + $0x68] sm:$0xff]  }
   0x2   :  { %v365_v1 = vld [vmem:[%s483_s1 + $0x38] sm:$0xff]   ;;  %320 = vmatprep.subr.bf16.mxu0 %v364_v0  ;;  %348 = vmatprep.subr.bf16.mxu1 %v364_v0  ;;  %v367_v3 = vld [vmem:[%s483_s1 + $0x30] sm:$0xff]   ;;  %v369_v5 = vld [vmem:[%s483_s1 + $0x28] sm:$0xff]  }
   0x3   :  { %321 = vmatpush3.bf16.msra.mxu0 %v365_v1  ;;  %356 = vmatpush3.bf16.msra.mxu1 %v365_v1  ;;  %v370_v6 = vld [vmem:[%s483_s1 + $0x60] sm:$0xff]   ;;  %v372_v8 = vld [vmem:[%s483_s1 + $0x58] sm:$0xff]   ;;  %v374_v10 = vld [vmem:[%s483_s1 + $0x50] sm:$0xff]  }
   0x4   :  { %322 = vmatprep.subr.bf16.mxu0 %v366_v2  ;;  %349 = vmatprep.subr.bf16.mxu1 %v366_v2  ;;  %v371_v7 = vld [vmem:[%s483_s1 + $0x20] sm:$0xff]   ;;  %v373_v9 = vld [vmem:[%s483_s1 + $0x18] sm:$0xff]   ;;  %v375_v13 = vld [vmem:[%s483_s1 + $0x10] sm:$0xff]  }
   0x5   :  { %v382_v11 = vld [vmem:[%s484_s0 + $0x4] ss:$8 sps:$4 sm:$0xff]   ;;  %v385_v12 = vld [vmem:[%s484_s0 + $0x14] ss:$8 sps:$4 sm:$0xff]   ;;  %v380_v18 = vld [vmem:[%s484_s0] ss:$8 sps:$4 sm:$0xff]  }
   0x6   :  { %v376_v14 = vld [vmem:[%s483_s1 + $0x48] sm:$0xff]   ;;  %208 = vmatprep.mubr.bf16.mxu0 %v382_v11  ;;  %216 = vmatprep.mubr.bf16.mxu1 %v385_v12  ;;  %v378_v16 = vld [vmem:[%s483_s1 + $0x40] sm:$0xff]   ;;  %v383_v19 = vld [vmem:[%s484_s0 + $0x10] ss:$8 sps:$4 sm:$0xff]  }
   0x7   :  { %323 = vmatpush3.bf16.msra.mxu0 %v367_v3  ;;  %357 = vmatpush3.bf16.msra.mxu1 %v367_v3  ;;  %v377_v15 = vld [vmem:[%s483_s1 + $0x8] sm:$0xff]   ;;  %v379_v17 = vld [vmem:[%s483_s1] sm:$0xff]  }
   0x8   :  { %324 = vmatprep.subr.bf16.mxu0 %v368_v4  ;;  %350 = vmatprep.subr.bf16.mxu1 %v368_v4  ;;  %v280_v24 = vld [vmem:[%s485_s2] ss:$0 sm:$0xff] }
   0xb   :  { %325 = vmatpush3.bf16.msra.mxu0 %v369_v5  ;;  %358 = vmatpush3.bf16.msra.mxu1 %v369_v5 }
   0xc   :  { %326 = vmatprep.subr.bf16.mxu0 %v370_v6  ;;  %351 = vmatprep.subr.bf16.mxu1 %v370_v6 }
   0xf   :  { %327 = vmatpush3.bf16.msra.mxu0 %v371_v7  ;;  %359 = vmatpush3.bf16.msra.mxu1 %v371_v7 }
  0x10   :  { %328 = vmatprep.subr.bf16.mxu0 %v372_v8  ;;  %352 = vmatprep.subr.bf16.mxu1 %v372_v8 }
  0x13   :  { %329 = vmatpush3.bf16.msra.mxu0 %v373_v9  ;;  %360 = vmatpush3.bf16.msra.mxu1 %v373_v9 }
  0x14   :  { %330 = vmatprep.subr.bf16.mxu0 %v374_v10  ;;  %353 = vmatprep.subr.bf16.mxu1 %v374_v10 }
  0x17   :  { %331 = vmatpush3.bf16.msra.mxu0 %v375_v13  ;;  %361 = vmatpush3.bf16.msra.mxu1 %v375_v13 }
  0x18   :  { %332 = vmatprep.subr.bf16.mxu0 %v376_v14  ;;  %354 = vmatprep.subr.bf16.mxu1 %v376_v14 }
  0x1b   :  { %333 = vmatpush3.bf16.msra.mxu0 %v377_v15  ;;  %362 = vmatpush3.bf16.msra.mxu1 %v377_v15 }
  0x1c   :  { %334 = vmatprep.subr.bf16.mxu0 %v378_v16  ;;  %355 = vmatprep.subr.bf16.mxu1 %v378_v16 }
  0x1f   :  { %335 = vmatpush3.bf16.msra.mxu0 %v379_v17  ;;  %363 = vmatpush3.bf16.msra.mxu1 %v379_v17 }
  0x22   :  { %209 = vmatmul.mubr.bf16.vlgmr.msra.gmra.mxu0 %v380_v18  ;;  %217 = vmatmul.mubr.bf16.vlgmr.msra.gmra.mxu1 %v383_v19 }
  0xe2   :  { %v336_v20 = vpop.f32.mrf.mxu0  ;;  %v342_v21 = vpop.f32.mrf.mxu1 }
  0xe4   :  { %v337_v22 = vpop.f32.mrf.mxu0  ;;  %v343_v23 = vpop.f32.mrf.mxu1 }
  0xe5   :  { %v338_v25 = vadd.f32 %v337_v22, %v336_v20  ;;  %v344_v28 = vadd.f32 %v343_v23, %v342_v21 }
  0xe6   :  { %v339_v26 = vpop.f32.mrf.mxu0  ;;  %v345_v27 = vpop.f32.mrf.mxu1 }
  0xe7   :  { %v211_v29 = vadd.f32 %v338_v25, %v280_v24  ;;  %v219_v34 = vadd.f32 %v344_v28, %v280_v24 }
  0xe8   :  { %v340_v30 = vpop.f32.mrf.mxu0  ;;  %v346_v31 = vpop.f32.mrf.mxu1 }
  0xe9   :  { %v341_v32 = vadd.f32 %v340_v30, %v339_v26  ;;  %v347_v33 = vadd.f32 %v346_v31, %v345_v27  ;;  %v254_v37 = vmul.f32 %v211_v29, %v211_v29  ;;  %v256_v42 = vmul.f32 %v219_v34, %v219_v34 }
  0xeb   :  { %v214_v35 = vadd.f32 %v341_v32, %v280_v24  ;;  %v222_v36 = vadd.f32 %v347_v33, %v280_v24 }
  0xed   :  { %v312_v38 = vpack.c.bf16 %v214_v35, %v211_v29  ;;  %v245_v39 = vadd.f32 %v214_v35, %v211_v29  ;;  %v255_v40 = vmul.f32 %v214_v35, %v214_v35  ;;  %v317_v41 = vpack.c.bf16 %v222_v36, %v219_v34 }
  0xee   :  { %v257_v46 = vmul.f32 %v222_v36, %v222_v36 }
  0xef   :  { %313 = vst [vmem:[%s486_s3] sm:$0xff] %v312_v38   ;;  %v258_v43 = vadd.f32 %v255_v40, %v254_v37  ;;  %319 = vst [vmem:[%s486_s3 + $0x8] sm:$0xff] %v317_v41   ;;  %v246_v44 = vadd.f32 %v245_v39, %v219_v34 }
  0xf1   :  { %v247_v45 = vadd.f32 %v246_v44, %v222_v36  ;;  %v259_v47 = vadd.f32 %v258_v43, %v256_v42 }
  0xf3   :  { %v248_v48 = vrot.slane %v247_v45, 4  ;;  %v260_v49 = vadd.f32 %v259_v47, %v257_v46 }
  0xf5   :  { %v249_v50 = vadd.f32 %v248_v48, %v247_v45  ;;  %v261_v51 = vrot.slane %v260_v49, 4 }
  0xf7   :  { %v250_v52 = vrot.slane %v249_v50, 2  ;;  %v262_v53 = vadd.f32 %v261_v51, %v260_v49 }
  0xf9   :  { %v251_v54 = vadd.f32 %v250_v52, %v249_v50  ;;  %v263_v55 = vrot.slane %v262_v53, 2 }
  0xfb   :  { %v252_v56 = vrot.slane %v251_v54, 1  ;;  %v264_v57 = vadd.f32 %v263_v55, %v262_v53 }
  0xfd   :  { %v265_v58 = vrot.slane %v264_v57, 1  ;;  %v253_v59 = vadd.f32 %v252_v56, %v251_v54 }
  0xff   :  { %v266_v60 = vadd.f32 %v265_v58, %v264_v57 }
 0x101   :  { %v268_v61 = vsel %vm267_vm0, %v253_v59, %v266_v60 }
 0x102   :  { %v270_v62 = vsel %vm269_vm1, %v268_v61, 0.0 }
 0x103   :  { %271 = vst [vmem:[%s487_s4] sm:$0xff] %v270_v62 }

// kernel: generator_forward.27
= control target key start
LH: loop header
LB: loop body
LE: loop exit
PB: predicated region body
PF: predicated region fallthrough
CT: control target
= control target key end

     0   :  { %vm172_vm0 = vcmask 257024   ;;  %s416_s0 = inlined_call_operand.vmem [shape: bf16[128,32], index: 0, kind: input, shape index: {}]   ;;  %s417_s1 = inlined_call_operand.vmem [shape: f32[1,32], index: 1, kind: input, shape index: {}]   ;;  %s418_s2 = inlined_call_operand.vmem [shape: f32[1,32], index: 2, kind: input, shape index: {}]   ;;  %s419_s3 = inlined_call_operand.vmem [shape: bf16[128,32], index: 3, kind: output, shape index: {}]  }
   0x1   :  { %v228_v0 = vld [vmem:[%s416_s0] sm:$0xff]   ;;  %v259_v4 = vld [vmem:[%s416_s0 + $0x8] sm:$0xff]   ;;  %v260_v5 = vld [vmem:[%s416_s0 + $0x10] sm:$0xff]  }
   0x2   :  { %v292_v1 = vld [vmem:[%s417_s1] ss:$0 sm:$0xff]  ;;  %v229_v2 = vunpack.c.l.bf16 %v228_v0  ;;  %v230_v3 = vunpack.c.h.bf16 %v228_v0  ;;  %v261_v6 = vld [vmem:[%s416_s0 + $0x18] sm:$0xff]   ;;  %v233_v8 = vunpack.c.l.bf16 %v259_v4  ;;  %v234_v9 = vunpack.c.h.bf16 %v259_v4  ;;  %v263_v41 = vld [vmem:[%s416_s0 + $0x28] sm:$0xff]  }
   0x3   :  { %v306_v7 = vld [vmem:[%s418_s2] ss:$0 sm:$0xff]  ;;  %v237_v10 = vunpack.c.l.bf16 %v260_v5  ;;  %v238_v11 = vunpack.c.h.bf16 %v260_v5  ;;  %v241_v14 = vunpack.c.l.bf16 %v261_v6  ;;  %v242_v15 = vunpack.c.h.bf16 %v261_v6  ;;  %v264_v42 = vld [vmem:[%s416_s0 + $0x30] sm:$0xff]   ;;  %v265_v47 = vld [vmem:[%s416_s0 + $0x38] sm:$0xff]  }
   0x4   :  { %v53_v12 = vmul.f32 %v229_v2, %v292_v1  ;;  %v54_v13 = vmul.f32 %v230_v3, %v292_v1  ;;  %v55_v16 = vmul.f32 %v233_v8, %v292_v1  ;;  %v56_v17 = vmul.f32 %v234_v9, %v292_v1  ;;  %v262_v36 = vld [vmem:[%s416_s0 + $0x20] sm:$0xff]  }
   0x5   :  { %v57_v18 = vmul.f32 %v237_v10, %v292_v1  ;;  %v58_v19 = vmul.f32 %v238_v11, %v292_v1  ;;  %v59_v22 = vmul.f32 %v241_v14, %v292_v1  ;;  %v60_v23 = vmul.f32 %v242_v15, %v292_v1 }
   0x6   :  { %v76_v20 = vadd.f32 %v306_v7, %v53_v12  ;;  %v77_v21 = vadd.f32 %v306_v7, %v54_v13  ;;  %v78_v24 = vadd.f32 %v306_v7, %v55_v16  ;;  %v79_v25 = vadd.f32 %v306_v7, %v56_v17 }
   0x7   :  { %v80_v26 = vadd.f32 %v306_v7, %v57_v18  ;;  %v81_v27 = vadd.f32 %v306_v7, %v58_v19  ;;  %v82_v30 = vadd.f32 %v306_v7, %v59_v22  ;;  %v83_v31 = vadd.f32 %v306_v7, %v60_v23 }
   0x8   :  { %v92_v28 = vmax.f32 %v76_v20, 0.0  ;;  %v93_v29 = vmax.f32 %v77_v21, 0.0  ;;  %v94_v32 = vmax.f32 %v78_v24, 0.0  ;;  %v95_v33 = vmax.f32 %v79_v25, 0.0 }
   0x9   :  { %v96_v34 = vmax.f32 %v80_v26, 0.0  ;;  %v97_v35 = vmax.f32 %v81_v27, 0.0  ;;  %v98_v39 = vmax.f32 %v82_v30, 0.0  ;;  %v99_v40 = vmax.f32 %v83_v31, 0.0 }
   0xa   :  { %v211_v37 = vpack.c.bf16 %v92_v28, %v92_v28  ;;  %v212_v38 = vpack.c.bf16 %v93_v29, %v93_v29  ;;  %v213_v43 = vpack.c.bf16 %v94_v32, %v94_v32  ;;  %v214_v44 = vpack.c.bf16 %v95_v33, %v95_v33 }
   0xb   :  { %v215_v45 = vpack.c.bf16 %v96_v34, %v96_v34  ;;  %v216_v46 = vpack.c.bf16 %v97_v35, %v97_v35  ;;  %v217_v48 = vpack.c.bf16 %v98_v39, %v98_v39  ;;  %v218_v49 = vpack.c.bf16 %v99_v40, %v99_v40 }
   0xc   :  { %173 = vst.msk [vmem:[%s419_s3] sm:$0xf] %vm172_vm0, %v211_v37  ;;  %174 = vst.msk [vmem:[%s419_s3 + $0x4] sm:$0xf] %vm172_vm0, %v212_v38  ;;  %v245_v50 = vunpack.c.l.bf16 %v262_v36  ;;  %v246_v51 = vunpack.c.h.bf16 %v262_v36  ;;  %v249_v52 = vunpack.c.l.bf16 %v263_v41  ;;  %v250_v53 = vunpack.c.h.bf16 %v263_v41 }
   0xd   :  { %175 = vst.msk [vmem:[%s419_s3 + $0x8] sm:$0xf] %vm172_vm0, %v213_v43  ;;  %176 = vst.msk [vmem:[%s419_s3 + $0xc] sm:$0xf] %vm172_vm0, %v214_v44  ;;  %v253_v54 = vunpack.c.l.bf16 %v264_v42  ;;  %v254_v55 = vunpack.c.h.bf16 %v264_v42  ;;  %v257_v58 = vunpack.c.l.bf16 %v265_v47  ;;  %v258_v59 = vunpack.c.h.bf16 %v265_v47 }
   0xe   :  { %177 = vst.msk [vmem:[%s419_s3 + $0x10] sm:$0xf] %vm172_vm0, %v215_v45  ;;  %178 = vst.msk [vmem:[%s419_s3 + $0x14] sm:$0xf] %vm172_vm0, %v216_v46  ;;  %v61_v56 = vmul.f32 %v245_v50, %v292_v1  ;;  %v62_v57 = vmul.f32 %v246_v51, %v292_v1  ;;  %v63_v60 = vmul.f32 %v249_v52, %v292_v1 }
   0xf   :  { %179 = vst.msk [vmem:[%s419_s3 + $0x18] sm:$0xf] %vm172_vm0, %v217_v48  ;;  %180 = vst.msk [vmem:[%s419_s3 + $0x1c] sm:$0xf] %vm172_vm0, %v218_v49  ;;  %v64_v61 = vmul.f32 %v250_v53, %v292_v1  ;;  %v65_v62 = vmul.f32 %v253_v54, %v292_v1  ;;  %v66_v63 = vmul.f32 %v254_v55, %v292_v1 }
  0x10   :  { %v84_v0 = vadd.f32 %v306_v7, %v61_v56  ;;  %v85_v2 = vadd.f32 %v306_v7, %v62_v57  ;;  %v67_v3 = vmul.f32 %v257_v58, %v292_v1  ;;  %v68_v4 = vmul.f32 %v258_v59, %v292_v1 }
  0x11   :  { %v86_v5 = vadd.f32 %v306_v7, %v63_v60  ;;  %v87_v6 = vadd.f32 %v306_v7, %v64_v61  ;;  %v88_v8 = vadd.f32 %v306_v7, %v65_v62  ;;  %v89_v9 = vadd.f32 %v306_v7, %v66_v63 }
  0x12   :  { %v100_v10 = vmax.f32 %v84_v0, 0.0  ;;  %v101_v11 = vmax.f32 %v85_v2, 0.0  ;;  %v90_v12 = vadd.f32 %v306_v7, %v67_v3  ;;  %v91_v13 = vadd.f32 %v306_v7, %v68_v4 }
  0x13   :  { %v102_v14 = vmax.f32 %v86_v5, 0.0  ;;  %v103_v15 = vmax.f32 %v87_v6, 0.0  ;;  %v104_v16 = vmax.f32 %v88_v8, 0.0  ;;  %v105_v17 = vmax.f32 %v89_v9, 0.0 }
  0x14   :  { %v219_v18 = vpack.c.bf16 %v100_v10, %v100_v10  ;;  %v220_v1 = vpack.c.bf16 %v101_v11, %v101_v11  ;;  %v106_v19 = vmax.f32 %v90_v12, 0.0  ;;  %v107_v20 = vmax.f32 %v91_v13, 0.0 }
  0x15   :  { %v221_v21 = vpack.c.bf16 %v102_v14, %v102_v14  ;;  %v222_v22 = vpack.c.bf16 %v103_v15, %v103_v15  ;;  %v223_v23 = vpack.c.bf16 %v104_v16, %v104_v16  ;;  %v224_v24 = vpack.c.bf16 %v105_v17, %v105_v17 }
  0x16   :  { %181 = vst.msk [vmem:[%s419_s3 + $0x20] sm:$0xf] %vm172_vm0, %v219_v18  ;;  %182 = vst.msk [vmem:[%s419_s3 + $0x24] sm:$0xf] %vm172_vm0, %v220_v1  ;;  %v225_v7 = vpack.c.bf16 %v106_v19, %v106_v19  ;;  %v226_v25 = vpack.c.bf16 %v107_v20, %v107_v20 }
  0x17   :  { %183 = vst.msk [vmem:[%s419_s3 + $0x28] sm:$0xf] %vm172_vm0, %v221_v21  ;;  %184 = vst.msk [vmem:[%s419_s3 + $0x2c] sm:$0xf] %vm172_vm0, %v222_v22 }
  0x18   :  { %185 = vst.msk [vmem:[%s419_s3 + $0x30] sm:$0xf] %vm172_vm0, %v223_v23  ;;  %186 = vst.msk [vmem:[%s419_s3 + $0x34] sm:$0xf] %vm172_vm0, %v224_v24 }
  0x19   :  { %187 = vst.msk [vmem:[%s419_s3 + $0x38] sm:$0xf] %vm172_vm0, %v225_v7  ;;  %188 = vst.msk [vmem:[%s419_s3 + $0x3c] sm:$0xf] %vm172_vm0, %v226_v25 }

// kernel: generator_forward.28
= control target key start
LH: loop header
LB: loop body
LE: loop exit
PB: predicated region body
PF: predicated region fallthrough
CT: control target
= control target key end

     0   :  { %vm387_vm0 = vcmask 1040384   ;;  %vm389_vm1 = vcmask 1041408   ;;  %s691_s1 = inlined_call_operand.vmem [shape: bf16[128,128], index: 1, kind: input, shape index: {}]   ;;  %s692_s0 = inlined_call_operand.vmem [shape: bf16[128,128], index: 0, kind: input, shape index: {}]   ;;  %s693_s2 = inlined_call_operand.vmem [shape: f32[1,128], index: 2, kind: input, shape index: {}]   ;;  %s694_s3 = inlined_call_operand.vmem [shape: bf16[128,128], index: 3, kind: output, shape index: {0}]   ;;  %s695_s4 = inlined_call_operand.vmem [shape: f32[8,128], index: 4, kind: output, shape index: {1}]  }
   0x1   :  { %v560_v0 = vld [vmem:[%s691_s1 + $0x38] sm:$0xff]   ;;  %v561_v1 = vld [vmem:[%s691_s1 + $0x30] sm:$0xff]   ;;  %v562_v2 = vld [vmem:[%s691_s1 + $0x28] sm:$0xff]  }
   0x2   :  { %512 = vmatprep.subr.bf16.mxu0 %v560_v0  ;;  %544 = vmatprep.subr.bf16.mxu1 %v560_v0  ;;  %v563_v3 = vld [vmem:[%s691_s1 + $0x20] sm:$0xff]   ;;  %v564_v5 = vld [vmem:[%s691_s1 + $0x18] sm:$0xff]   ;;  %v565_v7 = vld [vmem:[%s691_s1 + $0x10] sm:$0xff]  }
   0x3   :  { %513 = vmatpush3.bf16.msra.mxu0 %v560_v0  ;;  %552 = vmatpush3.bf16.msra.mxu1 %v560_v0  ;;  %v568_v4 = vld [vmem:[%s692_s0] sm:$0xff]   ;;  %v566_v8 = vld [vmem:[%s691_s1 + $0x8] sm:$0xff]   ;;  %v570_v12 = vld [vmem:[%s692_s0 + $0x10] sm:$0xff]  }
   0x4   :  { %514 = vmatprep.subr.bf16.mxu0 %v561_v1  ;;  %545 = vmatprep.subr.bf16.mxu1 %v561_v1  ;;  %v572_v6 = vld [vmem:[%s692_s0 + $0x20] sm:$0xff]   ;;  %v569_v10 = vld [vmem:[%s692_s0 + $0x8] sm:$0xff]   ;;  %v574_v13 = vld [vmem:[%s692_s0 + $0x30] sm:$0xff]  }
   0x5   :  { %528 = vmatprep.mubr.bf16.mxu0 %v568_v4  ;;  %536 = vmatprep.mubr.bf16.mxu1 %v572_v6  ;;  %v567_v9 = vld [vmem:[%s691_s1] sm:$0xff]   ;;  %v573_v11 = vld [vmem:[%s692_s0 + $0x28] sm:$0xff]   ;;  %v571_v14 = vld [vmem:[%s692_s0 + $0x18] sm:$0xff]  }
   0x6   :  { %v575_v15 = vld [vmem:[%s692_s0 + $0x38] sm:$0xff]   ;;  %v400_v18 = vld [vmem:[%s693_s2] ss:$0 sm:$0xff] }
   0x7   :  { %515 = vmatpush3.bf16.msra.mxu0 %v561_v1  ;;  %553 = vmatpush3.bf16.msra.mxu1 %v561_v1 }
   0x8   :  { %516 = vmatprep.subr.bf16.mxu0 %v562_v2  ;;  %546 = vmatprep.subr.bf16.mxu1 %v562_v2 }
   0xb   :  { %517 = vmatpush3.bf16.msra.mxu0 %v562_v2  ;;  %554 = vmatpush3.bf16.msra.mxu1 %v562_v2 }
   0xc   :  { %518 = vmatprep.subr.bf16.mxu0 %v563_v3  ;;  %547 = vmatprep.subr.bf16.mxu1 %v563_v3 }
   0xf   :  { %519 = vmatpush3.bf16.msra.mxu0 %v563_v3  ;;  %555 = vmatpush3.bf16.msra.mxu1 %v563_v3 }
  0x10   :  { %520 = vmatprep.subr.bf16.mxu0 %v564_v5  ;;  %548 = vmatprep.subr.bf16.mxu1 %v564_v5 }
  0x13   :  { %521 = vmatpush3.bf16.msra.mxu0 %v564_v5  ;;  %556 = vmatpush3.bf16.msra.mxu1 %v564_v5 }
  0x14   :  { %522 = vmatprep.subr.bf16.mxu0 %v565_v7  ;;  %549 = vmatprep.subr.bf16.mxu1 %v565_v7 }
  0x17   :  { %523 = vmatpush3.bf16.msra.mxu0 %v565_v7  ;;  %557 = vmatpush3.bf16.msra.mxu1 %v565_v7 }
  0x18   :  { %524 = vmatprep.subr.bf16.mxu0 %v566_v8  ;;  %550 = vmatprep.subr.bf16.mxu1 %v566_v8 }
  0x1b   :  { %525 = vmatpush3.bf16.msra.mxu0 %v566_v8  ;;  %558 = vmatpush3.bf16.msra.mxu1 %v566_v8 }
  0x1c   :  { %526 = vmatprep.subr.bf16.mxu0 %v567_v9  ;;  %551 = vmatprep.subr.bf16.mxu1 %v567_v9 }
  0x1f   :  { %527 = vmatpush3.bf16.msra.mxu0 %v567_v9  ;;  %559 = vmatpush3.bf16.msra.mxu1 %v567_v9 }
  0x22   :  { %529 = vmatmul.mubr.bf16.vlgmr.msra.gmra.mxu0 %v569_v10  ;;  %537 = vmatmul.mubr.bf16.vlgmr.msra.gmra.mxu1 %v573_v11 }
  0x23   :  { %532 = vmatprep.mubr.bf16.mxu0 %v570_v12  ;;  %540 = vmatprep.mubr.bf16.mxu1 %v574_v13 }
  0x2a   :  { %533 = vmatmul.mubr.bf16.gmra.mxu0 %v571_v14  ;;  %541 = vmatmul.mubr.bf16.gmra.mxu1 %v575_v15 }
  0xe2   :  { %v530_v16 = vpop.f32.mrf.mxu0  ;;  %v538_v17 = vpop.f32.mrf.mxu1 }
  0xe3   :  { %v652_v21 = vadd.f32 %v538_v17, %v400_v18  ;;  %v195_v24 = vadd.f32 %v530_v16, %v400_v18 }
  0xe4   :  { %v186_v19 = vpop.f32.mrf.mxu0  ;;  %v218_v20 = vpop.f32.mrf.mxu1 }
  0xe5   :  { %v187_v25 = vadd.f32 %v400_v18, %v186_v19  ;;  %v219_v29 = vadd.f32 %v400_v18, %v218_v20  ;;  %v352_v44 = vmul.f32 %v195_v24, %v195_v24  ;;  %v360_v20 = vmul.f32 %v652_v21, %v652_v21 }
  0xe6   :  { %v531_v22 = vpop.f32.mrf.mxu0  ;;  %v539_v23 = vpop.f32.mrf.mxu1 }
  0xe7   :  { %v198_v26 = vadd.f32 %v531_v22, %v400_v18  ;;  %v654_v27 = vadd.f32 %v539_v23, %v400_v18  ;;  %v350_v37 = vmul.f32 %v187_v25, %v187_v25  ;;  %v358_v14 = vmul.f32 %v219_v29, %v219_v29 }
  0xe8   :  { %v189_v28 = vpop.f32.mrf.mxu0  ;;  %v221_v30 = vpop.f32.mrf.mxu1 }
  0xe9   :  { %v457_v31 = vpack.c.bf16 %v198_v26, %v195_v24  ;;  %v190_v32 = vadd.f32 %v400_v18, %v189_v28  ;;  %v477_v33 = vpack.c.bf16 %v654_v27, %v652_v21  ;;  %v222_v35 = vadd.f32 %v400_v18, %v221_v30 }
  0xea   :  { %v534_v34 = vpop.f32.mrf.mxu0  ;;  %v542_v36 = vpop.f32.mrf.mxu1  ;;  %v353_v48 = vmul.f32 %v198_v26, %v198_v26 }
  0xeb   :  { %489 = vst [vmem:[%s694_s3 + $0x8] sm:$0xff] %v457_v31   ;;  %v452_v38 = vpack.c.bf16 %v190_v32, %v187_v25  ;;  %v329_v39 = vadd.f32 %v190_v32, %v187_v25  ;;  %v351_v40 = vmul.f32 %v190_v32, %v190_v32  ;;  %493 = vst [vmem:[%s694_s3 + $0x28] sm:$0xff] %v477_v33  }
  0xec   :  { %v202_v41 = vpop.f32.mrf.mxu0  ;;  %v472_v42 = vpack.c.bf16 %v222_v35, %v219_v29  ;;  %v234_v43 = vpop.f32.mrf.mxu1  ;;  %v243_v50 = vadd.f32 %v542_v36, %v400_v18  ;;  %v211_v53 = vadd.f32 %v534_v34, %v400_v18 }
  0xed   :  { %453 = vst [vmem:[%s694_s3] sm:$0xff] %v452_v38   ;;  %v330_v45 = vadd.f32 %v329_v39, %v195_v24  ;;  %v366_v46 = vadd.f32 %v351_v40, %v350_v37  ;;  %v203_v47 = vadd.f32 %v400_v18, %v202_v41  ;;  %v235_v57 = vadd.f32 %v400_v18, %v234_v43 }
  0xee   :  { %v535_v49 = vpop.f32.mrf.mxu0  ;;  %492 = vst [vmem:[%s694_s3 + $0x20] sm:$0xff] %v472_v42   ;;  %v543_v51 = vpop.f32.mrf.mxu1  ;;  %v356_v8 = vmul.f32 %v211_v53, %v211_v53  ;;  %v361_v24 = vmul.f32 %v654_v27, %v654_v27  ;;  %v364_v34 = vmul.f32 %v243_v50, %v243_v50 }
  0xef   :  { %v367_v52 = vadd.f32 %v366_v46, %v352_v44  ;;  %v331_v54 = vadd.f32 %v330_v45, %v198_v26  ;;  %v214_v55 = vadd.f32 %v535_v49, %v400_v18  ;;  %v246_v58 = vadd.f32 %v543_v51, %v400_v18 }
  0xf0   :  { %v205_v56 = vpop.f32.mrf.mxu0  ;;  %v237_v59 = vpop.f32.mrf.mxu1  ;;  %v354_v61 = vmul.f32 %v203_v47, %v203_v47  ;;  %v362_v30 = vmul.f32 %v235_v57, %v235_v57 }
  0xf1   :  { %v332_v60 = vadd.f32 %v331_v54, %v203_v47  ;;  %v368_v62 = vadd.f32 %v367_v52, %v353_v48  ;;  %v467_v63 = vpack.c.bf16 %v214_v55, %v211_v53  ;;  %v206_v0 = vadd.f32 %v400_v18, %v205_v56 }
  0xf2   :  { %v487_v1 = vpack.c.bf16 %v246_v58, %v243_v50  ;;  %v238_v2 = vadd.f32 %v400_v18, %v237_v59  ;;  %v357_v11 = vmul.f32 %v214_v55, %v214_v55  ;;  %v359_v18 = vmul.f32 %v222_v35, %v222_v35 }
  0xf3   :  { %v369_v3 = vadd.f32 %v368_v62, %v354_v61  ;;  %491 = vst [vmem:[%s694_s3 + $0x18] sm:$0xff] %v467_v63   ;;  %v462_v4 = vpack.c.bf16 %v206_v0, %v203_v47  ;;  %v333_v5 = vadd.f32 %v332_v60, %v206_v0  ;;  %v355_v6 = vmul.f32 %v206_v0, %v206_v0 }
  0xf4   :  { %495 = vst [vmem:[%s694_s3 + $0x38] sm:$0xff] %v487_v1   ;;  %v482_v7 = vpack.c.bf16 %v238_v2, %v235_v57  ;;  %v363_v33 = vmul.f32 %v238_v2, %v238_v2  ;;  %v365_v37 = vmul.f32 %v246_v58, %v246_v58 }
  0xf5   :  { %490 = vst [vmem:[%s694_s3 + $0x10] sm:$0xff] %v462_v4   ;;  %v334_v9 = vadd.f32 %v333_v5, %v211_v53  ;;  %v370_v10 = vadd.f32 %v369_v3, %v355_v6 }
  0xf6   :  { %494 = vst [vmem:[%s694_s3 + $0x30] sm:$0xff] %v482_v7  }
  0xf7   :  { %v371_v12 = vadd.f32 %v370_v10, %v356_v8  ;;  %v335_v13 = vadd.f32 %v334_v9, %v214_v55 }
  0xf9   :  { %v336_v15 = vadd.f32 %v335_v13, %v219_v29  ;;  %v372_v16 = vadd.f32 %v371_v12, %v357_v11 }
  0xfb   :  { %v337_v17 = vadd.f32 %v336_v15, %v222_v35  ;;  %v373_v19 = vadd.f32 %v372_v16, %v358_v14 }
  0xfd   :  { %v338_v22 = vadd.f32 %v337_v17, %v652_v21  ;;  %v374_v23 = vadd.f32 %v373_v19, %v359_v18 }
  0xff   :  { %v375_v25 = vadd.f32 %v374_v23, %v360_v20  ;;  %v339_v26 = vadd.f32 %v338_v22, %v654_v27 }
 0x101   :  { %v340_v28 = vadd.f32 %v339_v26, %v235_v57  ;;  %v376_v31 = vadd.f32 %v375_v25, %v361_v24 }
 0x103   :  { %v377_v29 = vadd.f32 %v376_v31, %v362_v30  ;;  %v341_v32 = vadd.f32 %v340_v28, %v238_v2 }
 0x105   :  { %v342_v35 = vadd.f32 %v341_v32, %v243_v50  ;;  %v378_v36 = vadd.f32 %v377_v29, %v363_v33 }
 0x107   :  { %v343_v38 = vadd.f32 %v342_v35, %v246_v58  ;;  %v379_v39 = vadd.f32 %v378_v36, %v364_v34 }
 0x109   :  { %v344_v21 = vrot.slane %v343_v38, 4  ;;  %v380_v40 = vadd.f32 %v379_v39, %v365_v37 }
 0x10b   :  { %v345_v41 = vadd.f32 %v344_v21, %v343_v38  ;;  %v381_v42 = vrot.slane %v380_v40, 4 }
 0x10d   :  { %v346_v43 = vrot.slane %v345_v41, 2  ;;  %v382_v44 = vadd.f32 %v381_v42, %v380_v40 }
 0x10f   :  { %v347_v45 = vadd.f32 %v346_v43, %v345_v41  ;;  %v383_v27 = vrot.slane %v382_v44, 2 }
 0x111   :  { %v348_v46 = vrot.slane %v347_v45, 1  ;;  %v384_v47 = vadd.f32 %v383_v27, %v382_v44 }
 0x113   :  { %v385_v48 = vrot.slane %v384_v47, 1  ;;  %v349_v49 = vadd.f32 %v348_v46, %v347_v45 }
 0x115   :  { %v386_v51 = vadd.f32 %v385_v48, %v384_v47 }
 0x117   :  { %v388_v50 = vsel %vm387_vm0, %v349_v49, %v386_v51 }
 0x118   :  { %v390_v52 = vsel %vm389_vm1, %v388_v50, 0.0 }
 0x119   :  { %391 = vst [vmem:[%s695_s4] sm:$0xff] %v390_v52 }

// kernel: generator_forward.32
= control target key start
LH: loop header
LB: loop body
LE: loop exit
PB: predicated region body
PF: predicated region fallthrough
CT: control target
= control target key end

     0   :  { %vm604_vm0 = vcmask 125952   ;;  %s1472_s0 = inlined_call_operand.vmem [shape: bf16[512,16], index: 0, kind: input, shape index: {}]   ;;  %s1473_s1 = inlined_call_operand.vmem [shape: f32[1,16], index: 1, kind: input, shape index: {}]   ;;  %s1474_s2 = inlined_call_operand.vmem [shape: f32[1,16], index: 2, kind: input, shape index: {}]   ;;  %s1475_s3 = inlined_call_operand.vmem [shape: bf16[512,16], index: 3, kind: output, shape index: {}]  }
   0x1   :  { %v804_v0 = vld [vmem:[%s1472_s0] sm:$0xff]   ;;  %v931_v4 = vld [vmem:[%s1472_s0 + $0x8] sm:$0xff]   ;;  %v932_v5 = vld [vmem:[%s1472_s0 + $0x10] sm:$0xff]  }
   0x2   :  { %v988_v1 = vld [vmem:[%s1473_s1] ss:$0 sm:$0xff]  ;;  %v805_v2 = vunpack.c.l.bf16 %v804_v0  ;;  %v806_v3 = vunpack.c.h.bf16 %v804_v0  ;;  %v933_v6 = vld [vmem:[%s1472_s0 + $0x18] sm:$0xff]   ;;  %v809_v8 = vunpack.c.l.bf16 %v931_v4  ;;  %v810_v9 = vunpack.c.h.bf16 %v931_v4  ;;  %v935_v41 = vld [vmem:[%s1472_s0 + $0x28] sm:$0xff]  }
   0x3   :  { %v1002_v7 = vld [vmem:[%s1474_s2] ss:$0 sm:$0xff]  ;;  %v813_v10 = vunpack.c.l.bf16 %v932_v5  ;;  %v814_v11 = vunpack.c.h.bf16 %v932_v5  ;;  %v817_v14 = vunpack.c.l.bf16 %v933_v6  ;;  %v818_v15 = vunpack.c.h.bf16 %v933_v6  ;;  %v936_v42 = vld [vmem:[%s1472_s0 + $0x30] sm:$0xff]   ;;  %v937_v47 = vld [vmem:[%s1472_s0 + $0x38] sm:$0xff]  }
   0x4   :  { %v149_v12 = vmul.f32 %v805_v2, %v988_v1  ;;  %v150_v13 = vmul.f32 %v806_v3, %v988_v1  ;;  %v151_v16 = vmul.f32 %v809_v8, %v988_v1  ;;  %v152_v17 = vmul.f32 %v810_v9, %v988_v1  ;;  %v934_v36 = vld [vmem:[%s1472_s0 + $0x20] sm:$0xff]  }
   0x5   :  { %v153_v18 = vmul.f32 %v813_v10, %v988_v1  ;;  %v154_v19 = vmul.f32 %v814_v11, %v988_v1  ;;  %v155_v22 = vmul.f32 %v817_v14, %v988_v1  ;;  %v156_v23 = vmul.f32 %v818_v15, %v988_v1 }
   0x6   :  { %v220_v20 = vadd.f32 %v1002_v7, %v149_v12  ;;  %v221_v21 = vadd.f32 %v1002_v7, %v150_v13  ;;  %v222_v24 = vadd.f32 %v1002_v7, %v151_v16  ;;  %v223_v25 = vadd.f32 %v1002_v7, %v152_v17 }
   0x7   :  { %v224_v26 = vadd.f32 %v1002_v7, %v153_v18  ;;  %v225_v27 = vadd.f32 %v1002_v7, %v154_v19  ;;  %v226_v30 = vadd.f32 %v1002_v7, %v155_v22  ;;  %v227_v31 = vadd.f32 %v1002_v7, %v156_v23  ;;  %v938_v18 = vld [vmem:[%s1472_s0 + $0x40] sm:$0xff]   ;;  %v939_v23 = vld [vmem:[%s1472_s0 + $0x48] sm:$0xff]  }
   0x8   :  { %v284_v28 = vmax.f32 %v220_v20, 0.0  ;;  %v285_v29 = vmax.f32 %v221_v21, 0.0  ;;  %v286_v32 = vmax.f32 %v222_v24, 0.0  ;;  %v287_v33 = vmax.f32 %v223_v25, 0.0  ;;  %v940_v24 = vld [vmem:[%s1472_s0 + $0x50] sm:$0xff]  }
   0x9   :  { %v288_v34 = vmax.f32 %v224_v26, 0.0  ;;  %v289_v35 = vmax.f32 %v225_v27, 0.0  ;;  %v290_v39 = vmax.f32 %v226_v30, 0.0  ;;  %v291_v40 = vmax.f32 %v227_v31, 0.0 }
   0xa   :  { %v739_v37 = vpack.c.bf16 %v284_v28, %v284_v28  ;;  %v740_v38 = vpack.c.bf16 %v285_v29, %v285_v29  ;;  %v741_v43 = vpack.c.bf16 %v286_v32, %v286_v32  ;;  %v742_v44 = vpack.c.bf16 %v287_v33, %v287_v33  ;;  %v941_v29 = vld [vmem:[%s1472_s0 + $0x58] sm:$0xff]  }
   0xb   :  { %v743_v45 = vpack.c.bf16 %v288_v34, %v288_v34  ;;  %v744_v46 = vpack.c.bf16 %v289_v35, %v289_v35  ;;  %v745_v48 = vpack.c.bf16 %v290_v39, %v290_v39  ;;  %v746_v49 = vpack.c.bf16 %v291_v40, %v291_v40 }
   0xc   :  { %605 = vst.msk [vmem:[%s1475_s3] sm:$0xf] %vm604_vm0, %v739_v37  ;;  %606 = vst.msk [vmem:[%s1475_s3 + $0x4] sm:$0xf] %vm604_vm0, %v740_v38  ;;  %v821_v50 = vunpack.c.l.bf16 %v934_v36  ;;  %v822_v51 = vunpack.c.h.bf16 %v934_v36  ;;  %v825_v52 = vunpack.c.l.bf16 %v935_v41  ;;  %v826_v53 = vunpack.c.h.bf16 %v935_v41 }
   0xd   :  { %607 = vst.msk [vmem:[%s1475_s3 + $0x8] sm:$0xf] %vm604_vm0, %v741_v43  ;;  %608 = vst.msk [vmem:[%s1475_s3 + $0xc] sm:$0xf] %vm604_vm0, %v742_v44  ;;  %v829_v54 = vunpack.c.l.bf16 %v936_v42  ;;  %v830_v55 = vunpack.c.h.bf16 %v936_v42  ;;  %v833_v58 = vunpack.c.l.bf16 %v937_v47  ;;  %v834_v59 = vunpack.c.h.bf16 %v937_v47 }
   0xe   :  { %609 = vst.msk [vmem:[%s1475_s3 + $0x10] sm:$0xf] %vm604_vm0, %v743_v45  ;;  %610 = vst.msk [vmem:[%s1475_s3 + $0x14] sm:$0xf] %vm604_vm0, %v744_v46  ;;  %v157_v56 = vmul.f32 %v821_v50, %v988_v1  ;;  %v158_v57 = vmul.f32 %v822_v51, %v988_v1  ;;  %v159_v60 = vmul.f32 %v825_v52, %v988_v1  ;;  %v837_v32 = vunpack.c.l.bf16 %v938_v18 }
   0xf   :  { %611 = vst.msk [vmem:[%s1475_s3 + $0x18] sm:$0xf] %vm604_vm0, %v745_v48  ;;  %612 = vst.msk [vmem:[%s1475_s3 + $0x1c] sm:$0xf] %vm604_vm0, %v746_v49  ;;  %v160_v61 = vmul.f32 %v826_v53, %v988_v1  ;;  %v161_v62 = vmul.f32 %v829_v54, %v988_v1  ;;  %v162_v63 = vmul.f32 %v830_v55, %v988_v1  ;;  %v838_v33 = vunpack.c.h.bf16 %v938_v18 }
  0x10   :  { %v228_v0 = vadd.f32 %v1002_v7, %v157_v56  ;;  %v229_v2 = vadd.f32 %v1002_v7, %v158_v57  ;;  %v163_v3 = vmul.f32 %v833_v58, %v988_v1  ;;  %v164_v4 = vmul.f32 %v834_v59, %v988_v1 }
  0x11   :  { %v230_v5 = vadd.f32 %v1002_v7, %v159_v60  ;;  %v231_v6 = vadd.f32 %v1002_v7, %v160_v61  ;;  %v232_v8 = vadd.f32 %v1002_v7, %v161_v62  ;;  %v233_v9 = vadd.f32 %v1002_v7, %v162_v63  ;;  %v942_v62 = vld [vmem:[%s1472_s0 + $0x60] sm:$0xff]  }
  0x12   :  { %v292_v10 = vmax.f32 %v228_v0, 0.0  ;;  %v293_v11 = vmax.f32 %v229_v2, 0.0  ;;  %v234_v12 = vadd.f32 %v1002_v7, %v163_v3  ;;  %v235_v13 = vadd.f32 %v1002_v7, %v164_v4  ;;  %v943_v4 = vld [vmem:[%s1472_s0 + $0x68] sm:$0xff]  }
  0x13   :  { %v294_v14 = vmax.f32 %v230_v5, 0.0  ;;  %v295_v15 = vmax.f32 %v231_v6, 0.0  ;;  %v296_v16 = vmax.f32 %v232_v8, 0.0  ;;  %v297_v17 = vmax.f32 %v233_v9, 0.0  ;;  %v944_v5 = vld [vmem:[%s1472_s0 + $0x70] sm:$0xff]  }
  0x14   :  { %v747_v19 = vpack.c.bf16 %v292_v10, %v292_v10  ;;  %v748_v20 = vpack.c.bf16 %v293_v11, %v293_v11  ;;  %v298_v21 = vmax.f32 %v234_v12, 0.0  ;;  %v299_v22 = vmax.f32 %v235_v13, 0.0  ;;  %v945_v11 = vld [vmem:[%s1472_s0 + $0x78] sm:$0xff]  }
  0x15   :  { %v749_v25 = vpack.c.bf16 %v294_v14, %v294_v14  ;;  %v750_v26 = vpack.c.bf16 %v295_v15, %v295_v15  ;;  %v751_v27 = vpack.c.bf16 %v296_v16, %v296_v16  ;;  %v752_v28 = vpack.c.bf16 %v297_v17, %v297_v17 }
  0x16   :  { %613 = vst.msk [vmem:[%s1475_s3 + $0x20] sm:$0xf] %vm604_vm0, %v747_v19  ;;  %614 = vst.msk [vmem:[%s1475_s3 + $0x24] sm:$0xf] %vm604_vm0, %v748_v20  ;;  %v753_v30 = vpack.c.bf16 %v298_v21, %v298_v21  ;;  %v754_v31 = vpack.c.bf16 %v299_v22, %v299_v22  ;;  %v841_v34 = vunpack.c.l.bf16 %v939_v23  ;;  %v842_v35 = vunpack.c.h.bf16 %v939_v23 }
  0x17   :  { %615 = vst.msk [vmem:[%s1475_s3 + $0x28] sm:$0xf] %vm604_vm0, %v749_v25  ;;  %616 = vst.msk [vmem:[%s1475_s3 + $0x2c] sm:$0xf] %vm604_vm0, %v750_v26  ;;  %v845_v36 = vunpack.c.l.bf16 %v940_v24  ;;  %v846_v37 = vunpack.c.h.bf16 %v940_v24  ;;  %v165_v38 = vmul.f32 %v837_v32, %v988_v1  ;;  %v166_v39 = vmul.f32 %v838_v33, %v988_v1 }
  0x18   :  { %617 = vst.msk [vmem:[%s1475_s3 + $0x30] sm:$0xf] %vm604_vm0, %v751_v27  ;;  %618 = vst.msk [vmem:[%s1475_s3 + $0x34] sm:$0xf] %vm604_vm0, %v752_v28  ;;  %v849_v40 = vunpack.c.l.bf16 %v941_v29  ;;  %v850_v41 = vunpack.c.h.bf16 %v941_v29  ;;  %v167_v42 = vmul.f32 %v841_v34, %v988_v1  ;;  %v168_v43 = vmul.f32 %v842_v35, %v988_v1 }
  0x19   :  { %619 = vst.msk [vmem:[%s1475_s3 + $0x38] sm:$0xf] %vm604_vm0, %v753_v30  ;;  %620 = vst.msk [vmem:[%s1475_s3 + $0x3c] sm:$0xf] %vm604_vm0, %v754_v31  ;;  %v169_v44 = vmul.f32 %v845_v36, %v988_v1  ;;  %v170_v45 = vmul.f32 %v846_v37, %v988_v1  ;;  %v236_v46 = vadd.f32 %v1002_v7, %v165_v38  ;;  %v853_v14 = vunpack.c.l.bf16 %v942_v62 }
  0x1a   :  { %v237_v47 = vadd.f32 %v1002_v7, %v166_v39  ;;  %v171_v48 = vmul.f32 %v849_v40, %v988_v1  ;;  %v172_v49 = vmul.f32 %v850_v41, %v988_v1  ;;  %v238_v50 = vadd.f32 %v1002_v7, %v167_v42 }
  0x1b   :  { %v239_v51 = vadd.f32 %v1002_v7, %v168_v43  ;;  %v240_v52 = vadd.f32 %v1002_v7, %v169_v44  ;;  %v241_v53 = vadd.f32 %v1002_v7, %v170_v45  ;;  %v300_v54 = vmax.f32 %v236_v46, 0.0  ;;  %v946_v44 = vld [vmem:[%s1472_s0 + $0x80] sm:$0xff]  }
  0x1c   :  { %v301_v55 = vmax.f32 %v237_v47, 0.0  ;;  %v242_v56 = vadd.f32 %v1002_v7, %v171_v48  ;;  %v243_v57 = vadd.f32 %v1002_v7, %v172_v49  ;;  %v302_v58 = vmax.f32 %v238_v50, 0.0  ;;  %v947_v49 = vld [vmem:[%s1472_s0 + $0x88] sm:$0xff]   ;;  %v948_v50 = vld [vmem:[%s1472_s0 + $0x90] sm:$0xff]  }
  0x1d   :  { %v303_v59 = vmax.f32 %v239_v51, 0.0  ;;  %v304_v60 = vmax.f32 %v240_v52, 0.0  ;;  %v305_v61 = vmax.f32 %v241_v53, 0.0  ;;  %v755_v63 = vpack.c.bf16 %v300_v54, %v300_v54 }
  0x1e   :  { %v756_v0 = vpack.c.bf16 %v301_v55, %v301_v55  ;;  %v306_v2 = vmax.f32 %v242_v56, 0.0  ;;  %v307_v3 = vmax.f32 %v243_v57, 0.0  ;;  %v757_v6 = vpack.c.bf16 %v302_v58, %v302_v58  ;;  %v949_v55 = vld [vmem:[%s1472_s0 + $0x98] sm:$0xff]  }
  0x1f   :  { %v758_v8 = vpack.c.bf16 %v303_v59, %v303_v59  ;;  %v759_v9 = vpack.c.bf16 %v304_v60, %v304_v60  ;;  %v760_v10 = vpack.c.bf16 %v305_v61, %v305_v61  ;;  %621 = vst.msk [vmem:[%s1475_s3 + $0x40] sm:$0xf] %vm604_vm0, %v755_v63  ;;  %v854_v15 = vunpack.c.h.bf16 %v942_v62 }
  0x20   :  { %622 = vst.msk [vmem:[%s1475_s3 + $0x44] sm:$0xf] %vm604_vm0, %v756_v0  ;;  %v761_v12 = vpack.c.bf16 %v306_v2, %v306_v2  ;;  %v762_v13 = vpack.c.bf16 %v307_v3, %v307_v3  ;;  %623 = vst.msk [vmem:[%s1475_s3 + $0x48] sm:$0xf] %vm604_vm0, %v757_v6  ;;  %v857_v16 = vunpack.c.l.bf16 %v943_v4  ;;  %v858_v17 = vunpack.c.h.bf16 %v943_v4 }
  0x21   :  { %624 = vst.msk [vmem:[%s1475_s3 + $0x4c] sm:$0xf] %vm604_vm0, %v758_v8  ;;  %625 = vst.msk [vmem:[%s1475_s3 + $0x50] sm:$0xf] %vm604_vm0, %v759_v9  ;;  %v861_v18 = vunpack.c.l.bf16 %v944_v5  ;;  %v862_v19 = vunpack.c.h.bf16 %v944_v5  ;;  %v173_v20 = vmul.f32 %v853_v14, %v988_v1  ;;  %v174_v21 = vmul.f32 %v854_v15, %v988_v1 }
  0x22   :  { %626 = vst.msk [vmem:[%s1475_s3 + $0x54] sm:$0xf] %vm604_vm0, %v760_v10  ;;  %627 = vst.msk [vmem:[%s1475_s3 + $0x58] sm:$0xf] %vm604_vm0, %v761_v12  ;;  %v865_v22 = vunpack.c.l.bf16 %v945_v11  ;;  %v866_v23 = vunpack.c.h.bf16 %v945_v11  ;;  %v175_v24 = vmul.f32 %v857_v16, %v988_v1  ;;  %v176_v25 = vmul.f32 %v858_v17, %v988_v1 }
  0x23   :  { %628 = vst.msk [vmem:[%s1475_s3 + $0x5c] sm:$0xf] %vm604_vm0, %v762_v13  ;;  %v177_v26 = vmul.f32 %v861_v18, %v988_v1  ;;  %v178_v27 = vmul.f32 %v862_v19, %v988_v1  ;;  %v244_v28 = vadd.f32 %v1002_v7, %v173_v20  ;;  %v245_v29 = vadd.f32 %v1002_v7, %v174_v21 }
  0x24   :  { %v179_v30 = vmul.f32 %v865_v22, %v988_v1  ;;  %v180_v31 = vmul.f32 %v866_v23, %v988_v1  ;;  %v246_v32 = vadd.f32 %v1002_v7, %v175_v24  ;;  %v247_v33 = vadd.f32 %v1002_v7, %v176_v25 }
  0x25   :  { %v248_v34 = vadd.f32 %v1002_v7, %v177_v26  ;;  %v249_v35 = vadd.f32 %v1002_v7, %v178_v27  ;;  %v308_v36 = vmax.f32 %v244_v28, 0.0  ;;  %v309_v37 = vmax.f32 %v245_v29, 0.0  ;;  %v950_v26 = vld [vmem:[%s1472_s0 + $0xa0] sm:$0xff]  }
  0x26   :  { %v250_v38 = vadd.f32 %v1002_v7, %v179_v30  ;;  %v251_v39 = vadd.f32 %v1002_v7, %v180_v31  ;;  %v310_v40 = vmax.f32 %v246_v32, 0.0  ;;  %v311_v41 = vmax.f32 %v247_v33, 0.0  ;;  %v951_v31 = vld [vmem:[%s1472_s0 + $0xa8] sm:$0xff]   ;;  %v952_v32 = vld [vmem:[%s1472_s0 + $0xb0] sm:$0xff]  }
  0x27   :  { %v312_v42 = vmax.f32 %v248_v34, 0.0  ;;  %v313_v43 = vmax.f32 %v249_v35, 0.0  ;;  %v763_v45 = vpack.c.bf16 %v308_v36, %v308_v36  ;;  %v764_v46 = vpack.c.bf16 %v309_v37, %v309_v37  ;;  %v953_v37 = vld [vmem:[%s1472_s0 + $0xb8] sm:$0xff]  }
  0x28   :  { %v314_v47 = vmax.f32 %v250_v38, 0.0  ;;  %v315_v48 = vmax.f32 %v251_v39, 0.0  ;;  %v765_v51 = vpack.c.bf16 %v310_v40, %v310_v40  ;;  %v766_v52 = vpack.c.bf16 %v311_v41, %v311_v41 }
  0x29   :  { %v767_v53 = vpack.c.bf16 %v312_v42, %v312_v42  ;;  %v768_v54 = vpack.c.bf16 %v313_v43, %v313_v43  ;;  %629 = vst.msk [vmem:[%s1475_s3 + $0x60] sm:$0xf] %vm604_vm0, %v763_v45  ;;  %630 = vst.msk [vmem:[%s1475_s3 + $0x64] sm:$0xf] %vm604_vm0, %v764_v46  ;;  %v869_v58 = vunpack.c.l.bf16 %v946_v44  ;;  %v870_v59 = vunpack.c.h.bf16 %v946_v44 }
  0x2a   :  { %v769_v56 = vpack.c.bf16 %v314_v47, %v314_v47  ;;  %v770_v57 = vpack.c.bf16 %v315_v48, %v315_v48  ;;  %631 = vst.msk [vmem:[%s1475_s3 + $0x68] sm:$0xf] %vm604_vm0, %v765_v51  ;;  %632 = vst.msk [vmem:[%s1475_s3 + $0x6c] sm:$0xf] %vm604_vm0, %v766_v52  ;;  %v873_v60 = vunpack.c.l.bf16 %v947_v49  ;;  %v874_v61 = vunpack.c.h.bf16 %v947_v49 }
  0x2b   :  { %633 = vst.msk [vmem:[%s1475_s3 + $0x70] sm:$0xf] %vm604_vm0, %v767_v53  ;;  %634 = vst.msk [vmem:[%s1475_s3 + $0x74] sm:$0xf] %vm604_vm0, %v768_v54  ;;  %v877_v62 = vunpack.c.l.bf16 %v948_v50  ;;  %v878_v63 = vunpack.c.h.bf16 %v948_v50  ;;  %v181_v0 = vmul.f32 %v869_v58, %v988_v1  ;;  %v182_v2 = vmul.f32 %v870_v59, %v988_v1 }
  0x2c   :  { %635 = vst.msk [vmem:[%s1475_s3 + $0x78] sm:$0xf] %vm604_vm0, %v769_v56  ;;  %636 = vst.msk [vmem:[%s1475_s3 + $0x7c] sm:$0xf] %vm604_vm0, %v770_v57  ;;  %v881_v3 = vunpack.c.l.bf16 %v949_v55  ;;  %v882_v4 = vunpack.c.h.bf16 %v949_v55  ;;  %v183_v5 = vmul.f32 %v873_v60, %v988_v1  ;;  %v184_v6 = vmul.f32 %v874_v61, %v988_v1 }
  0x2d   :  { %v185_v8 = vmul.f32 %v877_v62, %v988_v1  ;;  %v186_v9 = vmul.f32 %v878_v63, %v988_v1  ;;  %v252_v10 = vadd.f32 %v1002_v7, %v181_v0  ;;  %v253_v11 = vadd.f32 %v1002_v7, %v182_v2 }
  0x2e   :  { %v187_v12 = vmul.f32 %v881_v3, %v988_v1  ;;  %v188_v13 = vmul.f32 %v882_v4, %v988_v1  ;;  %v254_v14 = vadd.f32 %v1002_v7, %v183_v5  ;;  %v255_v15 = vadd.f32 %v1002_v7, %v184_v6 }
  0x2f   :  { %v256_v16 = vadd.f32 %v1002_v7, %v185_v8  ;;  %v257_v17 = vadd.f32 %v1002_v7, %v186_v9  ;;  %v316_v18 = vmax.f32 %v252_v10, 0.0  ;;  %v317_v19 = vmax.f32 %v253_v11, 0.0  ;;  %v954_v8 = vld [vmem:[%s1472_s0 + $0xc0] sm:$0xff]  }
  0x30   :  { %v258_v20 = vadd.f32 %v1002_v7, %v187_v12  ;;  %v259_v21 = vadd.f32 %v1002_v7, %v188_v13  ;;  %v318_v22 = vmax.f32 %v254_v14, 0.0  ;;  %v319_v23 = vmax.f32 %v255_v15, 0.0  ;;  %v955_v13 = vld [vmem:[%s1472_s0 + $0xc8] sm:$0xff]   ;;  %v956_v14 = vld [vmem:[%s1472_s0 + $0xd0] sm:$0xff]  }
  0x31   :  { %v320_v24 = vmax.f32 %v256_v16, 0.0  ;;  %v321_v25 = vmax.f32 %v257_v17, 0.0  ;;  %v771_v27 = vpack.c.bf16 %v316_v18, %v316_v18  ;;  %v772_v28 = vpack.c.bf16 %v317_v19, %v317_v19  ;;  %v957_v19 = vld [vmem:[%s1472_s0 + $0xd8] sm:$0xff]  }
  0x32   :  { %v322_v29 = vmax.f32 %v258_v20, 0.0  ;;  %v323_v30 = vmax.f32 %v259_v21, 0.0  ;;  %v773_v33 = vpack.c.bf16 %v318_v22, %v318_v22  ;;  %v774_v34 = vpack.c.bf16 %v319_v23, %v319_v23 }
  0x33   :  { %v775_v35 = vpack.c.bf16 %v320_v24, %v320_v24  ;;  %v776_v36 = vpack.c.bf16 %v321_v25, %v321_v25  ;;  %637 = vst.msk [vmem:[%s1475_s3 + $0x80] sm:$0xf] %vm604_vm0, %v771_v27  ;;  %638 = vst.msk [vmem:[%s1475_s3 + $0x84] sm:$0xf] %vm604_vm0, %v772_v28  ;;  %v885_v40 = vunpack.c.l.bf16 %v950_v26  ;;  %v886_v41 = vunpack.c.h.bf16 %v950_v26 }
  0x34   :  { %v777_v38 = vpack.c.bf16 %v322_v29, %v322_v29  ;;  %v778_v39 = vpack.c.bf16 %v323_v30, %v323_v30  ;;  %639 = vst.msk [vmem:[%s1475_s3 + $0x88] sm:$0xf] %vm604_vm0, %v773_v33  ;;  %640 = vst.msk [vmem:[%s1475_s3 + $0x8c] sm:$0xf] %vm604_vm0, %v774_v34  ;;  %v889_v42 = vunpack.c.l.bf16 %v951_v31  ;;  %v890_v43 = vunpack.c.h.bf16 %v951_v31 }
  0x35   :  { %641 = vst.msk [vmem:[%s1475_s3 + $0x90] sm:$0xf] %vm604_vm0, %v775_v35  ;;  %642 = vst.msk [vmem:[%s1475_s3 + $0x94] sm:$0xf] %vm604_vm0, %v776_v36  ;;  %v893_v44 = vunpack.c.l.bf16 %v952_v32  ;;  %v894_v45 = vunpack.c.h.bf16 %v952_v32  ;;  %v189_v46 = vmul.f32 %v885_v40, %v988_v1  ;;  %v190_v47 = vmul.f32 %v886_v41, %v988_v1 }
  0x36   :  { %643 = vst.msk [vmem:[%s1475_s3 + $0x98] sm:$0xf] %vm604_vm0, %v777_v38  ;;  %644 = vst.msk [vmem:[%s1475_s3 + $0x9c] sm:$0xf] %vm604_vm0, %v778_v39  ;;  %v897_v48 = vunpack.c.l.bf16 %v953_v37  ;;  %v898_v49 = vunpack.c.h.bf16 %v953_v37  ;;  %v191_v50 = vmul.f32 %v889_v42, %v988_v1  ;;  %v192_v51 = vmul.f32 %v890_v43, %v988_v1 }
  0x37   :  { %v193_v52 = vmul.f32 %v893_v44, %v988_v1  ;;  %v194_v53 = vmul.f32 %v894_v45, %v988_v1  ;;  %v260_v54 = vadd.f32 %v1002_v7, %v189_v46  ;;  %v261_v55 = vadd.f32 %v1002_v7, %v190_v47 }
  0x38   :  { %v195_v56 = vmul.f32 %v897_v48, %v988_v1  ;;  %v196_v57 = vmul.f32 %v898_v49, %v988_v1  ;;  %v262_v58 = vadd.f32 %v1002_v7, %v191_v50  ;;  %v263_v59 = vadd.f32 %v1002_v7, %v192_v51 }
  0x39   :  { %v264_v60 = vadd.f32 %v1002_v7, %v193_v52  ;;  %v265_v61 = vadd.f32 %v1002_v7, %v194_v53  ;;  %v324_v62 = vmax.f32 %v260_v54, 0.0  ;;  %v325_v63 = vmax.f32 %v261_v55, 0.0  ;;  %v958_v52 = vld [vmem:[%s1472_s0 + $0xe0] sm:$0xff]  }
  0x3a   :  { %v266_v0 = vadd.f32 %v1002_v7, %v195_v56  ;;  %v267_v2 = vadd.f32 %v1002_v7, %v196_v57  ;;  %v326_v3 = vmax.f32 %v262_v58, 0.0  ;;  %v327_v4 = vmax.f32 %v263_v59, 0.0  ;;  %v959_v57 = vld [vmem:[%s1472_s0 + $0xe8] sm:$0xff]   ;;  %v960_v58 = vld [vmem:[%s1472_s0 + $0xf0] sm:$0xff]  }
  0x3b   :  { %v328_v5 = vmax.f32 %v264_v60, 0.0  ;;  %v329_v6 = vmax.f32 %v265_v61, 0.0  ;;  %v779_v9 = vpack.c.bf16 %v324_v62, %v324_v62  ;;  %v780_v10 = vpack.c.bf16 %v325_v63, %v325_v63  ;;  %v961_v63 = vld [vmem:[%s1472_s0 + $0xf8] sm:$0xff]  }
  0x3c   :  { %v330_v11 = vmax.f32 %v266_v0, 0.0  ;;  %v331_v12 = vmax.f32 %v267_v2, 0.0  ;;  %v781_v15 = vpack.c.bf16 %v326_v3, %v326_v3  ;;  %v782_v16 = vpack.c.bf16 %v327_v4, %v327_v4 }
  0x3d   :  { %v783_v17 = vpack.c.bf16 %v328_v5, %v328_v5  ;;  %v784_v18 = vpack.c.bf16 %v329_v6, %v329_v6  ;;  %645 = vst.msk [vmem:[%s1475_s3 + $0xa0] sm:$0xf] %vm604_vm0, %v779_v9  ;;  %646 = vst.msk [vmem:[%s1475_s3 + $0xa4] sm:$0xf] %vm604_vm0, %v780_v10  ;;  %v901_v22 = vunpack.c.l.bf16 %v954_v8  ;;  %v902_v23 = vunpack.c.h.bf16 %v954_v8 }
  0x3e   :  { %v785_v20 = vpack.c.bf16 %v330_v11, %v330_v11  ;;  %v786_v21 = vpack.c.bf16 %v331_v12, %v331_v12  ;;  %647 = vst.msk [vmem:[%s1475_s3 + $0xa8] sm:$0xf] %vm604_vm0, %v781_v15  ;;  %648 = vst.msk [vmem:[%s1475_s3 + $0xac] sm:$0xf] %vm604_vm0, %v782_v16  ;;  %v905_v24 = vunpack.c.l.bf16 %v955_v13  ;;  %v906_v25 = vunpack.c.h.bf16 %v955_v13 }
  0x3f   :  { %649 = vst.msk [vmem:[%s1475_s3 + $0xb0] sm:$0xf] %vm604_vm0, %v783_v17  ;;  %650 = vst.msk [vmem:[%s1475_s3 + $0xb4] sm:$0xf] %vm604_vm0, %v784_v18  ;;  %v909_v26 = vunpack.c.l.bf16 %v956_v14  ;;  %v910_v27 = vunpack.c.h.bf16 %v956_v14  ;;  %v197_v28 = vmul.f32 %v901_v22, %v988_v1  ;;  %v198_v29 = vmul.f32 %v902_v23, %v988_v1 }
  0x40   :  { %651 = vst.msk [vmem:[%s1475_s3 + $0xb8] sm:$0xf] %vm604_vm0, %v785_v20  ;;  %652 = vst.msk [vmem:[%s1475_s3 + $0xbc] sm:$0xf] %vm604_vm0, %v786_v21  ;;  %v913_v30 = vunpack.c.l.bf16 %v957_v19  ;;  %v914_v31 = vunpack.c.h.bf16 %v957_v19  ;;  %v199_v32 = vmul.f32 %v905_v24, %v988_v1  ;;  %v200_v33 = vmul.f32 %v906_v25, %v988_v1 }
  0x41   :  { %v201_v34 = vmul.f32 %v909_v26, %v988_v1  ;;  %v202_v35 = vmul.f32 %v910_v27, %v988_v1  ;;  %v268_v36 = vadd.f32 %v1002_v7, %v197_v28  ;;  %v269_v37 = vadd.f32 %v1002_v7, %v198_v29 }
  0x42   :  { %v203_v38 = vmul.f32 %v913_v30, %v988_v1  ;;  %v204_v39 = vmul.f32 %v914_v31, %v988_v1  ;;  %v270_v40 = vadd.f32 %v1002_v7, %v199_v32  ;;  %v271_v41 = vadd.f32 %v1002_v7, %v200_v33 }
  0x43   :  { %v272_v42 = vadd.f32 %v1002_v7, %v201_v34  ;;  %v273_v43 = vadd.f32 %v1002_v7, %v202_v35  ;;  %v332_v44 = vmax.f32 %v268_v36, 0.0  ;;  %v333_v45 = vmax.f32 %v269_v37, 0.0 }
  0x44   :  { %v274_v46 = vadd.f32 %v1002_v7, %v203_v38  ;;  %v275_v47 = vadd.f32 %v1002_v7, %v204_v39  ;;  %v334_v48 = vmax.f32 %v270_v40, 0.0  ;;  %v335_v49 = vmax.f32 %v271_v41, 0.0 }
  0x45   :  { %v336_v50 = vmax.f32 %v272_v42, 0.0  ;;  %v337_v51 = vmax.f32 %v273_v43, 0.0  ;;  %v787_v53 = vpack.c.bf16 %v332_v44, %v332_v44  ;;  %v788_v54 = vpack.c.bf16 %v333_v45, %v333_v45 }
  0x46   :  { %v338_v55 = vmax.f32 %v274_v46, 0.0  ;;  %v339_v56 = vmax.f32 %v275_v47, 0.0  ;;  %v789_v59 = vpack.c.bf16 %v334_v48, %v334_v48  ;;  %v790_v60 = vpack.c.bf16 %v335_v49, %v335_v49 }
  0x47   :  { %v791_v61 = vpack.c.bf16 %v336_v50, %v336_v50  ;;  %v792_v62 = vpack.c.bf16 %v337_v51, %v337_v51  ;;  %653 = vst.msk [vmem:[%s1475_s3 + $0xc0] sm:$0xf] %vm604_vm0, %v787_v53  ;;  %654 = vst.msk [vmem:[%s1475_s3 + $0xc4] sm:$0xf] %vm604_vm0, %v788_v54  ;;  %v917_v3 = vunpack.c.l.bf16 %v958_v52  ;;  %v918_v4 = vunpack.c.h.bf16 %v958_v52 }
  0x48   :  { %v793_v0 = vpack.c.bf16 %v338_v55, %v338_v55  ;;  %v794_v2 = vpack.c.bf16 %v339_v56, %v339_v56  ;;  %655 = vst.msk [vmem:[%s1475_s3 + $0xc8] sm:$0xf] %vm604_vm0, %v789_v59  ;;  %656 = vst.msk [vmem:[%s1475_s3 + $0xcc] sm:$0xf] %vm604_vm0, %v790_v60  ;;  %v921_v5 = vunpack.c.l.bf16 %v959_v57  ;;  %v922_v6 = vunpack.c.h.bf16 %v959_v57 }
  0x49   :  { %657 = vst.msk [vmem:[%s1475_s3 + $0xd0] sm:$0xf] %vm604_vm0, %v791_v61  ;;  %658 = vst.msk [vmem:[%s1475_s3 + $0xd4] sm:$0xf] %vm604_vm0, %v792_v62  ;;  %v925_v8 = vunpack.c.l.bf16 %v960_v58  ;;  %v926_v9 = vunpack.c.h.bf16 %v960_v58  ;;  %v205_v10 = vmul.f32 %v917_v3, %v988_v1  ;;  %v206_v11 = vmul.f32 %v918_v4, %v988_v1 }
  0x4a   :  { %659 = vst.msk [vmem:[%s1475_s3 + $0xd8] sm:$0xf] %vm604_vm0, %v793_v0  ;;  %660 = vst.msk [vmem:[%s1475_s3 + $0xdc] sm:$0xf] %vm604_vm0, %v794_v2  ;;  %v929_v12 = vunpack.c.l.bf16 %v961_v63  ;;  %v930_v13 = vunpack.c.h.bf16 %v961_v63  ;;  %v207_v14 = vmul.f32 %v921_v5, %v988_v1  ;;  %v208_v15 = vmul.f32 %v922_v6, %v988_v1 }
  0x4b   :  { %v209_v16 = vmul.f32 %v925_v8, %v988_v1  ;;  %v210_v17 = vmul.f32 %v926_v9, %v988_v1  ;;  %v276_v18 = vadd.f32 %v1002_v7, %v205_v10  ;;  %v277_v19 = vadd.f32 %v1002_v7, %v206_v11 }
  0x4c   :  { %v211_v20 = vmul.f32 %v929_v12, %v988_v1  ;;  %v212_v21 = vmul.f32 %v930_v13, %v988_v1  ;;  %v278_v22 = vadd.f32 %v1002_v7, %v207_v14  ;;  %v279_v23 = vadd.f32 %v1002_v7, %v208_v15 }
  0x4d   :  { %v280_v24 = vadd.f32 %v1002_v7, %v209_v16  ;;  %v281_v25 = vadd.f32 %v1002_v7, %v210_v17  ;;  %v340_v26 = vmax.f32 %v276_v18, 0.0  ;;  %v341_v27 = vmax.f32 %v277_v19, 0.0 }
  0x4e   :  { %v282_v28 = vadd.f32 %v1002_v7, %v211_v20  ;;  %v283_v29 = vadd.f32 %v1002_v7, %v212_v21  ;;  %v342_v30 = vmax.f32 %v278_v22, 0.0  ;;  %v343_v31 = vmax.f32 %v279_v23, 0.0 }
  0x4f   :  { %v344_v32 = vmax.f32 %v280_v24, 0.0  ;;  %v345_v33 = vmax.f32 %v281_v25, 0.0  ;;  %v795_v34 = vpack.c.bf16 %v340_v26, %v340_v26  ;;  %v796_v1 = vpack.c.bf16 %v341_v27, %v341_v27 }
  0x50   :  { %v346_v35 = vmax.f32 %v282_v28, 0.0  ;;  %v347_v36 = vmax.f32 %v283_v29, 0.0  ;;  %v797_v37 = vpack.c.bf16 %v342_v30, %v342_v30  ;;  %v798_v38 = vpack.c.bf16 %v343_v31, %v343_v31 }
  0x51   :  { %v799_v39 = vpack.c.bf16 %v344_v32, %v344_v32  ;;  %v800_v40 = vpack.c.bf16 %v345_v33, %v345_v33  ;;  %661 = vst.msk [vmem:[%s1475_s3 + $0xe0] sm:$0xf] %vm604_vm0, %v795_v34  ;;  %662 = vst.msk [vmem:[%s1475_s3 + $0xe4] sm:$0xf] %vm604_vm0, %v796_v1 }
  0x52   :  { %v801_v7 = vpack.c.bf16 %v346_v35, %v346_v35  ;;  %v802_v41 = vpack.c.bf16 %v347_v36, %v347_v36  ;;  %663 = vst.msk [vmem:[%s1475_s3 + $0xe8] sm:$0xf] %vm604_vm0, %v797_v37  ;;  %664 = vst.msk [vmem:[%s1475_s3 + $0xec] sm:$0xf] %vm604_vm0, %v798_v38 }
  0x53   :  { %665 = vst.msk [vmem:[%s1475_s3 + $0xf0] sm:$0xf] %vm604_vm0, %v799_v39  ;;  %666 = vst.msk [vmem:[%s1475_s3 + $0xf4] sm:$0xf] %vm604_vm0, %v800_v40 }
  0x54   :  { %667 = vst.msk [vmem:[%s1475_s3 + $0xf8] sm:$0xf] %vm604_vm0, %v801_v7  ;;  %668 = vst.msk [vmem:[%s1475_s3 + $0xfc] sm:$0xf] %vm604_vm0, %v802_v41 }

// kernel: generator_forward.33
= control target key start
LH: loop header
LB: loop body
LE: loop exit
PB: predicated region body
PF: predicated region fallthrough
CT: control target
= control target key end

     0   :  { %vm280_vm0 = vcmask 523264   ;;  %vm1188_vm1 = vcmask 1040384   ;;  %vm1190_vm2 = vcmask 1041408   ;;  %s2266_s1 = inlined_call_operand.vmem [shape: bf16[64,128], index: 1, kind: input, shape index: {}]   ;;  %s2267_s0 = inlined_call_operand.vmem [shape: bf16[512,64], index: 0, kind: input, shape index: {}]   ;;  %s2268_s2 = inlined_call_operand.vmem [shape: f32[1,128], index: 2, kind: input, shape index: {}]   ;;  %s2269_s3 = inlined_call_operand.vmem [shape: bf16[512,128], index: 3, kind: output, shape index: {0}]   ;;  %s2270_s4 = inlined_call_operand.vmem [shape: f32[8,128], index: 4, kind: output, shape index: {1}]  }
   0x1   :  { %v1705_v0 = vld [vmem:[%s2266_s1 + $0x18] sm:$0xff]   ;;  %v1706_v1 = vld [vmem:[%s2266_s1 + $0x10] sm:$0xff]   ;;  %v1707_v2 = vld [vmem:[%s2266_s1 + $0x8] sm:$0xff]  }
   0x2   :  { %1625 = vmatprep.subr.bf16.mxu0 %v1705_v0  ;;  %1697 = vmatprep.subr.bf16.mxu1 %v1705_v0  ;;  %v1709_v3 = vld [vmem:[%s2267_s0] sm:$0xff]   ;;  %v1710_v5 = vld [vmem:[%s2267_s0 + $0x8] sm:$0xff]   ;;  %v1711_v6 = vld [vmem:[%s2267_s0 + $0x10] sm:$0xff]  }
   0x3   :  { %1626 = vmatpush3.bf16.msra.mxu0 %v1705_v0  ;;  %1701 = vmatpush3.bf16.msra.mxu1 %v1705_v0  ;;  %v1708_v4 = vld [vmem:[%s2266_s1] sm:$0xff]   ;;  %v1712_v7 = vld [vmem:[%s2267_s0 + $0x18] sm:$0xff]   ;;  %v1726_v9 = vld [vmem:[%s2267_s0 + $0x88] sm:$0xff]  }
   0x4   :  { %1627 = vmatprep.subr.bf16.mxu0 %v1706_v1  ;;  %1698 = vmatprep.subr.bf16.mxu1 %v1706_v1  ;;  %v1725_v8 = vld [vmem:[%s2267_s0 + $0x80] sm:$0xff]   ;;  %v1727_v10 = vld [vmem:[%s2267_s0 + $0x90] sm:$0xff]   ;;  %v1728_v12 = vld [vmem:[%s2267_s0 + $0x98] sm:$0xff]  }
   0x5   :  { %1633 = vmatprep.mubr.msk.bf16.mxu0 %vm280_vm0, %v1709_v3  ;;  %1665 = vmatprep.mubr.msk.bf16.mxu1 %vm280_vm0, %v1725_v8  ;;  %v1713_v11 = vld [vmem:[%s2267_s0 + $0x20] sm:$0xff]   ;;  %v1714_v14 = vld [vmem:[%s2267_s0 + $0x28] sm:$0xff]   ;;  %v1715_v15 = vld [vmem:[%s2267_s0 + $0x30] sm:$0xff]  }
   0x6   :  { %v1729_v13 = vld [vmem:[%s2267_s0 + $0xa0] sm:$0xff]   ;;  %v1730_v16 = vld [vmem:[%s2267_s0 + $0xa8] sm:$0xff]   ;;  %v1731_v17 = vld [vmem:[%s2267_s0 + $0xb0] sm:$0xff]  }
   0x7   :  { %1628 = vmatpush3.bf16.msra.mxu0 %v1706_v1  ;;  %1702 = vmatpush3.bf16.msra.mxu1 %v1706_v1  ;;  %v1716_v18 = vld [vmem:[%s2267_s0 + $0x38] sm:$0xff]   ;;  %v1717_v19 = vld [vmem:[%s2267_s0 + $0x40] sm:$0xff]   ;;  %v1718_v22 = vld [vmem:[%s2267_s0 + $0x48] sm:$0xff]  }
   0x8   :  { %1629 = vmatprep.subr.bf16.mxu0 %v1707_v2  ;;  %1699 = vmatprep.subr.bf16.mxu1 %v1707_v2  ;;  %v1732_v20 = vld [vmem:[%s2267_s0 + $0xb8] sm:$0xff]   ;;  %v1733_v21 = vld [vmem:[%s2267_s0 + $0xc0] sm:$0xff]   ;;  %v1719_v23 = vld [vmem:[%s2267_s0 + $0x50] sm:$0xff]  }
   0x9   :  { %v1734_v24 = vld [vmem:[%s2267_s0 + $0xc8] sm:$0xff]   ;;  %v1735_v25 = vld [vmem:[%s2267_s0 + $0xd0] sm:$0xff]   ;;  %v1720_v26 = vld [vmem:[%s2267_s0 + $0x58] sm:$0xff]  }
   0xa   :  { %v1721_v27 = vld [vmem:[%s2267_s0 + $0x60] sm:$0xff]   ;;  %v1736_v28 = vld [vmem:[%s2267_s0 + $0xd8] sm:$0xff]   ;;  %v1722_v30 = vld [vmem:[%s2267_s0 + $0x68] sm:$0xff]  }
   0xb   :  { %1630 = vmatpush3.bf16.msra.mxu0 %v1707_v2  ;;  %1703 = vmatpush3.bf16.msra.mxu1 %v1707_v2  ;;  %v1737_v29 = vld [vmem:[%s2267_s0 + $0xe0] sm:$0xff]   ;;  %v1723_v31 = vld [vmem:[%s2267_s0 + $0x70] sm:$0xff]   ;;  %v1738_v32 = vld [vmem:[%s2267_s0 + $0xe8] sm:$0xff]  }
   0xc   :  { %1631 = vmatprep.subr.bf16.mxu0 %v1708_v4  ;;  %1700 = vmatprep.subr.bf16.mxu1 %v1708_v4  ;;  %v1739_v33 = vld [vmem:[%s2267_s0 + $0xf0] sm:$0xff]   ;;  %v1724_v34 = vld [vmem:[%s2267_s0 + $0x78] sm:$0xff]   ;;  %v1909_v37 = vld [vmem:[%s2268_s2] ss:$0 sm:$0xff] }
   0xd   :  { %v1740_v35 = vld [vmem:[%s2267_s0 + $0xf8] sm:$0xff]  }
   0xf   :  { %1632 = vmatpush3.bf16.msra.mxu0 %v1708_v4  ;;  %1704 = vmatpush3.bf16.msra.mxu1 %v1708_v4 }
  0x12   :  { %1634 = vmatmul.mubr.msk.bf16.vlgmr.msra.gmra.mxu0 %vm280_vm0, %v1710_v5  ;;  %1666 = vmatmul.mubr.msk.bf16.vlgmr.msra.gmra.mxu1 %vm280_vm0, %v1726_v9 }
  0x13   :  { %1637 = vmatprep.mubr.msk.bf16.mxu0 %vm280_vm0, %v1711_v6  ;;  %1669 = vmatprep.mubr.msk.bf16.mxu1 %vm280_vm0, %v1727_v10 }
  0x1a   :  { %1638 = vmatmul.mubr.msk.bf16.gmra.mxu0 %vm280_vm0, %v1712_v7  ;;  %1670 = vmatmul.mubr.msk.bf16.gmra.mxu1 %vm280_vm0, %v1728_v12 }
  0x1b   :  { %1641 = vmatprep.mubr.msk.bf16.mxu0 %vm280_vm0, %v1713_v11  ;;  %1673 = vmatprep.mubr.msk.bf16.mxu1 %vm280_vm0, %v1729_v13 }
  0x22   :  { %1642 = vmatmul.mubr.msk.bf16.gmra.mxu0 %vm280_vm0, %v1714_v14  ;;  %1674 = vmatmul.mubr.msk.bf16.gmra.mxu1 %vm280_vm0, %v1730_v16 }
  0x23   :  { %1645 = vmatprep.mubr.msk.bf16.mxu0 %vm280_vm0, %v1715_v15  ;;  %1677 = vmatprep.mubr.msk.bf16.mxu1 %vm280_vm0, %v1731_v17 }
  0x2a   :  { %1646 = vmatmul.mubr.msk.bf16.gmra.mxu0 %vm280_vm0, %v1716_v18  ;;  %1678 = vmatmul.mubr.msk.bf16.gmra.mxu1 %vm280_vm0, %v1732_v20 }
  0x2b   :  { %1649 = vmatprep.mubr.msk.bf16.mxu0 %vm280_vm0, %v1717_v19  ;;  %1681 = vmatprep.mubr.msk.bf16.mxu1 %vm280_vm0, %v1733_v21 }
  0x32   :  { %1650 = vmatmul.mubr.msk.bf16.gmra.mxu0 %vm280_vm0, %v1718_v22  ;;  %1682 = vmatmul.mubr.msk.bf16.gmra.mxu1 %vm280_vm0, %v1734_v24 }
  0x33   :  { %1653 = vmatprep.mubr.msk.bf16.mxu0 %vm280_vm0, %v1719_v23  ;;  %1685 = vmatprep.mubr.msk.bf16.mxu1 %vm280_vm0, %v1735_v25 }
  0x3a   :  { %1654 = vmatmul.mubr.msk.bf16.gmra.mxu0 %vm280_vm0, %v1720_v26  ;;  %1686 = vmatmul.mubr.msk.bf16.gmra.mxu1 %vm280_vm0, %v1736_v28 }
  0x3b   :  { %1657 = vmatprep.mubr.msk.bf16.mxu0 %vm280_vm0, %v1721_v27  ;;  %1689 = vmatprep.mubr.msk.bf16.mxu1 %vm280_vm0, %v1737_v29 }
  0x42   :  { %1658 = vmatmul.mubr.msk.bf16.gmra.mxu0 %vm280_vm0, %v1722_v30  ;;  %1690 = vmatmul.mubr.msk.bf16.gmra.mxu1 %vm280_vm0, %v1738_v32 }
  0x43   :  { %1661 = vmatprep.mubr.msk.bf16.mxu0 %vm280_vm0, %v1723_v31  ;;  %1693 = vmatprep.mubr.msk.bf16.mxu1 %vm280_vm0, %v1739_v33 }
  0x4a   :  { %1662 = vmatmul.mubr.msk.bf16.gmra.mxu0 %vm280_vm0, %v1724_v34  ;;  %1694 = vmatmul.mubr.msk.bf16.gmra.mxu1 %vm280_vm0, %v1740_v35 }
  0xd2   :  { %v1635_v36 = vpop.f32.mrf.mxu0  ;;  %v1667_v43 = vpop.f32.mrf.mxu1 }
  0xd3   :  { %v420_v40 = vadd.f32 %v1635_v36, %v1909_v37  ;;  %v1916_v49 = vadd.f32 %v1667_v43, %v1909_v37 }
  0xd4   :  { %v411_v38 = vpop.f32.mrf.mxu0  ;;  %v539_v47 = vpop.f32.mrf.mxu1 }
  0xd5   :  { %v412_v41 = vadd.f32 %v1909_v37, %v411_v38  ;;  %v1922_v56 = vadd.f32 %v1909_v37, %v539_v47  ;;  %v1057_v58 = vmul.f32 %v420_v40, %v420_v40 }
  0xd6   :  { %v1636_v39 = vpop.f32.mrf.mxu0  ;;  %v1668_v54 = vpop.f32.mrf.mxu1 }
  0xd7   :  { %v423_v42 = vadd.f32 %v1636_v39, %v1909_v37  ;;  %v1055_v50 = vmul.f32 %v412_v41, %v412_v41  ;;  %v1925_v57 = vadd.f32 %v1668_v54, %v1909_v37 }
  0xd8   :  { %v414_v44 = vpop.f32.mrf.mxu0  ;;  %v542_v62 = vpop.f32.mrf.mxu1 }
  0xd9   :  { %v1406_v45 = vpack.c.bf16 %v423_v42, %v420_v40  ;;  %v415_v46 = vadd.f32 %v1909_v37, %v414_v44  ;;  %v1058_v63 = vmul.f32 %v423_v42, %v423_v42  ;;  %v1486_v1 = vpack.c.bf16 %v1925_v57, %v1916_v49 }
  0xda   :  { %v1639_v48 = vpop.f32.mrf.mxu0  ;;  %v1934_v2 = vadd.f32 %v1909_v37, %v542_v62  ;;  %v1671_v7 = vpop.f32.mrf.mxu1 }
  0xdb   :  { %1558 = vst [vmem:[%s2269_s3 + $0x8] sm:$0xff] %v1406_v45   ;;  %v1401_v51 = vpack.c.bf16 %v415_v46, %v412_v41  ;;  %v986_v52 = vadd.f32 %v415_v46, %v412_v41  ;;  %v1056_v53 = vmul.f32 %v415_v46, %v415_v46  ;;  %v436_v4 = vadd.f32 %v1639_v48, %v1909_v37 }
  0xdc   :  { %v427_v55 = vpop.f32.mrf.mxu0  ;;  %1574 = vst [vmem:[%s2269_s3 + $0x88] sm:$0xff] %v1486_v1   ;;  %v1481_v9 = vpack.c.bf16 %v1934_v2, %v1922_v56  ;;  %v555_v14 = vpop.f32.mrf.mxu1  ;;  %v1951_v18 = vadd.f32 %v1671_v7, %v1909_v37 }
  0xdd   :  { %1402 = vst [vmem:[%s2269_s3] sm:$0xff] %v1401_v51   ;;  %v987_v59 = vadd.f32 %v986_v52, %v420_v40  ;;  %v1119_v60 = vadd.f32 %v1056_v53, %v1055_v50  ;;  %v428_v61 = vadd.f32 %v1909_v37, %v427_v55  ;;  %v1954_v24 = vadd.f32 %v1909_v37, %v555_v14 }
  0xde   :  { %v1640_v0 = vpop.f32.mrf.mxu0  ;;  %1573 = vst [vmem:[%s2269_s3 + $0x80] sm:$0xff] %v1481_v9   ;;  %v1672_v19 = vpop.f32.mrf.mxu1  ;;  %v1061_v25 = vmul.f32 %v436_v4, %v436_v4 }
  0xdf   :  { %v1120_v3 = vadd.f32 %v1119_v60, %v1057_v58  ;;  %v988_v5 = vadd.f32 %v987_v59, %v423_v42  ;;  %v439_v6 = vadd.f32 %v1640_v0, %v1909_v37  ;;  %v1059_v11 = vmul.f32 %v428_v61, %v428_v61 }
  0xe0   :  { %v430_v8 = vpop.f32.mrf.mxu0  ;;  %v1957_v26 = vadd.f32 %v1672_v19, %v1909_v37  ;;  %v558_v27 = vpop.f32.mrf.mxu1 }
  0xe1   :  { %v989_v10 = vadd.f32 %v988_v5, %v428_v61  ;;  %v1121_v12 = vadd.f32 %v1120_v3, %v1058_v63  ;;  %v1416_v13 = vpack.c.bf16 %v439_v6, %v436_v4  ;;  %v431_v15 = vadd.f32 %v1909_v37, %v430_v8 }
  0xe2   :  { %v1643_v16 = vpop.f32.mrf.mxu0  ;;  %v1964_v32 = vadd.f32 %v1909_v37, %v558_v27  ;;  %v1496_v35 = vpack.c.bf16 %v1957_v26, %v1951_v18  ;;  %v1675_v36 = vpop.f32.mrf.mxu1  ;;  %v1062_v38 = vmul.f32 %v439_v6, %v439_v6 }
  0xe3   :  { %v1122_v17 = vadd.f32 %v1121_v12, %v1059_v11  ;;  %1560 = vst [vmem:[%s2269_s3 + $0x18] sm:$0xff] %v1416_v13   ;;  %v1411_v20 = vpack.c.bf16 %v431_v15, %v428_v61  ;;  %v990_v21 = vadd.f32 %v989_v10, %v431_v15  ;;  %v1060_v22 = vmul.f32 %v431_v15, %v431_v15 }
  0xe4   :  { %v443_v23 = vpop.f32.mrf.mxu0  ;;  %v452_v33 = vadd.f32 %v1643_v16, %v1909_v37  ;;  %v1491_v42 = vpack.c.bf16 %v1964_v32, %v1954_v24  ;;  %1576 = vst [vmem:[%s2269_s3 + $0x98] sm:$0xff] %v1496_v35   ;;  %v571_v45 = vpop.f32.mrf.mxu1  ;;  %v1980_v51 = vadd.f32 %v1675_v36, %v1909_v37 }
  0xe5   :  { %1559 = vst [vmem:[%s2269_s3 + $0x10] sm:$0xff] %v1411_v20   ;;  %v991_v28 = vadd.f32 %v990_v21, %v436_v4  ;;  %v1123_v29 = vadd.f32 %v1122_v17, %v1060_v22  ;;  %v444_v30 = vadd.f32 %v1909_v37, %v443_v23  ;;  %v1992_v62 = vadd.f32 %v1909_v37, %v571_v45 }
  0xe6   :  { %v1644_v31 = vpop.f32.mrf.mxu0  ;;  %1575 = vst [vmem:[%s2269_s3 + $0x90] sm:$0xff] %v1491_v42   ;;  %v1676_v54 = vpop.f32.mrf.mxu1  ;;  %v1065_v61 = vmul.f32 %v452_v33, %v452_v33 }
  0xe7   :  { %v455_v34 = vadd.f32 %v1644_v31, %v1909_v37  ;;  %v1124_v39 = vadd.f32 %v1123_v29, %v1061_v25  ;;  %v992_v40 = vadd.f32 %v991_v28, %v439_v6  ;;  %v1063_v47 = vmul.f32 %v444_v30, %v444_v30 }
  0xe8   :  { %v446_v41 = vpop.f32.mrf.mxu0  ;;  %v1986_v60 = vadd.f32 %v1676_v54, %v1909_v37  ;;  %v574_v63 = vpop.f32.mrf.mxu1 }
  0xe9   :  { %v1426_v43 = vpack.c.bf16 %v455_v34, %v452_v33  ;;  %v447_v44 = vadd.f32 %v1909_v37, %v446_v41  ;;  %v993_v46 = vadd.f32 %v992_v40, %v444_v30  ;;  %v1125_v48 = vadd.f32 %v1124_v39, %v1062_v38 }
  0xea   :  { %v1647_v50 = vpop.f32.mrf.mxu0  ;;  %v1506_v5 = vpack.c.bf16 %v1986_v60, %v1980_v51  ;;  %v2000_v8 = vadd.f32 %v1909_v37, %v574_v63  ;;  %v1679_v9 = vpop.f32.mrf.mxu1  ;;  %v1066_v10 = vmul.f32 %v455_v34, %v455_v34 }
  0xeb   :  { %1562 = vst [vmem:[%s2269_s3 + $0x28] sm:$0xff] %v1426_v43   ;;  %v1421_v52 = vpack.c.bf16 %v447_v44, %v444_v30  ;;  %v1064_v53 = vmul.f32 %v447_v44, %v447_v44  ;;  %v1126_v55 = vadd.f32 %v1125_v48, %v1063_v47  ;;  %v994_v58 = vadd.f32 %v993_v46, %v447_v44 }
  0xec   :  { %v459_v59 = vpop.f32.mrf.mxu0  ;;  %v468_v6 = vadd.f32 %v1647_v50, %v1909_v37  ;;  %1578 = vst [vmem:[%s2269_s3 + $0xa8] sm:$0xff] %v1506_v5   ;;  %v1501_v16 = vpack.c.bf16 %v2000_v8, %v1992_v62  ;;  %v587_v17 = vpop.f32.mrf.mxu1  ;;  %v2009_v23 = vadd.f32 %v1679_v9, %v1909_v37 }
  0xed   :  { %1561 = vst [vmem:[%s2269_s3 + $0x20] sm:$0xff] %v1421_v52   ;;  %v995_v0 = vadd.f32 %v994_v58, %v452_v33  ;;  %v1127_v1 = vadd.f32 %v1126_v55, %v1064_v53  ;;  %v460_v3 = vadd.f32 %v1909_v37, %v459_v59  ;;  %v2024_v35 = vadd.f32 %v1909_v37, %v587_v17 }
  0xee   :  { %v1648_v4 = vpop.f32.mrf.mxu0  ;;  %1577 = vst [vmem:[%s2269_s3 + $0xa0] sm:$0xff] %v1501_v16   ;;  %v1680_v28 = vpop.f32.mrf.mxu1 }
  0xef   :  { %v471_v7 = vadd.f32 %v1648_v4, %v1909_v37  ;;  %v1128_v11 = vadd.f32 %v1127_v1, %v1065_v61  ;;  %v996_v12 = vadd.f32 %v995_v0, %v455_v34  ;;  %v1067_v20 = vmul.f32 %v460_v3, %v460_v3 }
  0xf0   :  { %v462_v13 = vpop.f32.mrf.mxu0  ;;  %v2018_v33 = vadd.f32 %v1680_v28, %v1909_v37  ;;  %v1069_v34 = vmul.f32 %v468_v6, %v468_v6  ;;  %v590_v36 = vpop.f32.mrf.mxu1 }
  0xf1   :  { %v1436_v14 = vpack.c.bf16 %v471_v7, %v468_v6  ;;  %v463_v15 = vadd.f32 %v1909_v37, %v462_v13  ;;  %v997_v19 = vadd.f32 %v996_v12, %v460_v3  ;;  %v1129_v21 = vadd.f32 %v1128_v11, %v1066_v10 }
  0xf2   :  { %v1651_v22 = vpop.f32.mrf.mxu0  ;;  %v1516_v42 = vpack.c.bf16 %v2018_v33, %v2009_v23  ;;  %v2032_v45 = vadd.f32 %v1909_v37, %v590_v36  ;;  %v1683_v46 = vpop.f32.mrf.mxu1  ;;  %v1070_v47 = vmul.f32 %v471_v7, %v471_v7 }
  0xf3   :  { %1564 = vst [vmem:[%s2269_s3 + $0x38] sm:$0xff] %v1436_v14   ;;  %v1431_v25 = vpack.c.bf16 %v463_v15, %v460_v3  ;;  %v1068_v27 = vmul.f32 %v463_v15, %v463_v15  ;;  %v1130_v29 = vadd.f32 %v1129_v21, %v1067_v20  ;;  %v998_v30 = vadd.f32 %v997_v19, %v463_v15 }
  0xf4   :  { %v475_v31 = vpop.f32.mrf.mxu0  ;;  %v484_v43 = vadd.f32 %v1651_v22, %v1909_v37  ;;  %1580 = vst [vmem:[%s2269_s3 + $0xb8] sm:$0xff] %v1516_v42   ;;  %v1511_v55 = vpack.c.bf16 %v2032_v45, %v2024_v35  ;;  %v603_v58 = vpop.f32.mrf.mxu1  ;;  %v2041_v1 = vadd.f32 %v1683_v46, %v1909_v37 }
  0xf5   :  { %1563 = vst [vmem:[%s2269_s3 + $0x30] sm:$0xff] %v1431_v25   ;;  %v999_v38 = vadd.f32 %v998_v30, %v468_v6  ;;  %v1131_v39 = vadd.f32 %v1130_v29, %v1068_v27  ;;  %v476_v40 = vadd.f32 %v1909_v37, %v475_v31  ;;  %v2056_v12 = vadd.f32 %v1909_v37, %v603_v58 }
  0xf6   :  { %v1652_v41 = vpop.f32.mrf.mxu0  ;;  %1579 = vst [vmem:[%s2269_s3 + $0xb0] sm:$0xff] %v1511_v55   ;;  %v1684_v5 = vpop.f32.mrf.mxu1  ;;  %v1073_v11 = vmul.f32 %v484_v43, %v484_v43 }
  0xf7   :  { %v487_v44 = vadd.f32 %v1652_v41, %v1909_v37  ;;  %v1132_v48 = vadd.f32 %v1131_v39, %v1069_v34  ;;  %v1000_v50 = vadd.f32 %v999_v38, %v471_v7  ;;  %v1071_v61 = vmul.f32 %v476_v40, %v476_v40 }
  0xf8   :  { %v478_v52 = vpop.f32.mrf.mxu0  ;;  %v2050_v10 = vadd.f32 %v1684_v5, %v1909_v37  ;;  %v606_v13 = vpop.f32.mrf.mxu1 }
  0xf9   :  { %v1446_v53 = vpack.c.bf16 %v487_v44, %v484_v43  ;;  %v479_v54 = vadd.f32 %v1909_v37, %v478_v52  ;;  %v1001_v59 = vadd.f32 %v1000_v50, %v476_v40  ;;  %v1133_v63 = vadd.f32 %v1132_v48, %v1070_v47 }
  0xfa   :  { %v1655_v0 = vpop.f32.mrf.mxu0  ;;  %v1526_v19 = vpack.c.bf16 %v2050_v10, %v2041_v1  ;;  %v2064_v22 = vadd.f32 %v1909_v37, %v606_v13  ;;  %v1687_v25 = vpop.f32.mrf.mxu1  ;;  %v1074_v27 = vmul.f32 %v487_v44, %v487_v44 }
  0xfb   :  { %1566 = vst [vmem:[%s2269_s3 + $0x48] sm:$0xff] %v1446_v53   ;;  %v1441_v3 = vpack.c.bf16 %v479_v54, %v476_v40  ;;  %v1072_v4 = vmul.f32 %v479_v54, %v479_v54  ;;  %v1134_v6 = vadd.f32 %v1133_v63, %v1071_v61  ;;  %v1002_v7 = vadd.f32 %v1001_v59, %v479_v54 }
  0xfc   :  { %v491_v9 = vpop.f32.mrf.mxu0  ;;  %v500_v20 = vadd.f32 %v1655_v0, %v1909_v37  ;;  %1582 = vst [vmem:[%s2269_s3 + $0xc8] sm:$0xff] %v1526_v19   ;;  %v1521_v36 = vpack.c.bf16 %v2064_v22, %v2056_v12  ;;  %v619_v38 = vpop.f32.mrf.mxu1 }
  0xfd   :  { %1565 = vst [vmem:[%s2269_s3 + $0x40] sm:$0xff] %v1441_v3   ;;  %v1003_v14 = vadd.f32 %v1002_v7, %v484_v43  ;;  %v1135_v15 = vadd.f32 %v1134_v6, %v1072_v4  ;;  %v492_v16 = vadd.f32 %v1909_v37, %v491_v9  ;;  %v2073_v43 = vadd.f32 %v1687_v25, %v1909_v37 }
  0xfe   :  { %v1656_v17 = vpop.f32.mrf.mxu0  ;;  %1581 = vst [vmem:[%s2269_s3 + $0xc0] sm:$0xff] %v1521_v36   ;;  %v1688_v47 = vpop.f32.mrf.mxu1  ;;  %v1077_v54 = vmul.f32 %v500_v20, %v500_v20  ;;  %v2088_v55 = vadd.f32 %v1909_v37, %v619_v38 }
  0xff   :  { %v503_v21 = vadd.f32 %v1656_v17, %v1909_v37  ;;  %v1136_v28 = vadd.f32 %v1135_v15, %v1073_v11  ;;  %v1004_v29 = vadd.f32 %v1003_v14, %v487_v44  ;;  %v1075_v40 = vmul.f32 %v492_v16, %v492_v16 }
 0x100   :  { %v494_v30 = vpop.f32.mrf.mxu0  ;;  %v2082_v53 = vadd.f32 %v1688_v47, %v1909_v37  ;;  %v622_v58 = vpop.f32.mrf.mxu1 }
 0x101   :  { %v1456_v31 = vpack.c.bf16 %v503_v21, %v500_v20  ;;  %v495_v34 = vadd.f32 %v1909_v37, %v494_v30  ;;  %v1005_v39 = vadd.f32 %v1004_v29, %v492_v16  ;;  %v1137_v41 = vadd.f32 %v1136_v28, %v1074_v27 }
 0x102   :  { %v1659_v42 = vpop.f32.mrf.mxu0  ;;  %v1536_v3 = vpack.c.bf16 %v2082_v53, %v2073_v43  ;;  %v2096_v6 = vadd.f32 %v1909_v37, %v622_v58  ;;  %v1691_v7 = vpop.f32.mrf.mxu1  ;;  %v1078_v9 = vmul.f32 %v503_v21, %v503_v21 }
 0x103   :  { %1568 = vst [vmem:[%s2269_s3 + $0x58] sm:$0xff] %v1456_v31   ;;  %v1451_v44 = vpack.c.bf16 %v495_v34, %v492_v16  ;;  %v1076_v46 = vmul.f32 %v495_v34, %v495_v34  ;;  %v1138_v48 = vadd.f32 %v1137_v41, %v1075_v40  ;;  %v1006_v50 = vadd.f32 %v1005_v39, %v495_v34 }
 0x104   :  { %v507_v52 = vpop.f32.mrf.mxu0  ;;  %v516_v4 = vadd.f32 %v1659_v42, %v1909_v37  ;;  %1584 = vst [vmem:[%s2269_s3 + $0xd8] sm:$0xff] %v1536_v3   ;;  %v1531_v17 = vpack.c.bf16 %v2096_v6, %v2088_v55  ;;  %v635_v19 = vpop.f32.mrf.mxu1  ;;  %v2105_v29 = vadd.f32 %v1691_v7, %v1909_v37 }
 0x105   :  { %1567 = vst [vmem:[%s2269_s3 + $0x50] sm:$0xff] %v1451_v44   ;;  %v1007_v59 = vadd.f32 %v1006_v50, %v500_v20  ;;  %v1139_v61 = vadd.f32 %v1138_v48, %v1076_v46  ;;  %v508_v63 = vadd.f32 %v1909_v37, %v507_v52  ;;  %v2120_v41 = vadd.f32 %v1909_v37, %v635_v19 }
 0x106   :  { %v1660_v0 = vpop.f32.mrf.mxu0  ;;  %1583 = vst [vmem:[%s2269_s3 + $0xd0] sm:$0xff] %v1531_v17   ;;  %v1692_v31 = vpop.f32.mrf.mxu1  ;;  %v1081_v40 = vmul.f32 %v516_v4, %v516_v4 }
 0x107   :  { %v519_v5 = vadd.f32 %v1660_v0, %v1909_v37  ;;  %v1140_v11 = vadd.f32 %v1139_v61, %v1077_v54  ;;  %v1008_v13 = vadd.f32 %v1007_v59, %v503_v21  ;;  %v1079_v25 = vmul.f32 %v508_v63, %v508_v63 }
 0x108   :  { %v510_v14 = vpop.f32.mrf.mxu0  ;;  %v2114_v39 = vadd.f32 %v1692_v31, %v1909_v37  ;;  %v638_v42 = vpop.f32.mrf.mxu1 }
 0x109   :  { %v1466_v15 = vpack.c.bf16 %v519_v5, %v516_v4  ;;  %v511_v16 = vadd.f32 %v1909_v37, %v510_v14  ;;  %v1009_v20 = vadd.f32 %v1008_v13, %v508_v63  ;;  %v1141_v27 = vadd.f32 %v1140_v11, %v1078_v9 }
 0x10a   :  { %v1663_v28 = vpop.f32.mrf.mxu0  ;;  %v1546_v50 = vpack.c.bf16 %v2114_v39, %v2105_v29  ;;  %v2128_v58 = vadd.f32 %v1909_v37, %v638_v42  ;;  %v1695_v59 = vpop.f32.mrf.mxu1  ;;  %v1082_v61 = vmul.f32 %v519_v5, %v519_v5 }
 0x10b   :  { %1570 = vst [vmem:[%s2269_s3 + $0x68] sm:$0xff] %v1466_v15   ;;  %v1461_v21 = vpack.c.bf16 %v511_v16, %v508_v63  ;;  %v1080_v30 = vmul.f32 %v511_v16, %v511_v16  ;;  %v1142_v34 = vadd.f32 %v1141_v27, %v1079_v25  ;;  %v1010_v36 = vadd.f32 %v1009_v20, %v511_v16 }
 0x10c   :  { %v523_v38 = vpop.f32.mrf.mxu0  ;;  %v532_v52 = vadd.f32 %v1663_v28, %v1909_v37  ;;  %1586 = vst [vmem:[%s2269_s3 + $0xe8] sm:$0xff] %v1546_v50   ;;  %v1541_v9 = vpack.c.bf16 %v2128_v58, %v2120_v41  ;;  %v651_v11 = vpop.f32.mrf.mxu1  ;;  %v2137_v16 = vadd.f32 %v1695_v59, %v1909_v37  ;;  %v1089_v59 = vmul.f32 %v1916_v49, %v1916_v49 }
 0x10d   :  { %1569 = vst [vmem:[%s2269_s3 + $0x60] sm:$0xff] %v1461_v21   ;;  %v1011_v44 = vadd.f32 %v1010_v36, %v516_v4  ;;  %v1143_v46 = vadd.f32 %v1142_v34, %v1080_v30  ;;  %v524_v47 = vadd.f32 %v1909_v37, %v523_v38  ;;  %v2152_v28 = vadd.f32 %v1909_v37, %v651_v11 }
 0x10e   :  { %v1664_v48 = vpop.f32.mrf.mxu0  ;;  %1585 = vst [vmem:[%s2269_s3 + $0xe0] sm:$0xff] %v1541_v9   ;;  %v1696_v19 = vpop.f32.mrf.mxu1  ;;  %v1085_v30 = vmul.f32 %v532_v52, %v532_v52 }
 0x10f   :  { %v535_v54 = vadd.f32 %v1664_v48, %v1909_v37  ;;  %v1144_v63 = vadd.f32 %v1143_v46, %v1081_v40  ;;  %v1012_v0 = vadd.f32 %v1011_v44, %v519_v5  ;;  %v1083_v14 = vmul.f32 %v524_v47, %v524_v47 }
 0x110   :  { %v526_v3 = vpop.f32.mrf.mxu0  ;;  %v2146_v27 = vadd.f32 %v1696_v19, %v1909_v37  ;;  %v654_v21 = vpop.f32.mrf.mxu1  ;;  %v1095_v19 = vmul.f32 %v1992_v62, %v1992_v62 }
 0x111   :  { %v1476_v4 = vpack.c.bf16 %v535_v54, %v532_v52  ;;  %v527_v7 = vadd.f32 %v1909_v37, %v526_v3  ;;  %v1013_v13 = vadd.f32 %v1012_v0, %v524_v47  ;;  %v1145_v15 = vadd.f32 %v1144_v63, %v1082_v61 }
 0x112   :  { %v1556_v36 = vpack.c.bf16 %v2146_v27, %v2137_v16  ;;  %v2157_v38 = vadd.f32 %v1909_v37, %v654_v21  ;;  %v1086_v40 = vmul.f32 %v535_v54, %v535_v54  ;;  %v1096_v21 = vmul.f32 %v2000_v8, %v2000_v8 }
 0x113   :  { %1572 = vst [vmem:[%s2269_s3 + $0x78] sm:$0xff] %v1476_v4   ;;  %v1471_v5 = vpack.c.bf16 %v527_v7, %v524_v47  ;;  %v1084_v17 = vmul.f32 %v527_v7, %v527_v7  ;;  %v1146_v20 = vadd.f32 %v1145_v15, %v1083_v14  ;;  %v1014_v25 = vadd.f32 %v1013_v13, %v527_v7 }
 0x114   :  { %1588 = vst [vmem:[%s2269_s3 + $0xf8] sm:$0xff] %v1556_v36   ;;  %v1551_v46 = vpack.c.bf16 %v2157_v38, %v2152_v28  ;;  %v1087_v47 = vmul.f32 %v1922_v56, %v1922_v56  ;;  %v1091_v7 = vmul.f32 %v1954_v24, %v1954_v24  ;;  %v1092_v13 = vmul.f32 %v1964_v32, %v1964_v32 }
 0x115   :  { %1571 = vst [vmem:[%s2269_s3 + $0x70] sm:$0xff] %v1471_v5   ;;  %v1015_v31 = vadd.f32 %v1014_v25, %v532_v52  ;;  %v1147_v34 = vadd.f32 %v1146_v20, %v1084_v17  ;;  %v1088_v52 = vmul.f32 %v1934_v2, %v1934_v2 }
 0x116   :  { %1587 = vst [vmem:[%s2269_s3 + $0xf0] sm:$0xff] %v1551_v46   ;;  %v1100_v46 = vmul.f32 %v2032_v45, %v2032_v45 }
 0x117   :  { %v1148_v42 = vadd.f32 %v1147_v34, %v1085_v30  ;;  %v1016_v44 = vadd.f32 %v1015_v31, %v535_v54 }
 0x119   :  { %v1017_v48 = vadd.f32 %v1016_v44, %v1922_v56  ;;  %v1149_v50 = vadd.f32 %v1148_v42, %v1086_v40  ;;  %v1090_v56 = vmul.f32 %v1925_v57, %v1925_v57  ;;  %v1099_v40 = vmul.f32 %v2024_v35, %v2024_v35 }
 0x11b   :  { %v1018_v37 = vadd.f32 %v1017_v48, %v1934_v2  ;;  %v1150_v54 = vadd.f32 %v1149_v50, %v1087_v47 }
 0x11d   :  { %v1019_v61 = vadd.f32 %v1018_v37, %v1916_v49  ;;  %v1151_v63 = vadd.f32 %v1150_v54, %v1088_v52  ;;  %v1093_v49 = vmul.f32 %v1951_v18, %v1951_v18  ;;  %v1103_v52 = vmul.f32 %v2056_v12, %v2056_v12 }
 0x11f   :  { %v1152_v0 = vadd.f32 %v1151_v63, %v1089_v59  ;;  %v1020_v3 = vadd.f32 %v1019_v61, %v1925_v57  ;;  %v1094_v57 = vmul.f32 %v1957_v26, %v1957_v26  ;;  %v1104_v61 = vmul.f32 %v2064_v22, %v2064_v22 }
 0x121   :  { %v1021_v4 = vadd.f32 %v1020_v3, %v1954_v24  ;;  %v1153_v9 = vadd.f32 %v1152_v0, %v1090_v56 }
 0x123   :  { %v1154_v2 = vadd.f32 %v1153_v9, %v1091_v7  ;;  %v1022_v11 = vadd.f32 %v1021_v4, %v1964_v32  ;;  %v1107_v4 = vmul.f32 %v2088_v55, %v2088_v55 }
 0x125   :  { %v1023_v14 = vadd.f32 %v1022_v11, %v1951_v18  ;;  %v1155_v15 = vadd.f32 %v1154_v2, %v1092_v13  ;;  %v1097_v18 = vmul.f32 %v1980_v51, %v1980_v51  ;;  %v1108_v2 = vmul.f32 %v2096_v6, %v2096_v6 }
 0x127   :  { %v1156_v5 = vadd.f32 %v1155_v15, %v1093_v49  ;;  %v1024_v17 = vadd.f32 %v1023_v14, %v1957_v26  ;;  %v1098_v26 = vmul.f32 %v1986_v60, %v1986_v60  ;;  %v1111_v15 = vmul.f32 %v2120_v41, %v2120_v41 }
 0x129   :  { %v1025_v24 = vadd.f32 %v1024_v17, %v1992_v62  ;;  %v1157_v20 = vadd.f32 %v1156_v5, %v1094_v57  ;;  %v1112_v17 = vmul.f32 %v2128_v58, %v2128_v58 }
 0x12b   :  { %v1158_v25 = vadd.f32 %v1157_v20, %v1095_v19  ;;  %v1026_v32 = vadd.f32 %v1025_v24, %v2000_v8 }
 0x12d   :  { %v1027_v30 = vadd.f32 %v1026_v32, %v1980_v51  ;;  %v1159_v31 = vadd.f32 %v1158_v25, %v1096_v21  ;;  %v1101_v51 = vmul.f32 %v2009_v23, %v2009_v23  ;;  %v1115_v32 = vmul.f32 %v2152_v28, %v2152_v28 }
 0x12f   :  { %v1160_v34 = vadd.f32 %v1159_v31, %v1097_v18  ;;  %v1028_v36 = vadd.f32 %v1027_v30, %v1986_v60  ;;  %v1102_v60 = vmul.f32 %v2018_v33, %v2018_v33  ;;  %v1116_v30 = vmul.f32 %v2157_v38, %v2157_v38 }
 0x131   :  { %v1029_v62 = vadd.f32 %v1028_v36, %v2024_v35  ;;  %v1161_v42 = vadd.f32 %v1160_v34, %v1098_v26 }
 0x133   :  { %v1162_v44 = vadd.f32 %v1161_v42, %v1099_v40  ;;  %v1030_v8 = vadd.f32 %v1029_v62, %v2032_v45 }
 0x135   :  { %v1031_v47 = vadd.f32 %v1030_v8, %v2009_v23  ;;  %v1163_v48 = vadd.f32 %v1162_v44, %v1100_v46  ;;  %v1105_v23 = vmul.f32 %v2041_v1, %v2041_v1 }
 0x137   :  { %v1164_v50 = vadd.f32 %v1163_v48, %v1101_v51  ;;  %v1032_v37 = vadd.f32 %v1031_v47, %v2018_v33  ;;  %v1106_v33 = vmul.f32 %v2050_v10, %v2050_v10 }
 0x139   :  { %v1033_v35 = vadd.f32 %v1032_v37, %v2056_v12  ;;  %v1165_v54 = vadd.f32 %v1164_v50, %v1102_v60 }
 0x13b   :  { %v1166_v59 = vadd.f32 %v1165_v54, %v1103_v52  ;;  %v1034_v45 = vadd.f32 %v1033_v35, %v2064_v22 }
 0x13d   :  { %v1035_v63 = vadd.f32 %v1034_v45, %v2041_v1  ;;  %v1167_v56 = vadd.f32 %v1166_v59, %v1104_v61  ;;  %v1109_v1 = vmul.f32 %v2073_v43, %v2073_v43 }
 0x13f   :  { %v1168_v0 = vadd.f32 %v1167_v56, %v1105_v23  ;;  %v1036_v3 = vadd.f32 %v1035_v63, %v2050_v10  ;;  %v1110_v10 = vmul.f32 %v2082_v53, %v2082_v53 }
 0x141   :  { %v1037_v12 = vadd.f32 %v1036_v3, %v2088_v55  ;;  %v1169_v7 = vadd.f32 %v1168_v0, %v1106_v33 }
 0x143   :  { %v1170_v9 = vadd.f32 %v1169_v7, %v1107_v4  ;;  %v1038_v22 = vadd.f32 %v1037_v12, %v2096_v6 }
 0x145   :  { %v1039_v11 = vadd.f32 %v1038_v22, %v2073_v43  ;;  %v1171_v13 = vadd.f32 %v1170_v9, %v1108_v2  ;;  %v1113_v43 = vmul.f32 %v2105_v29, %v2105_v29 }
 0x147   :  { %v1172_v49 = vadd.f32 %v1171_v13, %v1109_v1  ;;  %v1040_v14 = vadd.f32 %v1039_v11, %v2082_v53  ;;  %v1114_v53 = vmul.f32 %v2114_v39, %v2114_v39 }
 0x149   :  { %v1041_v55 = vadd.f32 %v1040_v14, %v2120_v41  ;;  %v1173_v57 = vadd.f32 %v1172_v49, %v1110_v10 }
 0x14b   :  { %v1174_v5 = vadd.f32 %v1173_v57, %v1111_v15  ;;  %v1042_v6 = vadd.f32 %v1041_v55, %v2128_v58 }
 0x14d   :  { %v1043_v24 = vadd.f32 %v1042_v6, %v2105_v29  ;;  %v1175_v19 = vadd.f32 %v1174_v5, %v1112_v17  ;;  %v1117_v29 = vmul.f32 %v2137_v16, %v2137_v16 }
 0x14f   :  { %v1176_v20 = vadd.f32 %v1175_v19, %v1113_v43  ;;  %v1044_v25 = vadd.f32 %v1043_v24, %v2114_v39  ;;  %v1118_v39 = vmul.f32 %v2146_v27, %v2146_v27 }
 0x151   :  { %v1045_v41 = vadd.f32 %v1044_v25, %v2152_v28  ;;  %v1177_v21 = vadd.f32 %v1176_v20, %v1114_v53 }
 0x153   :  { %v1178_v18 = vadd.f32 %v1177_v21, %v1115_v32  ;;  %v1046_v58 = vadd.f32 %v1045_v41, %v2157_v38 }
 0x155   :  { %v1047_v31 = vadd.f32 %v1046_v58, %v2137_v16  ;;  %v1179_v26 = vadd.f32 %v1178_v18, %v1116_v30 }
 0x157   :  { %v1048_v34 = vadd.f32 %v1047_v31, %v2146_v27  ;;  %v1180_v36 = vadd.f32 %v1179_v26, %v1117_v29 }
 0x159   :  { %v1049_v28 = vrot.slane %v1048_v34, 4  ;;  %v1181_v62 = vadd.f32 %v1180_v36, %v1118_v39 }
 0x15b   :  { %v1050_v40 = vadd.f32 %v1049_v28, %v1048_v34  ;;  %v1182_v42 = vrot.slane %v1181_v62, 4 }
 0x15d   :  { %v1051_v44 = vrot.slane %v1050_v40, 2  ;;  %v1183_v8 = vadd.f32 %v1182_v42, %v1181_v62 }
 0x15f   :  { %v1052_v46 = vadd.f32 %v1051_v44, %v1050_v40  ;;  %v1184_v38 = vrot.slane %v1183_v8, 2 }
 0x161   :  { %v1053_v51 = vrot.slane %v1052_v46, 1  ;;  %v1185_v47 = vadd.f32 %v1184_v38, %v1183_v8 }
 0x163   :  { %v1186_v48 = vrot.slane %v1185_v47, 1  ;;  %v1054_v16 = vadd.f32 %v1053_v51, %v1052_v46 }
 0x165   :  { %v1187_v60 = vadd.f32 %v1186_v48, %v1185_v47 }
 0x167   :  { %v1189_v50 = vsel %vm1188_vm1, %v1054_v16, %v1187_v60 }
 0x168   :  { %v1191_v37 = vsel %vm1190_vm2, %v1189_v50, 0.0 }
 0x169   :  { %1192 = vst [vmem:[%s2270_s4] sm:$0xff] %v1191_v37 }

// kernel: generator_forward.37
= control target key start
LH: loop header
LB: loop body
LE: loop exit
PB: predicated region body
PF: predicated region fallthrough
CT: control target
= control target key end

     0   :  { %s2151_s12 = smov 0   ;;  %s2775_s0 = inlined_call_operand.vmem [shape: bf16[2048,8], index: 0, kind: input, shape index: {}]   ;;  %s2776_s1 = inlined_call_operand.vmem [shape: f32[1,8], index: 1, kind: input, shape index: {}]   ;;  %s2777_s2 = inlined_call_operand.vmem [shape: f32[1,8], index: 2, kind: input, shape index: {}]   ;;  %s2778_s3 = inlined_call_operand.vmem [shape: bf16[2048,8], index: 3, kind: output, shape index: {}]  }
   0x1 LB: > { %s1525_s13 = sadd.s32 4294967295, %s2129_s12   ;;  %p1529_p0 = scmp.ge.s32.totalorder %s2129_s12, 1  ;;  %s2129_s12 = sphi %s2151_s12, %s13_s12  }
   0x2   : > { %p138_p1 = scmp.lt.s32.totalorder %s2129_s12, 3 }
   0x4   : > { %p139_p2 = pnand %p1529_p0, %p138_p1 }
   0x5   : > { %s1530_s14 = sshll.u32 (!%p139_p2), %s1525_s13, 7 }
   0x6   : > { %142 = sbr.rel (%p139_p2) target bundleno = 179 (0xb3), region = 32  ;;  %p163_p3 = scmp.lt.s32.totalorder (!%p139_p2), %s1530_s14, 255 }
   0xb   : > { %s2780_s14 = smov (!%p163_p3, %s1530_s14), 255  ;;  %v2172_v0 = vld [vmem:[%s2776_s1] ss:$0 sm:$0xff]  ;;  %vm1340_vm0 = vcmask 60416  }
   0xc   : > { %s1531_s15 = sshll.u32 %s2780_s14, 2  ;;  %v2181_v9 = vld [vmem:[%s2777_s2] ss:$0 sm:$0xff] }
   0xd   : > { %s2167_s18 = scalar_lea.vmem %s2775_s0, %s1531_s15  ;;  %s2204_s25 = scalar_lea.vmem %s2778_s3, %s1531_s15 }
   0xe   : > { %v1795_v1 = vld [vmem:[%s2167_s18] sm:$0xff]   ;;  %v2050_v2 = vld [vmem:[%s2167_s18 + $0x8] sm:$0xff]   ;;  %v2051_v3 = vld [vmem:[%s2167_s18 + $0x10] sm:$0xff]  }
   0xf   : > { %v1796_v4 = vunpack.c.l.bf16 %v1795_v1  ;;  %v1797_v5 = vunpack.c.h.bf16 %v1795_v1  ;;  %v1800_v6 = vunpack.c.l.bf16 %v2050_v2  ;;  %v1801_v7 = vunpack.c.h.bf16 %v2050_v2  ;;  %v2052_v8 = vld [vmem:[%s2167_s18 + $0x18] sm:$0xff]   ;;  %v2053_v38 = vld [vmem:[%s2167_s18 + $0x20] sm:$0xff]   ;;  %v2054_v39 = vld [vmem:[%s2167_s18 + $0x28] sm:$0xff]  }
  0x10   : > { %v1804_v10 = vunpack.c.l.bf16 %v2051_v3  ;;  %v1805_v11 = vunpack.c.h.bf16 %v2051_v3  ;;  %v1808_v12 = vunpack.c.l.bf16 %v2052_v8  ;;  %v1809_v13 = vunpack.c.h.bf16 %v2052_v8  ;;  %v2055_v44 = vld [vmem:[%s2167_s18 + $0x30] sm:$0xff]   ;;  %v2056_v45 = vld [vmem:[%s2167_s18 + $0x38] sm:$0xff]  }
  0x11   : > { %v437_v14 = vmul.f32 %v1796_v4, %v2172_v0  ;;  %v438_v15 = vmul.f32 %v1797_v5, %v2172_v0  ;;  %v439_v16 = vmul.f32 %v1800_v6, %v2172_v0  ;;  %v440_v17 = vmul.f32 %v1801_v7, %v2172_v0 }
  0x12   : > { %v441_v18 = vmul.f32 %v1804_v10, %v2172_v0  ;;  %v442_v19 = vmul.f32 %v1805_v11, %v2172_v0  ;;  %v443_v20 = vmul.f32 %v1808_v12, %v2172_v0  ;;  %v444_v21 = vmul.f32 %v1809_v13, %v2172_v0 }
  0x13   : > { %v572_v22 = vadd.f32 %v2181_v9, %v437_v14  ;;  %v573_v23 = vadd.f32 %v2181_v9, %v438_v15  ;;  %v574_v24 = vadd.f32 %v2181_v9, %v439_v16  ;;  %v575_v25 = vadd.f32 %v2181_v9, %v440_v17 }
  0x14   : > { %v576_v26 = vadd.f32 %v2181_v9, %v441_v18  ;;  %v577_v27 = vadd.f32 %v2181_v9, %v442_v19  ;;  %v578_v28 = vadd.f32 %v2181_v9, %v443_v20  ;;  %v579_v29 = vadd.f32 %v2181_v9, %v444_v21  ;;  %v2057_v20 = vld [vmem:[%s2167_s18 + $0x40] sm:$0xff]   ;;  %v2058_v21 = vld [vmem:[%s2167_s18 + $0x48] sm:$0xff]  }
  0x15   : > { %v700_v30 = vmax.f32 %v572_v22, 0.0  ;;  %v701_v31 = vmax.f32 %v573_v23, 0.0  ;;  %v702_v32 = vmax.f32 %v574_v24, 0.0  ;;  %v703_v33 = vmax.f32 %v575_v25, 0.0 }
  0x16   : > { %v704_v34 = vmax.f32 %v576_v26, 0.0  ;;  %v705_v35 = vmax.f32 %v577_v27, 0.0  ;;  %v706_v36 = vmax.f32 %v578_v28, 0.0  ;;  %v707_v37 = vmax.f32 %v579_v29, 0.0  ;;  %v2059_v26 = vld [vmem:[%s2167_s18 + $0x50] sm:$0xff]   ;;  %v2060_v27 = vld [vmem:[%s2167_s18 + $0x58] sm:$0xff]  }
  0x17   : > { %v1666_v40 = vpack.c.bf16 %v700_v30, %v700_v30  ;;  %v1667_v41 = vpack.c.bf16 %v701_v31, %v701_v31  ;;  %v1668_v42 = vpack.c.bf16 %v702_v32, %v702_v32  ;;  %v1669_v43 = vpack.c.bf16 %v703_v33, %v703_v33 }
  0x18   : > { %v1670_v46 = vpack.c.bf16 %v704_v34, %v704_v34  ;;  %v1671_v47 = vpack.c.bf16 %v705_v35, %v705_v35  ;;  %v1672_v48 = vpack.c.bf16 %v706_v36, %v706_v36  ;;  %v1673_v49 = vpack.c.bf16 %v707_v37, %v707_v37 }
  0x19   : > { %1341 = vst.msk [vmem:[%s2204_s25] sm:$0xf] %vm1340_vm0, %v1666_v40  ;;  %1342 = vst.msk [vmem:[%s2204_s25 + $0x4] sm:$0xf] %vm1340_vm0, %v1667_v41  ;;  %v1812_v50 = vunpack.c.l.bf16 %v2053_v38  ;;  %v1813_v51 = vunpack.c.h.bf16 %v2053_v38  ;;  %v1816_v52 = vunpack.c.l.bf16 %v2054_v39  ;;  %v1817_v53 = vunpack.c.h.bf16 %v2054_v39 }
  0x1a   : > { %1343 = vst.msk [vmem:[%s2204_s25 + $0x8] sm:$0xf] %vm1340_vm0, %v1668_v42  ;;  %1344 = vst.msk [vmem:[%s2204_s25 + $0xc] sm:$0xf] %vm1340_vm0, %v1669_v43  ;;  %v1820_v54 = vunpack.c.l.bf16 %v2055_v44  ;;  %v1821_v55 = vunpack.c.h.bf16 %v2055_v44  ;;  %v1824_v56 = vunpack.c.l.bf16 %v2056_v45  ;;  %v1825_v57 = vunpack.c.h.bf16 %v2056_v45 }
  0x1b   : > { %1345 = vst.msk [vmem:[%s2204_s25 + $0x10] sm:$0xf] %vm1340_vm0, %v1670_v46  ;;  %1346 = vst.msk [vmem:[%s2204_s25 + $0x14] sm:$0xf] %vm1340_vm0, %v1671_v47  ;;  %v445_v58 = vmul.f32 %v1812_v50, %v2172_v0  ;;  %v446_v59 = vmul.f32 %v1813_v51, %v2172_v0  ;;  %v447_v60 = vmul.f32 %v1816_v52, %v2172_v0  ;;  %v1828_v32 = vunpack.c.l.bf16 %v2057_v20 }
  0x1c   : > { %1347 = vst.msk [vmem:[%s2204_s25 + $0x18] sm:$0xf] %vm1340_vm0, %v1672_v48  ;;  %1348 = vst.msk [vmem:[%s2204_s25 + $0x1c] sm:$0xf] %vm1340_vm0, %v1673_v49  ;;  %v448_v61 = vmul.f32 %v1817_v53, %v2172_v0  ;;  %v449_v62 = vmul.f32 %v1820_v54, %v2172_v0  ;;  %v450_v63 = vmul.f32 %v1821_v55, %v2172_v0  ;;  %v1829_v33 = vunpack.c.h.bf16 %v2057_v20 }
  0x1d   : > { %v451_v1 = vmul.f32 %v1824_v56, %v2172_v0  ;;  %v452_v2 = vmul.f32 %v1825_v57, %v2172_v0  ;;  %v580_v3 = vadd.f32 %v2181_v9, %v445_v58  ;;  %v581_v4 = vadd.f32 %v2181_v9, %v446_v59 }
  0x1e   : > { %v582_v5 = vadd.f32 %v2181_v9, %v447_v60  ;;  %v583_v6 = vadd.f32 %v2181_v9, %v448_v61  ;;  %v584_v7 = vadd.f32 %v2181_v9, %v449_v62  ;;  %v585_v8 = vadd.f32 %v2181_v9, %v450_v63 }
  0x1f   : > { %v586_v10 = vadd.f32 %v2181_v9, %v451_v1  ;;  %v587_v11 = vadd.f32 %v2181_v9, %v452_v2  ;;  %v708_v12 = vmax.f32 %v580_v3, 0.0  ;;  %v709_v13 = vmax.f32 %v581_v4, 0.0  ;;  %v2061_v1 = vld [vmem:[%s2167_s18 + $0x60] sm:$0xff]   ;;  %v2062_v2 = vld [vmem:[%s2167_s18 + $0x68] sm:$0xff]  }
  0x20   : > { %v710_v14 = vmax.f32 %v582_v5, 0.0  ;;  %v711_v15 = vmax.f32 %v583_v6, 0.0  ;;  %v712_v16 = vmax.f32 %v584_v7, 0.0  ;;  %v713_v17 = vmax.f32 %v585_v8, 0.0  ;;  %v2063_v7 = vld [vmem:[%s2167_s18 + $0x70] sm:$0xff]   ;;  %v2064_v8 = vld [vmem:[%s2167_s18 + $0x78] sm:$0xff]  }
  0x21   : > { %v714_v18 = vmax.f32 %v586_v10, 0.0  ;;  %v715_v19 = vmax.f32 %v587_v11, 0.0  ;;  %v1674_v22 = vpack.c.bf16 %v708_v12, %v708_v12  ;;  %v1675_v23 = vpack.c.bf16 %v709_v13, %v709_v13 }
  0x22   : > { %v1676_v24 = vpack.c.bf16 %v710_v14, %v710_v14  ;;  %v1677_v25 = vpack.c.bf16 %v711_v15, %v711_v15  ;;  %v1678_v28 = vpack.c.bf16 %v712_v16, %v712_v16  ;;  %v1679_v29 = vpack.c.bf16 %v713_v17, %v713_v17 }
  0x23   : > { %v1680_v30 = vpack.c.bf16 %v714_v18, %v714_v18  ;;  %v1681_v31 = vpack.c.bf16 %v715_v19, %v715_v19  ;;  %1349 = vst.msk [vmem:[%s2204_s25 + $0x20] sm:$0xf] %vm1340_vm0, %v1674_v22  ;;  %1350 = vst.msk [vmem:[%s2204_s25 + $0x24] sm:$0xf] %vm1340_vm0, %v1675_v23  ;;  %v1832_v34 = vunpack.c.l.bf16 %v2058_v21  ;;  %v1833_v35 = vunpack.c.h.bf16 %v2058_v21 }
  0x24   : > { %1351 = vst.msk [vmem:[%s2204_s25 + $0x28] sm:$0xf] %vm1340_vm0, %v1676_v24  ;;  %1352 = vst.msk [vmem:[%s2204_s25 + $0x2c] sm:$0xf] %vm1340_vm0, %v1677_v25  ;;  %v1836_v36 = vunpack.c.l.bf16 %v2059_v26  ;;  %v1837_v37 = vunpack.c.h.bf16 %v2059_v26  ;;  %v1840_v38 = vunpack.c.l.bf16 %v2060_v27  ;;  %v1841_v39 = vunpack.c.h.bf16 %v2060_v27 }
  0x25   : > { %1353 = vst.msk [vmem:[%s2204_s25 + $0x30] sm:$0xf] %vm1340_vm0, %v1678_v28  ;;  %1354 = vst.msk [vmem:[%s2204_s25 + $0x34] sm:$0xf] %vm1340_vm0, %v1679_v29  ;;  %v453_v40 = vmul.f32 %v1828_v32, %v2172_v0  ;;  %v454_v41 = vmul.f32 %v1829_v33, %v2172_v0  ;;  %v455_v42 = vmul.f32 %v1832_v34, %v2172_v0  ;;  %v1844_v14 = vunpack.c.l.bf16 %v2061_v1 }
  0x26   : > { %1355 = vst.msk [vmem:[%s2204_s25 + $0x38] sm:$0xf] %vm1340_vm0, %v1680_v30  ;;  %1356 = vst.msk [vmem:[%s2204_s25 + $0x3c] sm:$0xf] %vm1340_vm0, %v1681_v31  ;;  %v456_v43 = vmul.f32 %v1833_v35, %v2172_v0  ;;  %v457_v44 = vmul.f32 %v1836_v36, %v2172_v0  ;;  %v458_v45 = vmul.f32 %v1837_v37, %v2172_v0  ;;  %v1845_v15 = vunpack.c.h.bf16 %v2061_v1 }
  0x27   : > { %v459_v46 = vmul.f32 %v1840_v38, %v2172_v0  ;;  %v460_v47 = vmul.f32 %v1841_v39, %v2172_v0  ;;  %v588_v48 = vadd.f32 %v2181_v9, %v453_v40  ;;  %v589_v49 = vadd.f32 %v2181_v9, %v454_v41 }
  0x28   : > { %v590_v50 = vadd.f32 %v2181_v9, %v455_v42  ;;  %v591_v51 = vadd.f32 %v2181_v9, %v456_v43  ;;  %v592_v52 = vadd.f32 %v2181_v9, %v457_v44  ;;  %v593_v53 = vadd.f32 %v2181_v9, %v458_v45 }
  0x29   : > { %v594_v54 = vadd.f32 %v2181_v9, %v459_v46  ;;  %v595_v55 = vadd.f32 %v2181_v9, %v460_v47  ;;  %v716_v56 = vmax.f32 %v588_v48, 0.0  ;;  %v717_v57 = vmax.f32 %v589_v49, 0.0  ;;  %v2065_v46 = vld [vmem:[%s2167_s18 + $0x80] sm:$0xff]   ;;  %v2066_v47 = vld [vmem:[%s2167_s18 + $0x88] sm:$0xff]  }
  0x2a   : > { %v718_v58 = vmax.f32 %v590_v50, 0.0  ;;  %v719_v59 = vmax.f32 %v591_v51, 0.0  ;;  %v720_v60 = vmax.f32 %v592_v52, 0.0  ;;  %v721_v61 = vmax.f32 %v593_v53, 0.0  ;;  %v2067_v52 = vld [vmem:[%s2167_s18 + $0x90] sm:$0xff]   ;;  %v2068_v53 = vld [vmem:[%s2167_s18 + $0x98] sm:$0xff]  }
  0x2b   : > { %v722_v62 = vmax.f32 %v594_v54, 0.0  ;;  %v723_v63 = vmax.f32 %v595_v55, 0.0  ;;  %v1682_v3 = vpack.c.bf16 %v716_v56, %v716_v56  ;;  %v1683_v4 = vpack.c.bf16 %v717_v57, %v717_v57 }
  0x2c   : > { %v1684_v5 = vpack.c.bf16 %v718_v58, %v718_v58  ;;  %v1685_v6 = vpack.c.bf16 %v719_v59, %v719_v59  ;;  %v1686_v10 = vpack.c.bf16 %v720_v60, %v720_v60  ;;  %v1687_v11 = vpack.c.bf16 %v721_v61, %v721_v61 }
  0x2d   : > { %v1688_v12 = vpack.c.bf16 %v722_v62, %v722_v62  ;;  %v1689_v13 = vpack.c.bf16 %v723_v63, %v723_v63  ;;  %1357 = vst.msk [vmem:[%s2204_s25 + $0x40] sm:$0xf] %vm1340_vm0, %v1682_v3  ;;  %1358 = vst.msk [vmem:[%s2204_s25 + $0x44] sm:$0xf] %vm1340_vm0, %v1683_v4  ;;  %v1848_v16 = vunpack.c.l.bf16 %v2062_v2  ;;  %v1849_v17 = vunpack.c.h.bf16 %v2062_v2 }
  0x2e   : > { %1359 = vst.msk [vmem:[%s2204_s25 + $0x48] sm:$0xf] %vm1340_vm0, %v1684_v5  ;;  %1360 = vst.msk [vmem:[%s2204_s25 + $0x4c] sm:$0xf] %vm1340_vm0, %v1685_v6  ;;  %v1852_v18 = vunpack.c.l.bf16 %v2063_v7  ;;  %v1853_v19 = vunpack.c.h.bf16 %v2063_v7  ;;  %v1856_v20 = vunpack.c.l.bf16 %v2064_v8  ;;  %v1857_v21 = vunpack.c.h.bf16 %v2064_v8 }
  0x2f   : > { %1361 = vst.msk [vmem:[%s2204_s25 + $0x50] sm:$0xf] %vm1340_vm0, %v1686_v10  ;;  %1362 = vst.msk [vmem:[%s2204_s25 + $0x54] sm:$0xf] %vm1340_vm0, %v1687_v11  ;;  %v461_v22 = vmul.f32 %v1844_v14, %v2172_v0  ;;  %v462_v23 = vmul.f32 %v1845_v15, %v2172_v0  ;;  %v463_v24 = vmul.f32 %v1848_v16, %v2172_v0  ;;  %v1860_v58 = vunpack.c.l.bf16 %v2065_v46 }
  0x30   : > { %1363 = vst.msk [vmem:[%s2204_s25 + $0x58] sm:$0xf] %vm1340_vm0, %v1688_v12  ;;  %1364 = vst.msk [vmem:[%s2204_s25 + $0x5c] sm:$0xf] %vm1340_vm0, %v1689_v13  ;;  %v464_v25 = vmul.f32 %v1849_v17, %v2172_v0  ;;  %v465_v26 = vmul.f32 %v1852_v18, %v2172_v0  ;;  %v466_v27 = vmul.f32 %v1853_v19, %v2172_v0  ;;  %v1861_v59 = vunpack.c.h.bf16 %v2065_v46 }
  0x31   : > { %v467_v28 = vmul.f32 %v1856_v20, %v2172_v0  ;;  %v468_v29 = vmul.f32 %v1857_v21, %v2172_v0  ;;  %v596_v30 = vadd.f32 %v2181_v9, %v461_v22  ;;  %v597_v31 = vadd.f32 %v2181_v9, %v462_v23 }
  0x32   : > { %v598_v32 = vadd.f32 %v2181_v9, %v463_v24  ;;  %v599_v33 = vadd.f32 %v2181_v9, %v464_v25  ;;  %v600_v34 = vadd.f32 %v2181_v9, %v465_v26  ;;  %v601_v35 = vadd.f32 %v2181_v9, %v466_v27 }
  0x33   : > { %v602_v36 = vadd.f32 %v2181_v9, %v467_v28  ;;  %v603_v37 = vadd.f32 %v2181_v9, %v468_v29  ;;  %v724_v38 = vmax.f32 %v596_v30, 0.0  ;;  %v725_v39 = vmax.f32 %v597_v31, 0.0  ;;  %v2069_v28 = vld [vmem:[%s2167_s18 + $0xa0] sm:$0xff]   ;;  %v2070_v29 = vld [vmem:[%s2167_s18 + $0xa8] sm:$0xff]  }
  0x34   : > { %v726_v40 = vmax.f32 %v598_v32, 0.0  ;;  %v727_v41 = vmax.f32 %v599_v33, 0.0  ;;  %v728_v42 = vmax.f32 %v600_v34, 0.0  ;;  %v729_v43 = vmax.f32 %v601_v35, 0.0  ;;  %v2071_v34 = vld [vmem:[%s2167_s18 + $0xb0] sm:$0xff]   ;;  %v2072_v35 = vld [vmem:[%s2167_s18 + $0xb8] sm:$0xff]  }
  0x35   : > { %v730_v44 = vmax.f32 %v602_v36, 0.0  ;;  %v731_v45 = vmax.f32 %v603_v37, 0.0  ;;  %v1690_v48 = vpack.c.bf16 %v724_v38, %v724_v38  ;;  %v1691_v49 = vpack.c.bf16 %v725_v39, %v725_v39 }
  0x36   : > { %v1692_v50 = vpack.c.bf16 %v726_v40, %v726_v40  ;;  %v1693_v51 = vpack.c.bf16 %v727_v41, %v727_v41  ;;  %v1694_v54 = vpack.c.bf16 %v728_v42, %v728_v42  ;;  %v1695_v55 = vpack.c.bf16 %v729_v43, %v729_v43 }
  0x37   : > { %v1696_v56 = vpack.c.bf16 %v730_v44, %v730_v44  ;;  %v1697_v57 = vpack.c.bf16 %v731_v45, %v731_v45  ;;  %1365 = vst.msk [vmem:[%s2204_s25 + $0x60] sm:$0xf] %vm1340_vm0, %v1690_v48  ;;  %1366 = vst.msk [vmem:[%s2204_s25 + $0x64] sm:$0xf] %vm1340_vm0, %v1691_v49  ;;  %v1864_v60 = vunpack.c.l.bf16 %v2066_v47  ;;  %v1865_v61 = vunpack.c.h.bf16 %v2066_v47 }
  0x38   : > { %1367 = vst.msk [vmem:[%s2204_s25 + $0x68] sm:$0xf] %vm1340_vm0, %v1692_v50  ;;  %1368 = vst.msk [vmem:[%s2204_s25 + $0x6c] sm:$0xf] %vm1340_vm0, %v1693_v51  ;;  %v1868_v62 = vunpack.c.l.bf16 %v2067_v52  ;;  %v1869_v63 = vunpack.c.h.bf16 %v2067_v52  ;;  %v1872_v1 = vunpack.c.l.bf16 %v2068_v53  ;;  %v1873_v2 = vunpack.c.h.bf16 %v2068_v53 }
  0x39   : > { %1369 = vst.msk [vmem:[%s2204_s25 + $0x70] sm:$0xf] %vm1340_vm0, %v1694_v54  ;;  %1370 = vst.msk [vmem:[%s2204_s25 + $0x74] sm:$0xf] %vm1340_vm0, %v1695_v55  ;;  %v469_v3 = vmul.f32 %v1860_v58, %v2172_v0  ;;  %v470_v4 = vmul.f32 %v1861_v59, %v2172_v0  ;;  %v471_v5 = vmul.f32 %v1864_v60, %v2172_v0  ;;  %v1876_v40 = vunpack.c.l.bf16 %v2069_v28 }
  0x3a   : > { %1371 = vst.msk [vmem:[%s2204_s25 + $0x78] sm:$0xf] %vm1340_vm0, %v1696_v56  ;;  %1372 = vst.msk [vmem:[%s2204_s25 + $0x7c] sm:$0xf] %vm1340_vm0, %v1697_v57  ;;  %v472_v6 = vmul.f32 %v1865_v61, %v2172_v0  ;;  %v473_v7 = vmul.f32 %v1868_v62, %v2172_v0  ;;  %v474_v8 = vmul.f32 %v1869_v63, %v2172_v0  ;;  %v1877_v41 = vunpack.c.h.bf16 %v2069_v28 }
  0x3b   : > { %v475_v10 = vmul.f32 %v1872_v1, %v2172_v0  ;;  %v476_v11 = vmul.f32 %v1873_v2, %v2172_v0  ;;  %v604_v12 = vadd.f32 %v2181_v9, %v469_v3  ;;  %v605_v13 = vadd.f32 %v2181_v9, %v470_v4 }
  0x3c   : > { %v606_v14 = vadd.f32 %v2181_v9, %v471_v5  ;;  %v607_v15 = vadd.f32 %v2181_v9, %v472_v6  ;;  %v608_v16 = vadd.f32 %v2181_v9, %v473_v7  ;;  %v609_v17 = vadd.f32 %v2181_v9, %v474_v8 }
  0x3d   : > { %v610_v18 = vadd.f32 %v2181_v9, %v475_v10  ;;  %v611_v19 = vadd.f32 %v2181_v9, %v476_v11  ;;  %v732_v20 = vmax.f32 %v604_v12, 0.0  ;;  %v733_v21 = vmax.f32 %v605_v13, 0.0  ;;  %v2073_v10 = vld [vmem:[%s2167_s18 + $0xc0] sm:$0xff]   ;;  %v2074_v11 = vld [vmem:[%s2167_s18 + $0xc8] sm:$0xff]  }
  0x3e   : > { %v734_v22 = vmax.f32 %v606_v14, 0.0  ;;  %v735_v23 = vmax.f32 %v607_v15, 0.0  ;;  %v736_v24 = vmax.f32 %v608_v16, 0.0  ;;  %v737_v25 = vmax.f32 %v609_v17, 0.0  ;;  %v2075_v16 = vld [vmem:[%s2167_s18 + $0xd0] sm:$0xff]   ;;  %v2076_v17 = vld [vmem:[%s2167_s18 + $0xd8] sm:$0xff]  }
  0x3f   : > { %v738_v26 = vmax.f32 %v610_v18, 0.0  ;;  %v739_v27 = vmax.f32 %v611_v19, 0.0  ;;  %v1698_v30 = vpack.c.bf16 %v732_v20, %v732_v20  ;;  %v1699_v31 = vpack.c.bf16 %v733_v21, %v733_v21 }
  0x40   : > { %v1700_v32 = vpack.c.bf16 %v734_v22, %v734_v22  ;;  %v1701_v33 = vpack.c.bf16 %v735_v23, %v735_v23  ;;  %v1702_v36 = vpack.c.bf16 %v736_v24, %v736_v24  ;;  %v1703_v37 = vpack.c.bf16 %v737_v25, %v737_v25 }
  0x41   : > { %v1704_v38 = vpack.c.bf16 %v738_v26, %v738_v26  ;;  %v1705_v39 = vpack.c.bf16 %v739_v27, %v739_v27  ;;  %1373 = vst.msk [vmem:[%s2204_s25 + $0x80] sm:$0xf] %vm1340_vm0, %v1698_v30  ;;  %1374 = vst.msk [vmem:[%s2204_s25 + $0x84] sm:$0xf] %vm1340_vm0, %v1699_v31  ;;  %v1880_v42 = vunpack.c.l.bf16 %v2070_v29  ;;  %v1881_v43 = vunpack.c.h.bf16 %v2070_v29 }
  0x42   : > { %1375 = vst.msk [vmem:[%s2204_s25 + $0x88] sm:$0xf] %vm1340_vm0, %v1700_v32  ;;  %1376 = vst.msk [vmem:[%s2204_s25 + $0x8c] sm:$0xf] %vm1340_vm0, %v1701_v33  ;;  %v1884_v44 = vunpack.c.l.bf16 %v2071_v34  ;;  %v1885_v45 = vunpack.c.h.bf16 %v2071_v34  ;;  %v1888_v46 = vunpack.c.l.bf16 %v2072_v35  ;;  %v1889_v47 = vunpack.c.h.bf16 %v2072_v35 }
  0x43   : > { %1377 = vst.msk [vmem:[%s2204_s25 + $0x90] sm:$0xf] %vm1340_vm0, %v1702_v36  ;;  %1378 = vst.msk [vmem:[%s2204_s25 + $0x94] sm:$0xf] %vm1340_vm0, %v1703_v37  ;;  %v477_v48 = vmul.f32 %v1876_v40, %v2172_v0  ;;  %v478_v49 = vmul.f32 %v1877_v41, %v2172_v0  ;;  %v479_v50 = vmul.f32 %v1880_v42, %v2172_v0  ;;  %v1892_v22 = vunpack.c.l.bf16 %v2073_v10 }
  0x44   : > { %1379 = vst.msk [vmem:[%s2204_s25 + $0x98] sm:$0xf] %vm1340_vm0, %v1704_v38  ;;  %1380 = vst.msk [vmem:[%s2204_s25 + $0x9c] sm:$0xf] %vm1340_vm0, %v1705_v39  ;;  %v480_v51 = vmul.f32 %v1881_v43, %v2172_v0  ;;  %v481_v52 = vmul.f32 %v1884_v44, %v2172_v0  ;;  %v482_v53 = vmul.f32 %v1885_v45, %v2172_v0  ;;  %v1893_v23 = vunpack.c.h.bf16 %v2073_v10 }
  0x45   : > { %v483_v54 = vmul.f32 %v1888_v46, %v2172_v0  ;;  %v484_v55 = vmul.f32 %v1889_v47, %v2172_v0  ;;  %v612_v56 = vadd.f32 %v2181_v9, %v477_v48  ;;  %v613_v57 = vadd.f32 %v2181_v9, %v478_v49 }
  0x46   : > { %v614_v58 = vadd.f32 %v2181_v9, %v479_v50  ;;  %v615_v59 = vadd.f32 %v2181_v9, %v480_v51  ;;  %v616_v60 = vadd.f32 %v2181_v9, %v481_v52  ;;  %v617_v61 = vadd.f32 %v2181_v9, %v482_v53 }
  0x47   : > { %v618_v62 = vadd.f32 %v2181_v9, %v483_v54  ;;  %v619_v63 = vadd.f32 %v2181_v9, %v484_v55  ;;  %v740_v1 = vmax.f32 %v612_v56, 0.0  ;;  %v741_v2 = vmax.f32 %v613_v57, 0.0  ;;  %v2077_v54 = vld [vmem:[%s2167_s18 + $0xe0] sm:$0xff]   ;;  %v2078_v55 = vld [vmem:[%s2167_s18 + $0xe8] sm:$0xff]  }
  0x48   : > { %v742_v3 = vmax.f32 %v614_v58, 0.0  ;;  %v743_v4 = vmax.f32 %v615_v59, 0.0  ;;  %v744_v5 = vmax.f32 %v616_v60, 0.0  ;;  %v745_v6 = vmax.f32 %v617_v61, 0.0  ;;  %v2079_v60 = vld [vmem:[%s2167_s18 + $0xf0] sm:$0xff]   ;;  %v2080_v61 = vld [vmem:[%s2167_s18 + $0xf8] sm:$0xff]  }
  0x49   : > { %v746_v7 = vmax.f32 %v618_v62, 0.0  ;;  %v747_v8 = vmax.f32 %v619_v63, 0.0  ;;  %v1706_v12 = vpack.c.bf16 %v740_v1, %v740_v1  ;;  %v1707_v13 = vpack.c.bf16 %v741_v2, %v741_v2 }
  0x4a   : > { %v1708_v14 = vpack.c.bf16 %v742_v3, %v742_v3  ;;  %v1709_v15 = vpack.c.bf16 %v743_v4, %v743_v4  ;;  %v1710_v18 = vpack.c.bf16 %v744_v5, %v744_v5  ;;  %v1711_v19 = vpack.c.bf16 %v745_v6, %v745_v6 }
  0x4b   : > { %v1712_v20 = vpack.c.bf16 %v746_v7, %v746_v7  ;;  %v1713_v21 = vpack.c.bf16 %v747_v8, %v747_v8  ;;  %1381 = vst.msk [vmem:[%s2204_s25 + $0xa0] sm:$0xf] %vm1340_vm0, %v1706_v12  ;;  %1382 = vst.msk [vmem:[%s2204_s25 + $0xa4] sm:$0xf] %vm1340_vm0, %v1707_v13  ;;  %v1896_v24 = vunpack.c.l.bf16 %v2074_v11  ;;  %v1897_v25 = vunpack.c.h.bf16 %v2074_v11 }
  0x4c   : > { %1383 = vst.msk [vmem:[%s2204_s25 + $0xa8] sm:$0xf] %vm1340_vm0, %v1708_v14  ;;  %1384 = vst.msk [vmem:[%s2204_s25 + $0xac] sm:$0xf] %vm1340_vm0, %v1709_v15  ;;  %v1900_v26 = vunpack.c.l.bf16 %v2075_v16  ;;  %v1901_v27 = vunpack.c.h.bf16 %v2075_v16  ;;  %v1904_v28 = vunpack.c.l.bf16 %v2076_v17  ;;  %v1905_v29 = vunpack.c.h.bf16 %v2076_v17 }
  0x4d   : > { %1385 = vst.msk [vmem:[%s2204_s25 + $0xb0] sm:$0xf] %vm1340_vm0, %v1710_v18  ;;  %1386 = vst.msk [vmem:[%s2204_s25 + $0xb4] sm:$0xf] %vm1340_vm0, %v1711_v19  ;;  %v485_v30 = vmul.f32 %v1892_v22, %v2172_v0  ;;  %v486_v31 = vmul.f32 %v1893_v23, %v2172_v0  ;;  %v487_v32 = vmul.f32 %v1896_v24, %v2172_v0  ;;  %v1908_v3 = vunpack.c.l.bf16 %v2077_v54 }
  0x4e   : > { %1387 = vst.msk [vmem:[%s2204_s25 + $0xb8] sm:$0xf] %vm1340_vm0, %v1712_v20  ;;  %1388 = vst.msk [vmem:[%s2204_s25 + $0xbc] sm:$0xf] %vm1340_vm0, %v1713_v21  ;;  %v488_v33 = vmul.f32 %v1897_v25, %v2172_v0  ;;  %v489_v34 = vmul.f32 %v1900_v26, %v2172_v0  ;;  %v490_v35 = vmul.f32 %v1901_v27, %v2172_v0  ;;  %v1909_v4 = vunpack.c.h.bf16 %v2077_v54 }
  0x4f   : > { %v491_v36 = vmul.f32 %v1904_v28, %v2172_v0  ;;  %v492_v37 = vmul.f32 %v1905_v29, %v2172_v0  ;;  %v620_v38 = vadd.f32 %v2181_v9, %v485_v30  ;;  %v621_v39 = vadd.f32 %v2181_v9, %v486_v31 }
  0x50   : > { %v622_v40 = vadd.f32 %v2181_v9, %v487_v32  ;;  %v623_v41 = vadd.f32 %v2181_v9, %v488_v33  ;;  %v624_v42 = vadd.f32 %v2181_v9, %v489_v34  ;;  %v625_v43 = vadd.f32 %v2181_v9, %v490_v35 }
  0x51   : > { %v626_v44 = vadd.f32 %v2181_v9, %v491_v36  ;;  %v627_v45 = vadd.f32 %v2181_v9, %v492_v37  ;;  %v748_v46 = vmax.f32 %v620_v38, 0.0  ;;  %v749_v47 = vmax.f32 %v621_v39, 0.0  ;;  %v2081_v36 = vld [vmem:[%s2167_s18 + $0x100] sm:$0xff]   ;;  %v2082_v37 = vld [vmem:[%s2167_s18 + $0x108] sm:$0xff]  }
  0x52   : > { %v750_v48 = vmax.f32 %v622_v40, 0.0  ;;  %v751_v49 = vmax.f32 %v623_v41, 0.0  ;;  %v752_v50 = vmax.f32 %v624_v42, 0.0  ;;  %v753_v51 = vmax.f32 %v625_v43, 0.0  ;;  %v2083_v42 = vld [vmem:[%s2167_s18 + $0x110] sm:$0xff]   ;;  %v2084_v43 = vld [vmem:[%s2167_s18 + $0x118] sm:$0xff]  }
  0x53   : > { %v754_v52 = vmax.f32 %v626_v44, 0.0  ;;  %v755_v53 = vmax.f32 %v627_v45, 0.0  ;;  %v1714_v56 = vpack.c.bf16 %v748_v46, %v748_v46  ;;  %v1715_v57 = vpack.c.bf16 %v749_v47, %v749_v47 }
  0x54   : > { %v1716_v58 = vpack.c.bf16 %v750_v48, %v750_v48  ;;  %v1717_v59 = vpack.c.bf16 %v751_v49, %v751_v49  ;;  %v1718_v62 = vpack.c.bf16 %v752_v50, %v752_v50  ;;  %v1719_v63 = vpack.c.bf16 %v753_v51, %v753_v51 }
  0x55   : > { %v1720_v1 = vpack.c.bf16 %v754_v52, %v754_v52  ;;  %v1721_v2 = vpack.c.bf16 %v755_v53, %v755_v53  ;;  %1389 = vst.msk [vmem:[%s2204_s25 + $0xc0] sm:$0xf] %vm1340_vm0, %v1714_v56  ;;  %1390 = vst.msk [vmem:[%s2204_s25 + $0xc4] sm:$0xf] %vm1340_vm0, %v1715_v57  ;;  %v1912_v5 = vunpack.c.l.bf16 %v2078_v55  ;;  %v1913_v6 = vunpack.c.h.bf16 %v2078_v55 }
  0x56   : > { %1391 = vst.msk [vmem:[%s2204_s25 + $0xc8] sm:$0xf] %vm1340_vm0, %v1716_v58  ;;  %1392 = vst.msk [vmem:[%s2204_s25 + $0xcc] sm:$0xf] %vm1340_vm0, %v1717_v59  ;;  %v1916_v7 = vunpack.c.l.bf16 %v2079_v60  ;;  %v1917_v8 = vunpack.c.h.bf16 %v2079_v60  ;;  %v1920_v10 = vunpack.c.l.bf16 %v2080_v61  ;;  %v1921_v11 = vunpack.c.h.bf16 %v2080_v61 }
  0x57   : > { %1393 = vst.msk [vmem:[%s2204_s25 + $0xd0] sm:$0xf] %vm1340_vm0, %v1718_v62  ;;  %1394 = vst.msk [vmem:[%s2204_s25 + $0xd4] sm:$0xf] %vm1340_vm0, %v1719_v63  ;;  %v493_v12 = vmul.f32 %v1908_v3, %v2172_v0  ;;  %v494_v13 = vmul.f32 %v1909_v4, %v2172_v0  ;;  %v495_v14 = vmul.f32 %v1912_v5, %v2172_v0  ;;  %v1924_v48 = vunpack.c.l.bf16 %v2081_v36 }
  0x58   : > { %1395 = vst.msk [vmem:[%s2204_s25 + $0xd8] sm:$0xf] %vm1340_vm0, %v1720_v1  ;;  %1396 = vst.msk [vmem:[%s2204_s25 + $0xdc] sm:$0xf] %vm1340_vm0, %v1721_v2  ;;  %v496_v15 = vmul.f32 %v1913_v6, %v2172_v0  ;;  %v497_v16 = vmul.f32 %v1916_v7, %v2172_v0  ;;  %v498_v17 = vmul.f32 %v1917_v8, %v2172_v0  ;;  %v1925_v49 = vunpack.c.h.bf16 %v2081_v36 }
  0x59   : > { %v499_v18 = vmul.f32 %v1920_v10, %v2172_v0  ;;  %v500_v19 = vmul.f32 %v1921_v11, %v2172_v0  ;;  %v628_v20 = vadd.f32 %v2181_v9, %v493_v12  ;;  %v629_v21 = vadd.f32 %v2181_v9, %v494_v13 }
  0x5a   : > { %v630_v22 = vadd.f32 %v2181_v9, %v495_v14  ;;  %v631_v23 = vadd.f32 %v2181_v9, %v496_v15  ;;  %v632_v24 = vadd.f32 %v2181_v9, %v497_v16  ;;  %v633_v25 = vadd.f32 %v2181_v9, %v498_v17 }
  0x5b   : > { %v634_v26 = vadd.f32 %v2181_v9, %v499_v18  ;;  %v635_v27 = vadd.f32 %v2181_v9, %v500_v19  ;;  %v756_v28 = vmax.f32 %v628_v20, 0.0  ;;  %v757_v29 = vmax.f32 %v629_v21, 0.0  ;;  %v2085_v18 = vld [vmem:[%s2167_s18 + $0x120] sm:$0xff]   ;;  %v2086_v19 = vld [vmem:[%s2167_s18 + $0x128] sm:$0xff]  }
  0x5c   : > { %v758_v30 = vmax.f32 %v630_v22, 0.0  ;;  %v759_v31 = vmax.f32 %v631_v23, 0.0  ;;  %v760_v32 = vmax.f32 %v632_v24, 0.0  ;;  %v761_v33 = vmax.f32 %v633_v25, 0.0  ;;  %v2087_v24 = vld [vmem:[%s2167_s18 + $0x130] sm:$0xff]   ;;  %v2088_v25 = vld [vmem:[%s2167_s18 + $0x138] sm:$0xff]  }
  0x5d   : > { %v762_v34 = vmax.f32 %v634_v26, 0.0  ;;  %v763_v35 = vmax.f32 %v635_v27, 0.0  ;;  %v1722_v38 = vpack.c.bf16 %v756_v28, %v756_v28  ;;  %v1723_v39 = vpack.c.bf16 %v757_v29, %v757_v29 }
  0x5e   : > { %v1724_v40 = vpack.c.bf16 %v758_v30, %v758_v30  ;;  %v1725_v41 = vpack.c.bf16 %v759_v31, %v759_v31  ;;  %v1726_v44 = vpack.c.bf16 %v760_v32, %v760_v32  ;;  %v1727_v45 = vpack.c.bf16 %v761_v33, %v761_v33 }
  0x5f   : > { %v1728_v46 = vpack.c.bf16 %v762_v34, %v762_v34  ;;  %v1729_v47 = vpack.c.bf16 %v763_v35, %v763_v35  ;;  %1397 = vst.msk [vmem:[%s2204_s25 + $0xe0] sm:$0xf] %vm1340_vm0, %v1722_v38  ;;  %1398 = vst.msk [vmem:[%s2204_s25 + $0xe4] sm:$0xf] %vm1340_vm0, %v1723_v39  ;;  %v1928_v50 = vunpack.c.l.bf16 %v2082_v37  ;;  %v1929_v51 = vunpack.c.h.bf16 %v2082_v37 }
  0x60   : > { %1399 = vst.msk [vmem:[%s2204_s25 + $0xe8] sm:$0xf] %vm1340_vm0, %v1724_v40  ;;  %1400 = vst.msk [vmem:[%s2204_s25 + $0xec] sm:$0xf] %vm1340_vm0, %v1725_v41  ;;  %v1932_v52 = vunpack.c.l.bf16 %v2083_v42  ;;  %v1933_v53 = vunpack.c.h.bf16 %v2083_v42  ;;  %v1936_v54 = vunpack.c.l.bf16 %v2084_v43  ;;  %v1937_v55 = vunpack.c.h.bf16 %v2084_v43 }
  0x61   : > { %1401 = vst.msk [vmem:[%s2204_s25 + $0xf0] sm:$0xf] %vm1340_vm0, %v1726_v44  ;;  %1402 = vst.msk [vmem:[%s2204_s25 + $0xf4] sm:$0xf] %vm1340_vm0, %v1727_v45  ;;  %v501_v56 = vmul.f32 %v1924_v48, %v2172_v0  ;;  %v502_v57 = vmul.f32 %v1925_v49, %v2172_v0  ;;  %v503_v58 = vmul.f32 %v1928_v50, %v2172_v0  ;;  %v1940_v30 = vunpack.c.l.bf16 %v2085_v18 }
  0x62   : > { %1403 = vst.msk [vmem:[%s2204_s25 + $0xf8] sm:$0xf] %vm1340_vm0, %v1728_v46  ;;  %1404 = vst.msk [vmem:[%s2204_s25 + $0xfc] sm:$0xf] %vm1340_vm0, %v1729_v47  ;;  %v504_v59 = vmul.f32 %v1929_v51, %v2172_v0  ;;  %v505_v60 = vmul.f32 %v1932_v52, %v2172_v0  ;;  %v506_v61 = vmul.f32 %v1933_v53, %v2172_v0  ;;  %v1941_v31 = vunpack.c.h.bf16 %v2085_v18  ;;  %v2553_v18 = vld [vmem:[%s2776_s1] ss:$0 sm:$0xff] }
  0x63   : > { %v507_v62 = vmul.f32 %v1936_v54, %v2172_v0  ;;  %v508_v63 = vmul.f32 %v1937_v55, %v2172_v0  ;;  %v636_v1 = vadd.f32 %v2181_v9, %v501_v56  ;;  %v637_v2 = vadd.f32 %v2181_v9, %v502_v57 }
  0x64   : > { %v638_v3 = vadd.f32 %v2181_v9, %v503_v58  ;;  %v639_v4 = vadd.f32 %v2181_v9, %v504_v59  ;;  %v640_v5 = vadd.f32 %v2181_v9, %v505_v60  ;;  %v641_v6 = vadd.f32 %v2181_v9, %v506_v61  ;;  %v2089_v61 = vld [vmem:[%s2167_s18 + $0x140] sm:$0xff]  }
  0x65   : > { %v642_v7 = vadd.f32 %v2181_v9, %v507_v62  ;;  %v643_v8 = vadd.f32 %v2181_v9, %v508_v63  ;;  %v764_v10 = vmax.f32 %v636_v1, 0.0  ;;  %v765_v11 = vmax.f32 %v637_v2, 0.0  ;;  %v2090_v62 = vld [vmem:[%s2167_s18 + $0x148] sm:$0xff]  }
  0x66   : > { %v766_v12 = vmax.f32 %v638_v3, 0.0  ;;  %v767_v13 = vmax.f32 %v639_v4, 0.0  ;;  %v768_v14 = vmax.f32 %v640_v5, 0.0  ;;  %v769_v15 = vmax.f32 %v641_v6, 0.0  ;;  %v2091_v3 = vld [vmem:[%s2167_s18 + $0x150] sm:$0xff]   ;;  %v2092_v4 = vld [vmem:[%s2167_s18 + $0x158] sm:$0xff]  }
  0x67   : > { %v770_v16 = vmax.f32 %v642_v7, 0.0  ;;  %v771_v17 = vmax.f32 %v643_v8, 0.0  ;;  %v1730_v20 = vpack.c.bf16 %v764_v10, %v764_v10  ;;  %v1731_v21 = vpack.c.bf16 %v765_v11, %v765_v11 }
  0x68   : > { %v1732_v22 = vpack.c.bf16 %v766_v12, %v766_v12  ;;  %v1733_v23 = vpack.c.bf16 %v767_v13, %v767_v13  ;;  %v1734_v26 = vpack.c.bf16 %v768_v14, %v768_v14  ;;  %v1735_v27 = vpack.c.bf16 %v769_v15, %v769_v15 }
  0x69   : > { %v1736_v28 = vpack.c.bf16 %v770_v16, %v770_v16  ;;  %v1737_v29 = vpack.c.bf16 %v771_v17, %v771_v17  ;;  %1405 = vst.msk [vmem:[%s2204_s25 + $0x100] sm:$0xf] %vm1340_vm0, %v1730_v20  ;;  %1406 = vst.msk [vmem:[%s2204_s25 + $0x104] sm:$0xf] %vm1340_vm0, %v1731_v21  ;;  %v1944_v32 = vunpack.c.l.bf16 %v2086_v19  ;;  %v1945_v33 = vunpack.c.h.bf16 %v2086_v19 }
  0x6a   : > { %1407 = vst.msk [vmem:[%s2204_s25 + $0x108] sm:$0xf] %vm1340_vm0, %v1732_v22  ;;  %1408 = vst.msk [vmem:[%s2204_s25 + $0x10c] sm:$0xf] %vm1340_vm0, %v1733_v23  ;;  %v1948_v34 = vunpack.c.l.bf16 %v2087_v24  ;;  %v1949_v35 = vunpack.c.h.bf16 %v2087_v24  ;;  %v1952_v36 = vunpack.c.l.bf16 %v2088_v25  ;;  %v1953_v37 = vunpack.c.h.bf16 %v2088_v25 }
  0x6b   : > { %1409 = vst.msk [vmem:[%s2204_s25 + $0x110] sm:$0xf] %vm1340_vm0, %v1734_v26  ;;  %1410 = vst.msk [vmem:[%s2204_s25 + $0x114] sm:$0xf] %vm1340_vm0, %v1735_v27  ;;  %v509_v38 = vmul.f32 %v1940_v30, %v2172_v0  ;;  %v510_v39 = vmul.f32 %v1941_v31, %v2172_v0  ;;  %v511_v40 = vmul.f32 %v1944_v32, %v2172_v0  ;;  %v1956_v10 = vunpack.c.l.bf16 %v2089_v61  ;;  %v2566_v27 = vld [vmem:[%s2777_s2] ss:$0 sm:$0xff] }
  0x6c   : > { %1411 = vst.msk [vmem:[%s2204_s25 + $0x118] sm:$0xf] %vm1340_vm0, %v1736_v28  ;;  %1412 = vst.msk [vmem:[%s2204_s25 + $0x11c] sm:$0xf] %vm1340_vm0, %v1737_v29  ;;  %v512_v41 = vmul.f32 %v1945_v33, %v2172_v0  ;;  %v513_v42 = vmul.f32 %v1948_v34, %v2172_v0  ;;  %v514_v43 = vmul.f32 %v1949_v35, %v2172_v0  ;;  %v1957_v11 = vunpack.c.h.bf16 %v2089_v61 }
  0x6d   : > { %v515_v44 = vmul.f32 %v1952_v36, %v2172_v0  ;;  %v516_v45 = vmul.f32 %v1953_v37, %v2172_v0  ;;  %v644_v46 = vadd.f32 %v2181_v9, %v509_v38  ;;  %v645_v47 = vadd.f32 %v2181_v9, %v510_v39 }
  0x6e   : > { %v646_v48 = vadd.f32 %v2181_v9, %v511_v40  ;;  %v647_v49 = vadd.f32 %v2181_v9, %v512_v41  ;;  %v648_v50 = vadd.f32 %v2181_v9, %v513_v42  ;;  %v649_v51 = vadd.f32 %v2181_v9, %v514_v43 }
  0x6f   : > { %v650_v52 = vadd.f32 %v2181_v9, %v515_v44  ;;  %v651_v53 = vadd.f32 %v2181_v9, %v516_v45  ;;  %v772_v0 = vmax.f32 %v644_v46, 0.0  ;;  %v773_v54 = vmax.f32 %v645_v47, 0.0  ;;  %v2093_v44 = vld [vmem:[%s2167_s18 + $0x160] sm:$0xff]   ;;  %v2094_v45 = vld [vmem:[%s2167_s18 + $0x168] sm:$0xff]  }
  0x70   : > { %v774_v55 = vmax.f32 %v646_v48, 0.0  ;;  %v775_v56 = vmax.f32 %v647_v49, 0.0  ;;  %v776_v57 = vmax.f32 %v648_v50, 0.0  ;;  %v777_v58 = vmax.f32 %v649_v51, 0.0  ;;  %v2095_v50 = vld [vmem:[%s2167_s18 + $0x170] sm:$0xff]   ;;  %v2096_v51 = vld [vmem:[%s2167_s18 + $0x178] sm:$0xff]  }
  0x71   : > { %v778_v59 = vmax.f32 %v650_v52, 0.0  ;;  %v779_v60 = vmax.f32 %v651_v53, 0.0  ;;  %v1738_v63 = vpack.c.bf16 %v772_v0, %v772_v0  ;;  %v1739_v1 = vpack.c.bf16 %v773_v54, %v773_v54 }
  0x72   : > { %v1740_v2 = vpack.c.bf16 %v774_v55, %v774_v55  ;;  %v1741_v9 = vpack.c.bf16 %v775_v56, %v775_v56  ;;  %v1742_v5 = vpack.c.bf16 %v776_v57, %v776_v57  ;;  %v1743_v6 = vpack.c.bf16 %v777_v58, %v777_v58 }
  0x73   : > { %v1744_v7 = vpack.c.bf16 %v778_v59, %v778_v59  ;;  %v1745_v8 = vpack.c.bf16 %v779_v60, %v779_v60  ;;  %1413 = vst.msk [vmem:[%s2204_s25 + $0x120] sm:$0xf] %vm1340_vm0, %v1738_v63  ;;  %1414 = vst.msk [vmem:[%s2204_s25 + $0x124] sm:$0xf] %vm1340_vm0, %v1739_v1  ;;  %v1960_v12 = vunpack.c.l.bf16 %v2090_v62  ;;  %v1961_v13 = vunpack.c.h.bf16 %v2090_v62 }
  0x74   : > { %1415 = vst.msk [vmem:[%s2204_s25 + $0x128] sm:$0xf] %vm1340_vm0, %v1740_v2  ;;  %1416 = vst.msk [vmem:[%s2204_s25 + $0x12c] sm:$0xf] %vm1340_vm0, %v1741_v9  ;;  %v1964_v14 = vunpack.c.l.bf16 %v2091_v3  ;;  %v1965_v15 = vunpack.c.h.bf16 %v2091_v3  ;;  %v1968_v16 = vunpack.c.l.bf16 %v2092_v4  ;;  %v1969_v17 = vunpack.c.h.bf16 %v2092_v4 }
  0x75   : > { %1417 = vst.msk [vmem:[%s2204_s25 + $0x130] sm:$0xf] %vm1340_vm0, %v1742_v5  ;;  %1418 = vst.msk [vmem:[%s2204_s25 + $0x134] sm:$0xf] %vm1340_vm0, %v1743_v6  ;;  %v517_v19 = vmul.f32 %v2553_v18, %v1956_v10  ;;  %v518_v20 = vmul.f32 %v2553_v18, %v1957_v11  ;;  %v519_v21 = vmul.f32 %v2553_v18, %v1960_v12  ;;  %v1972_v55 = vunpack.c.l.bf16 %v2093_v44 }
  0x76   : > { %1419 = vst.msk [vmem:[%s2204_s25 + $0x138] sm:$0xf] %vm1340_vm0, %v1744_v7  ;;  %1420 = vst.msk [vmem:[%s2204_s25 + $0x13c] sm:$0xf] %vm1340_vm0, %v1745_v8  ;;  %v520_v22 = vmul.f32 %v2553_v18, %v1961_v13  ;;  %v521_v23 = vmul.f32 %v2553_v18, %v1964_v14  ;;  %v522_v24 = vmul.f32 %v2553_v18, %v1965_v15  ;;  %v1973_v56 = vunpack.c.h.bf16 %v2093_v44 }
  0x77   : > { %v523_v25 = vmul.f32 %v2553_v18, %v1968_v16  ;;  %v524_v26 = vmul.f32 %v2553_v18, %v1969_v17  ;;  %v652_v28 = vadd.f32 %v2566_v27, %v517_v19  ;;  %v653_v29 = vadd.f32 %v2566_v27, %v518_v20 }
  0x78   : > { %v654_v30 = vadd.f32 %v2566_v27, %v519_v21  ;;  %v655_v31 = vadd.f32 %v2566_v27, %v520_v22  ;;  %v656_v32 = vadd.f32 %v2566_v27, %v521_v23  ;;  %v657_v33 = vadd.f32 %v2566_v27, %v522_v24 }
  0x79   : > { %v658_v34 = vadd.f32 %v2566_v27, %v523_v25  ;;  %v659_v35 = vadd.f32 %v2566_v27, %v524_v26  ;;  %v780_v36 = vmax.f32 %v652_v28, 0.0  ;;  %v781_v37 = vmax.f32 %v653_v29, 0.0  ;;  %v2097_v25 = vld [vmem:[%s2167_s18 + $0x180] sm:$0xff]   ;;  %v2098_v26 = vld [vmem:[%s2167_s18 + $0x188] sm:$0xff]  }
  0x7a   : > { %v782_v38 = vmax.f32 %v654_v30, 0.0  ;;  %v783_v39 = vmax.f32 %v655_v31, 0.0  ;;  %v784_v40 = vmax.f32 %v656_v32, 0.0  ;;  %v785_v41 = vmax.f32 %v657_v33, 0.0  ;;  %v2099_v32 = vld [vmem:[%s2167_s18 + $0x190] sm:$0xff]   ;;  %v2100_v33 = vld [vmem:[%s2167_s18 + $0x198] sm:$0xff]  }
  0x7b   : > { %v786_v42 = vmax.f32 %v658_v34, 0.0  ;;  %v787_v43 = vmax.f32 %v659_v35, 0.0  ;;  %v1746_v46 = vpack.c.bf16 %v780_v36, %v780_v36  ;;  %v1747_v47 = vpack.c.bf16 %v781_v37, %v781_v37 }
  0x7c   : > { %v1748_v48 = vpack.c.bf16 %v782_v38, %v782_v38  ;;  %v1749_v49 = vpack.c.bf16 %v783_v39, %v783_v39  ;;  %v1750_v52 = vpack.c.bf16 %v784_v40, %v784_v40  ;;  %v1751_v53 = vpack.c.bf16 %v785_v41, %v785_v41 }
  0x7d   : > { %v1752_v0 = vpack.c.bf16 %v786_v42, %v786_v42  ;;  %v1753_v54 = vpack.c.bf16 %v787_v43, %v787_v43  ;;  %1421 = vst.msk [vmem:[%s2204_s25 + $0x140] sm:$0xf] %vm1340_vm0, %v1746_v46  ;;  %1422 = vst.msk [vmem:[%s2204_s25 + $0x144] sm:$0xf] %vm1340_vm0, %v1747_v47  ;;  %v1976_v57 = vunpack.c.l.bf16 %v2094_v45  ;;  %v1977_v58 = vunpack.c.h.bf16 %v2094_v45 }
  0x7e   : > { %1423 = vst.msk [vmem:[%s2204_s25 + $0x148] sm:$0xf] %vm1340_vm0, %v1748_v48  ;;  %1424 = vst.msk [vmem:[%s2204_s25 + $0x14c] sm:$0xf] %vm1340_vm0, %v1749_v49  ;;  %v1980_v59 = vunpack.c.l.bf16 %v2095_v50  ;;  %v1981_v60 = vunpack.c.h.bf16 %v2095_v50  ;;  %v1984_v61 = vunpack.c.l.bf16 %v2096_v51  ;;  %v1985_v62 = vunpack.c.h.bf16 %v2096_v51 }
  0x7f   : > { %1425 = vst.msk [vmem:[%s2204_s25 + $0x150] sm:$0xf] %vm1340_vm0, %v1750_v52  ;;  %1426 = vst.msk [vmem:[%s2204_s25 + $0x154] sm:$0xf] %vm1340_vm0, %v1751_v53  ;;  %v525_v63 = vmul.f32 %v2553_v18, %v1972_v55  ;;  %v526_v1 = vmul.f32 %v2553_v18, %v1973_v56  ;;  %v527_v2 = vmul.f32 %v2553_v18, %v1976_v57  ;;  %v1988_v38 = vunpack.c.l.bf16 %v2097_v25 }
  0x80   : > { %1427 = vst.msk [vmem:[%s2204_s25 + $0x158] sm:$0xf] %vm1340_vm0, %v1752_v0  ;;  %1428 = vst.msk [vmem:[%s2204_s25 + $0x15c] sm:$0xf] %vm1340_vm0, %v1753_v54  ;;  %v528_v9 = vmul.f32 %v2553_v18, %v1977_v58  ;;  %v529_v3 = vmul.f32 %v2553_v18, %v1980_v59  ;;  %v530_v4 = vmul.f32 %v2553_v18, %v1981_v60  ;;  %v1989_v39 = vunpack.c.h.bf16 %v2097_v25 }
  0x81   : > { %v531_v5 = vmul.f32 %v2553_v18, %v1984_v61  ;;  %v532_v6 = vmul.f32 %v2553_v18, %v1985_v62  ;;  %v660_v7 = vadd.f32 %v2566_v27, %v525_v63  ;;  %v661_v8 = vadd.f32 %v2566_v27, %v526_v1 }
  0x82   : > { %v662_v10 = vadd.f32 %v2566_v27, %v527_v2  ;;  %v663_v11 = vadd.f32 %v2566_v27, %v528_v9  ;;  %v664_v12 = vadd.f32 %v2566_v27, %v529_v3  ;;  %v665_v13 = vadd.f32 %v2566_v27, %v530_v4 }
  0x83   : > { %v666_v14 = vadd.f32 %v2566_v27, %v531_v5  ;;  %v667_v15 = vadd.f32 %v2566_v27, %v532_v6  ;;  %v788_v16 = vmax.f32 %v660_v7, 0.0  ;;  %v789_v17 = vmax.f32 %v661_v8, 0.0  ;;  %v2101_v5 = vld [vmem:[%s2167_s18 + $0x1a0] sm:$0xff]   ;;  %v2102_v6 = vld [vmem:[%s2167_s18 + $0x1a8] sm:$0xff]  }
  0x84   : > { %v790_v19 = vmax.f32 %v662_v10, 0.0  ;;  %v791_v20 = vmax.f32 %v663_v11, 0.0  ;;  %v792_v21 = vmax.f32 %v664_v12, 0.0  ;;  %v793_v22 = vmax.f32 %v665_v13, 0.0  ;;  %v2103_v12 = vld [vmem:[%s2167_s18 + $0x1b0] sm:$0xff]   ;;  %v2104_v13 = vld [vmem:[%s2167_s18 + $0x1b8] sm:$0xff]  }
  0x85   : > { %v794_v23 = vmax.f32 %v666_v14, 0.0  ;;  %v795_v24 = vmax.f32 %v667_v15, 0.0  ;;  %v1754_v28 = vpack.c.bf16 %v788_v16, %v788_v16  ;;  %v1755_v29 = vpack.c.bf16 %v789_v17, %v789_v17 }
  0x86   : > { %v1756_v30 = vpack.c.bf16 %v790_v19, %v790_v19  ;;  %v1757_v31 = vpack.c.bf16 %v791_v20, %v791_v20  ;;  %v1758_v34 = vpack.c.bf16 %v792_v21, %v792_v21  ;;  %v1759_v35 = vpack.c.bf16 %v793_v22, %v793_v22 }
  0x87   : > { %v1760_v36 = vpack.c.bf16 %v794_v23, %v794_v23  ;;  %v1761_v37 = vpack.c.bf16 %v795_v24, %v795_v24  ;;  %1429 = vst.msk [vmem:[%s2204_s25 + $0x160] sm:$0xf] %vm1340_vm0, %v1754_v28  ;;  %1430 = vst.msk [vmem:[%s2204_s25 + $0x164] sm:$0xf] %vm1340_vm0, %v1755_v29  ;;  %v1992_v40 = vunpack.c.l.bf16 %v2098_v26  ;;  %v1993_v41 = vunpack.c.h.bf16 %v2098_v26 }
  0x88   : > { %1431 = vst.msk [vmem:[%s2204_s25 + $0x168] sm:$0xf] %vm1340_vm0, %v1756_v30  ;;  %1432 = vst.msk [vmem:[%s2204_s25 + $0x16c] sm:$0xf] %vm1340_vm0, %v1757_v31  ;;  %v1996_v42 = vunpack.c.l.bf16 %v2099_v32  ;;  %v1997_v43 = vunpack.c.h.bf16 %v2099_v32  ;;  %v2000_v44 = vunpack.c.l.bf16 %v2100_v33  ;;  %v2001_v45 = vunpack.c.h.bf16 %v2100_v33 }
  0x89   : > { %1433 = vst.msk [vmem:[%s2204_s25 + $0x170] sm:$0xf] %vm1340_vm0, %v1758_v34  ;;  %1434 = vst.msk [vmem:[%s2204_s25 + $0x174] sm:$0xf] %vm1340_vm0, %v1759_v35  ;;  %v533_v46 = vmul.f32 %v2553_v18, %v1988_v38  ;;  %v534_v47 = vmul.f32 %v2553_v18, %v1989_v39  ;;  %v535_v48 = vmul.f32 %v2553_v18, %v1992_v40  ;;  %v2004_v19 = vunpack.c.l.bf16 %v2101_v5 }
  0x8a   : > { %1435 = vst.msk [vmem:[%s2204_s25 + $0x178] sm:$0xf] %vm1340_vm0, %v1760_v36  ;;  %1436 = vst.msk [vmem:[%s2204_s25 + $0x17c] sm:$0xf] %vm1340_vm0, %v1761_v37  ;;  %v536_v49 = vmul.f32 %v2553_v18, %v1993_v41  ;;  %v537_v50 = vmul.f32 %v2553_v18, %v1996_v42  ;;  %v538_v51 = vmul.f32 %v2553_v18, %v1997_v43  ;;  %v2005_v20 = vunpack.c.h.bf16 %v2101_v5 }
  0x8b   : > { %v539_v52 = vmul.f32 %v2553_v18, %v2000_v44  ;;  %v540_v53 = vmul.f32 %v2553_v18, %v2001_v45  ;;  %v668_v0 = vadd.f32 %v2566_v27, %v533_v46  ;;  %v669_v54 = vadd.f32 %v2566_v27, %v534_v47 }
  0x8c   : > { %v670_v55 = vadd.f32 %v2566_v27, %v535_v48  ;;  %v671_v56 = vadd.f32 %v2566_v27, %v536_v49  ;;  %v672_v57 = vadd.f32 %v2566_v27, %v537_v50  ;;  %v673_v58 = vadd.f32 %v2566_v27, %v538_v51 }
  0x8d   : > { %v674_v59 = vadd.f32 %v2566_v27, %v539_v52  ;;  %v675_v60 = vadd.f32 %v2566_v27, %v540_v53  ;;  %v796_v61 = vmax.f32 %v668_v0, 0.0  ;;  %v797_v62 = vmax.f32 %v669_v54, 0.0  ;;  %v2105_v52 = vld [vmem:[%s2167_s18 + $0x1c0] sm:$0xff]   ;;  %v2106_v53 = vld [vmem:[%s2167_s18 + $0x1c8] sm:$0xff]  }
  0x8e   : > { %v798_v63 = vmax.f32 %v670_v55, 0.0  ;;  %v799_v1 = vmax.f32 %v671_v56, 0.0  ;;  %v800_v2 = vmax.f32 %v672_v57, 0.0  ;;  %v801_v9 = vmax.f32 %v673_v58, 0.0  ;;  %v2107_v57 = vld [vmem:[%s2167_s18 + $0x1d0] sm:$0xff]   ;;  %v2108_v58 = vld [vmem:[%s2167_s18 + $0x1d8] sm:$0xff]  }
  0x8f   : > { %v802_v3 = vmax.f32 %v674_v59, 0.0  ;;  %v803_v4 = vmax.f32 %v675_v60, 0.0  ;;  %v1762_v7 = vpack.c.bf16 %v796_v61, %v796_v61  ;;  %v1763_v8 = vpack.c.bf16 %v797_v62, %v797_v62 }
  0x90   : > { %v1764_v10 = vpack.c.bf16 %v798_v63, %v798_v63  ;;  %v1765_v11 = vpack.c.bf16 %v799_v1, %v799_v1  ;;  %v1766_v14 = vpack.c.bf16 %v800_v2, %v800_v2  ;;  %v1767_v15 = vpack.c.bf16 %v801_v9, %v801_v9 }
  0x91   : > { %v1768_v16 = vpack.c.bf16 %v802_v3, %v802_v3  ;;  %v1769_v17 = vpack.c.bf16 %v803_v4, %v803_v4  ;;  %1437 = vst.msk [vmem:[%s2204_s25 + $0x180] sm:$0xf] %vm1340_vm0, %v1762_v7  ;;  %1438 = vst.msk [vmem:[%s2204_s25 + $0x184] sm:$0xf] %vm1340_vm0, %v1763_v8  ;;  %v2008_v21 = vunpack.c.l.bf16 %v2102_v6  ;;  %v2009_v22 = vunpack.c.h.bf16 %v2102_v6 }
  0x92   : > { %1439 = vst.msk [vmem:[%s2204_s25 + $0x188] sm:$0xf] %vm1340_vm0, %v1764_v10  ;;  %1440 = vst.msk [vmem:[%s2204_s25 + $0x18c] sm:$0xf] %vm1340_vm0, %v1765_v11  ;;  %v2012_v23 = vunpack.c.l.bf16 %v2103_v12  ;;  %v2013_v24 = vunpack.c.h.bf16 %v2103_v12  ;;  %v2016_v25 = vunpack.c.l.bf16 %v2104_v13  ;;  %v2017_v26 = vunpack.c.h.bf16 %v2104_v13 }
  0x93   : > { %1441 = vst.msk [vmem:[%s2204_s25 + $0x190] sm:$0xf] %vm1340_vm0, %v1766_v14  ;;  %1442 = vst.msk [vmem:[%s2204_s25 + $0x194] sm:$0xf] %vm1340_vm0, %v1767_v15  ;;  %v541_v28 = vmul.f32 %v2553_v18, %v2004_v19  ;;  %v542_v29 = vmul.f32 %v2553_v18, %v2005_v20  ;;  %v543_v30 = vmul.f32 %v2553_v18, %v2008_v21  ;;  %v2020_v63 = vunpack.c.l.bf16 %v2105_v52 }
  0x94   : > { %1443 = vst.msk [vmem:[%s2204_s25 + $0x198] sm:$0xf] %vm1340_vm0, %v1768_v16  ;;  %1444 = vst.msk [vmem:[%s2204_s25 + $0x19c] sm:$0xf] %vm1340_vm0, %v1769_v17  ;;  %v544_v31 = vmul.f32 %v2553_v18, %v2009_v22  ;;  %v545_v32 = vmul.f32 %v2553_v18, %v2012_v23  ;;  %v546_v33 = vmul.f32 %v2553_v18, %v2013_v24  ;;  %v2021_v1 = vunpack.c.h.bf16 %v2105_v52 }
  0x95   : > { %v547_v34 = vmul.f32 %v2553_v18, %v2016_v25  ;;  %v548_v35 = vmul.f32 %v2553_v18, %v2017_v26  ;;  %v676_v36 = vadd.f32 %v2566_v27, %v541_v28  ;;  %v677_v37 = vadd.f32 %v2566_v27, %v542_v29 }
  0x96   : > { %v678_v38 = vadd.f32 %v2566_v27, %v543_v30  ;;  %v679_v39 = vadd.f32 %v2566_v27, %v544_v31  ;;  %v680_v40 = vadd.f32 %v2566_v27, %v545_v32  ;;  %v681_v41 = vadd.f32 %v2566_v27, %v546_v33 }
  0x97   : > { %v682_v42 = vadd.f32 %v2566_v27, %v547_v34  ;;  %v683_v43 = vadd.f32 %v2566_v27, %v548_v35  ;;  %v804_v44 = vmax.f32 %v676_v36, 0.0  ;;  %v805_v45 = vmax.f32 %v677_v37, 0.0  ;;  %v2109_v34 = vld [vmem:[%s2167_s18 + $0x1e0] sm:$0xff]   ;;  %v2110_v35 = vld [vmem:[%s2167_s18 + $0x1e8] sm:$0xff]  }
  0x98   : > { %v806_v46 = vmax.f32 %v678_v38, 0.0  ;;  %v807_v47 = vmax.f32 %v679_v39, 0.0  ;;  %v808_v48 = vmax.f32 %v680_v40, 0.0  ;;  %v809_v49 = vmax.f32 %v681_v41, 0.0  ;;  %v2111_v40 = vld [vmem:[%s2167_s18 + $0x1f0] sm:$0xff]   ;;  %v2112_v41 = vld [vmem:[%s2167_s18 + $0x1f8] sm:$0xff]  }
  0x99   : > { %v810_v50 = vmax.f32 %v682_v42, 0.0  ;;  %v811_v51 = vmax.f32 %v683_v43, 0.0  ;;  %v1770_v0 = vpack.c.bf16 %v804_v44, %v804_v44  ;;  %v1771_v54 = vpack.c.bf16 %v805_v45, %v805_v45 }
  0x9a   : > { %v1772_v55 = vpack.c.bf16 %v806_v46, %v806_v46  ;;  %v1773_v56 = vpack.c.bf16 %v807_v47, %v807_v47  ;;  %v1774_v59 = vpack.c.bf16 %v808_v48, %v808_v48  ;;  %v1775_v60 = vpack.c.bf16 %v809_v49, %v809_v49 }
  0x9b   : > { %v1776_v61 = vpack.c.bf16 %v810_v50, %v810_v50  ;;  %v1777_v62 = vpack.c.bf16 %v811_v51, %v811_v51  ;;  %1445 = vst.msk [vmem:[%s2204_s25 + $0x1a0] sm:$0xf] %vm1340_vm0, %v1770_v0  ;;  %1446 = vst.msk [vmem:[%s2204_s25 + $0x1a4] sm:$0xf] %vm1340_vm0, %v1771_v54  ;;  %v2024_v2 = vunpack.c.l.bf16 %v2106_v53  ;;  %v2025_v9 = vunpack.c.h.bf16 %v2106_v53 }
  0x9c   : > { %1447 = vst.msk [vmem:[%s2204_s25 + $0x1a8] sm:$0xf] %vm1340_vm0, %v1772_v55  ;;  %1448 = vst.msk [vmem:[%s2204_s25 + $0x1ac] sm:$0xf] %vm1340_vm0, %v1773_v56  ;;  %v2028_v3 = vunpack.c.l.bf16 %v2107_v57  ;;  %v2029_v4 = vunpack.c.h.bf16 %v2107_v57  ;;  %v2032_v5 = vunpack.c.l.bf16 %v2108_v58  ;;  %v2033_v6 = vunpack.c.h.bf16 %v2108_v58 }
  0x9d   : > { %1449 = vst.msk [vmem:[%s2204_s25 + $0x1b0] sm:$0xf] %vm1340_vm0, %v1774_v59  ;;  %1450 = vst.msk [vmem:[%s2204_s25 + $0x1b4] sm:$0xf] %vm1340_vm0, %v1775_v60  ;;  %v549_v7 = vmul.f32 %v2553_v18, %v2020_v63  ;;  %v550_v8 = vmul.f32 %v2553_v18, %v2021_v1  ;;  %v551_v10 = vmul.f32 %v2553_v18, %v2024_v2  ;;  %v2036_v46 = vunpack.c.l.bf16 %v2109_v34 }
  0x9e   : > { %1451 = vst.msk [vmem:[%s2204_s25 + $0x1b8] sm:$0xf] %vm1340_vm0, %v1776_v61  ;;  %1452 = vst.msk [vmem:[%s2204_s25 + $0x1bc] sm:$0xf] %vm1340_vm0, %v1777_v62  ;;  %v552_v11 = vmul.f32 %v2553_v18, %v2025_v9  ;;  %v553_v12 = vmul.f32 %v2553_v18, %v2028_v3  ;;  %v554_v13 = vmul.f32 %v2553_v18, %v2029_v4  ;;  %v2037_v47 = vunpack.c.h.bf16 %v2109_v34 }
  0x9f   : > { %v555_v14 = vmul.f32 %v2553_v18, %v2032_v5  ;;  %v556_v15 = vmul.f32 %v2553_v18, %v2033_v6  ;;  %v684_v16 = vadd.f32 %v2566_v27, %v549_v7  ;;  %v685_v17 = vadd.f32 %v2566_v27, %v550_v8 }
  0xa0   : > { %v686_v19 = vadd.f32 %v2566_v27, %v551_v10  ;;  %v687_v20 = vadd.f32 %v2566_v27, %v552_v11  ;;  %v688_v21 = vadd.f32 %v2566_v27, %v553_v12  ;;  %v689_v22 = vadd.f32 %v2566_v27, %v554_v13 }
  0xa1   : > { %v690_v23 = vadd.f32 %v2566_v27, %v555_v14  ;;  %v691_v24 = vadd.f32 %v2566_v27, %v556_v15  ;;  %v812_v25 = vmax.f32 %v684_v16, 0.0  ;;  %v813_v26 = vmax.f32 %v685_v17, 0.0 }
  0xa2   : > { %v814_v28 = vmax.f32 %v686_v19, 0.0  ;;  %v815_v29 = vmax.f32 %v687_v20, 0.0  ;;  %v816_v30 = vmax.f32 %v688_v21, 0.0  ;;  %v817_v31 = vmax.f32 %v689_v22, 0.0 }
  0xa3   : > { %v818_v32 = vmax.f32 %v690_v23, 0.0  ;;  %v819_v33 = vmax.f32 %v691_v24, 0.0  ;;  %v1778_v36 = vpack.c.bf16 %v812_v25, %v812_v25  ;;  %v1779_v37 = vpack.c.bf16 %v813_v26, %v813_v26 }
  0xa4   : > { %v1780_v38 = vpack.c.bf16 %v814_v28, %v814_v28  ;;  %v1781_v39 = vpack.c.bf16 %v815_v29, %v815_v29  ;;  %v1782_v42 = vpack.c.bf16 %v816_v30, %v816_v30  ;;  %v1783_v43 = vpack.c.bf16 %v817_v31, %v817_v31 }
  0xa5   : > { %v1784_v44 = vpack.c.bf16 %v818_v32, %v818_v32  ;;  %v1785_v45 = vpack.c.bf16 %v819_v33, %v819_v33  ;;  %1453 = vst.msk [vmem:[%s2204_s25 + $0x1c0] sm:$0xf] %vm1340_vm0, %v1778_v36  ;;  %1454 = vst.msk [vmem:[%s2204_s25 + $0x1c4] sm:$0xf] %vm1340_vm0, %v1779_v37  ;;  %v2040_v48 = vunpack.c.l.bf16 %v2110_v35  ;;  %v2041_v49 = vunpack.c.h.bf16 %v2110_v35 }
  0xa6   : > { %1455 = vst.msk [vmem:[%s2204_s25 + $0x1c8] sm:$0xf] %vm1340_vm0, %v1780_v38  ;;  %1456 = vst.msk [vmem:[%s2204_s25 + $0x1cc] sm:$0xf] %vm1340_vm0, %v1781_v39  ;;  %v2044_v50 = vunpack.c.l.bf16 %v2111_v40  ;;  %v2045_v51 = vunpack.c.h.bf16 %v2111_v40  ;;  %v2048_v52 = vunpack.c.l.bf16 %v2112_v41  ;;  %v2049_v53 = vunpack.c.h.bf16 %v2112_v41 }
  0xa7   : > { %1457 = vst.msk [vmem:[%s2204_s25 + $0x1d0] sm:$0xf] %vm1340_vm0, %v1782_v42  ;;  %1458 = vst.msk [vmem:[%s2204_s25 + $0x1d4] sm:$0xf] %vm1340_vm0, %v1783_v43  ;;  %v557_v0 = vmul.f32 %v2553_v18, %v2036_v46  ;;  %v558_v54 = vmul.f32 %v2553_v18, %v2037_v47  ;;  %v559_v55 = vmul.f32 %v2553_v18, %v2040_v48 }
  0xa8   : > { %1459 = vst.msk [vmem:[%s2204_s25 + $0x1d8] sm:$0xf] %vm1340_vm0, %v1784_v44  ;;  %1460 = vst.msk [vmem:[%s2204_s25 + $0x1dc] sm:$0xf] %vm1340_vm0, %v1785_v45  ;;  %v560_v56 = vmul.f32 %v2553_v18, %v2041_v49  ;;  %v561_v57 = vmul.f32 %v2553_v18, %v2044_v50  ;;  %v562_v58 = vmul.f32 %v2553_v18, %v2045_v51 }
  0xa9   : > { %v563_v59 = vmul.f32 %v2553_v18, %v2048_v52  ;;  %v564_v60 = vmul.f32 %v2553_v18, %v2049_v53  ;;  %v692_v61 = vadd.f32 %v2566_v27, %v557_v0  ;;  %v693_v62 = vadd.f32 %v2566_v27, %v558_v54 }
  0xaa   : > { %v694_v63 = vadd.f32 %v2566_v27, %v559_v55  ;;  %v695_v1 = vadd.f32 %v2566_v27, %v560_v56  ;;  %v696_v2 = vadd.f32 %v2566_v27, %v561_v57  ;;  %v697_v9 = vadd.f32 %v2566_v27, %v562_v58 }
  0xab   : > { %v698_v3 = vadd.f32 %v2566_v27, %v563_v59  ;;  %v699_v4 = vadd.f32 %v2566_v27, %v564_v60  ;;  %v820_v5 = vmax.f32 %v692_v61, 0.0  ;;  %v821_v6 = vmax.f32 %v693_v62, 0.0 }
  0xac   : > { %v822_v18 = vmax.f32 %v694_v63, 0.0  ;;  %v823_v7 = vmax.f32 %v695_v1, 0.0  ;;  %v824_v8 = vmax.f32 %v696_v2, 0.0  ;;  %v825_v10 = vmax.f32 %v697_v9, 0.0 }
  0xad   : > { %v826_v11 = vmax.f32 %v698_v3, 0.0  ;;  %v827_v12 = vmax.f32 %v699_v4, 0.0  ;;  %v1786_v13 = vpack.c.bf16 %v820_v5, %v820_v5  ;;  %v1787_v14 = vpack.c.bf16 %v821_v6, %v821_v6 }
  0xae   : > { %v1788_v15 = vpack.c.bf16 %v822_v18, %v822_v18  ;;  %v1789_v27 = vpack.c.bf16 %v823_v7, %v823_v7  ;;  %v1790_v16 = vpack.c.bf16 %v824_v8, %v824_v8  ;;  %v1791_v17 = vpack.c.bf16 %v825_v10, %v825_v10 }
  0xaf   : > { %v1792_v19 = vpack.c.bf16 %v826_v11, %v826_v11  ;;  %v1793_v20 = vpack.c.bf16 %v827_v12, %v827_v12  ;;  %1461 = vst.msk [vmem:[%s2204_s25 + $0x1e0] sm:$0xf] %vm1340_vm0, %v1786_v13  ;;  %1462 = vst.msk [vmem:[%s2204_s25 + $0x1e4] sm:$0xf] %vm1340_vm0, %v1787_v14 }
  0xb0   : > { %1463 = vst.msk [vmem:[%s2204_s25 + $0x1e8] sm:$0xf] %vm1340_vm0, %v1788_v15  ;;  %1464 = vst.msk [vmem:[%s2204_s25 + $0x1ec] sm:$0xf] %vm1340_vm0, %v1789_v27 }
  0xb1   : > { %1465 = vst.msk [vmem:[%s2204_s25 + $0x1f0] sm:$0xf] %vm1340_vm0, %v1790_v16  ;;  %1466 = vst.msk [vmem:[%s2204_s25 + $0x1f4] sm:$0xf] %vm1340_vm0, %v1791_v17 }
  0xb2   : > { %1467 = vst.msk [vmem:[%s2204_s25 + $0x1f8] sm:$0xf] %vm1340_vm0, %v1792_v19  ;;  %1468 = vst.msk [vmem:[%s2204_s25 + $0x1fc] sm:$0xf] %vm1340_vm0, %v1793_v20 }
  0xb3 PF: > { %s13_s12 = sadd.s32 1, %s2129_s12  }
  0xb4   : > { %p10_p4 = scmp.ge.s32.totalorder %s13_s12, 4  }
  0xb6   :  { %12 = sbr.rel (!%p10_p4) target bundleno = 1 (0x1), region = 62 }

// kernel: generator_forward.38
= control target key start
LH: loop header
LB: loop body
LE: loop exit
PB: predicated region body
PF: predicated region fallthrough
CT: control target
= control target key end

     0   :  { %s1374_s12 = smov 0   ;;  %s1602_s0 = inlined_call_operand.vmem [shape: bf16[2048,32], index: 0, kind: input, shape index: {}]   ;;  %s1603_s1 = inlined_call_operand.vmem [shape: bf16[32,128], index: 1, kind: input, shape index: {}]   ;;  %s1604_s2 = inlined_call_operand.vmem [shape: f32[1,128], index: 2, kind: input, shape index: {}]   ;;  %s1605_s3 = inlined_call_operand.vmem [shape: f32[2048,128], index: 3, kind: output, shape index: {}]  }
   0x1 LB: > { %s992_s13 = sadd.s32 4294967295, %s1352_s12   ;;  %p996_p0 = scmp.ge.s32.totalorder %s1352_s12, 1  ;;  %s1352_s12 = sphi %s1374_s12, %s13_s12  }
   0x2   : > { %p138_p1 = scmp.lt.s32.totalorder %s1352_s12, 5 }
   0x4   : > { %p139_p2 = pnand %p996_p0, %p138_p1 }
   0x5   : > { %s997_s16 = sshll.u32 (!%p139_p2), %s992_s13, 6 }
   0x6   : > { %142 = sbr.rel (%p139_p2) target bundleno = 293 (0x125), region = 32  ;;  %p163_p3 = scmp.lt.s32.totalorder (!%p139_p2), %s997_s16, 255 }
   0xb   : > { %v1184_v0 = vld [vmem:[%s1603_s1 + $0x8] sm:$0xff]   ;;  %v1185_v1 = vld [vmem:[%s1603_s1] sm:$0xff]   ;;  %s1607_s16 = smov (!%p163_p3, %s997_s16), 255  ;;  %vm422_vm0 = vcmask 261120  }
   0xc   : > { %1104 = vmatprep.subr.bf16.mxu0 %v1184_v0  ;;  %1172 = vmatprep.subr.bf16.mxu1 %v1184_v0  ;;  %s998_s19 = sshll.u32 %s1607_s16, 2  ;;  %v1463_v34 = vld [vmem:[%s1604_s2] ss:$0 sm:$0xff]  ;;  %s1000_s25 = sshll.u32 %s1607_s16, 3 }
   0xd   : > { %1105 = vmatpush3.bf16.msra.mxu0 %v1184_v0  ;;  %1174 = vmatpush3.bf16.msra.mxu1 %v1184_v0  ;;  %s1394_s22 = scalar_lea.vmem %s1602_s0, %s998_s19  ;;  %s1482_s28 = scalar_lea.vmem %s1605_s3, %s1000_s25 }
   0xe   : > { %1106 = vmatprep.subr.bf16.mxu0 %v1185_v1  ;;  %1173 = vmatprep.subr.bf16.mxu1 %v1185_v1  ;;  %v1186_v2 = vld [vmem:[%s1394_s22] sm:$0xff]   ;;  %v1188_v4 = vld [vmem:[%s1394_s22 + $0x8] sm:$0xff]   ;;  %v1190_v6 = vld [vmem:[%s1394_s22 + $0x10] sm:$0xff]  }
   0xf   : > { %v1187_v3 = vld [vmem:[%s1394_s22 + $0x80] sm:$0xff]   ;;  %1108 = vmatprep.mubr.msk.bf16.mxu0 %vm422_vm0, %v1186_v2  ;;  %v1189_v5 = vld [vmem:[%s1394_s22 + $0x88] sm:$0xff]   ;;  %v1191_v7 = vld [vmem:[%s1394_s22 + $0x90] sm:$0xff]  }
  0x10   : > { %1140 = vmatprep.mubr.msk.bf16.mxu1 %vm422_vm0, %v1187_v3  ;;  %v1192_v8 = vld [vmem:[%s1394_s22 + $0x18] sm:$0xff]   ;;  %v1194_v10 = vld [vmem:[%s1394_s22 + $0x20] sm:$0xff]   ;;  %v1196_v12 = vld [vmem:[%s1394_s22 + $0x28] sm:$0xff]  }
  0x11   : > { %1107 = vmatpush3.bf16.msra.mxu0 %v1185_v1  ;;  %1175 = vmatpush3.bf16.msra.mxu1 %v1185_v1  ;;  %v1193_v9 = vld [vmem:[%s1394_s22 + $0x98] sm:$0xff]   ;;  %v1195_v11 = vld [vmem:[%s1394_s22 + $0xa0] sm:$0xff]   ;;  %v1197_v13 = vld [vmem:[%s1394_s22 + $0xa8] sm:$0xff]  }
  0x12   : > { %v1198_v14 = vld [vmem:[%s1394_s22 + $0x30] sm:$0xff]   ;;  %v1200_v16 = vld [vmem:[%s1394_s22 + $0x38] sm:$0xff]   ;;  %v1202_v18 = vld [vmem:[%s1394_s22 + $0x40] sm:$0xff]  }
  0x13   : > { %v1199_v15 = vld [vmem:[%s1394_s22 + $0xb0] sm:$0xff]   ;;  %v1201_v17 = vld [vmem:[%s1394_s22 + $0xb8] sm:$0xff]   ;;  %v1203_v19 = vld [vmem:[%s1394_s22 + $0xc0] sm:$0xff]  }
  0x14   : > { %1109 = vmatmul.mubr.msk.bf16.vlgmr.msra.gmra.mxu0 %vm422_vm0, %v1188_v4  ;;  %1141 = vmatmul.mubr.msk.bf16.vlgmr.msra.gmra.mxu1 %vm422_vm0, %v1189_v5  ;;  %v1204_v20 = vld [vmem:[%s1394_s22 + $0x48] sm:$0xff]   ;;  %v1206_v22 = vld [vmem:[%s1394_s22 + $0x50] sm:$0xff]   ;;  %v1208_v24 = vld [vmem:[%s1394_s22 + $0x58] sm:$0xff]  }
  0x15   : > { %1112 = vmatprep.mubr.msk.bf16.mxu0 %vm422_vm0, %v1190_v6  ;;  %1144 = vmatprep.mubr.msk.bf16.mxu1 %vm422_vm0, %v1191_v7  ;;  %v1205_v21 = vld [vmem:[%s1394_s22 + $0xc8] sm:$0xff]   ;;  %v1207_v23 = vld [vmem:[%s1394_s22 + $0xd0] sm:$0xff]   ;;  %v1209_v25 = vld [vmem:[%s1394_s22 + $0xd8] sm:$0xff]  }
  0x16   : > { %v1210_v26 = vld [vmem:[%s1394_s22 + $0x60] sm:$0xff]   ;;  %v1212_v28 = vld [vmem:[%s1394_s22 + $0x68] sm:$0xff]   ;;  %v1214_v30 = vld [vmem:[%s1394_s22 + $0x70] sm:$0xff]  }
  0x17   : > { %v1211_v27 = vld [vmem:[%s1394_s22 + $0xe0] sm:$0xff]   ;;  %v1213_v29 = vld [vmem:[%s1394_s22 + $0xe8] sm:$0xff]   ;;  %v1215_v31 = vld [vmem:[%s1394_s22 + $0xf0] sm:$0xff]  }
  0x18   : > { %v1216_v32 = vld [vmem:[%s1394_s22 + $0x78] sm:$0xff]  }
  0x19   : > { %v1217_v33 = vld [vmem:[%s1394_s22 + $0xf8] sm:$0xff]  }
  0x1c   : > { %1113 = vmatmul.mubr.msk.bf16.gmra.mxu0 %vm422_vm0, %v1192_v8  ;;  %1145 = vmatmul.mubr.msk.bf16.gmra.mxu1 %vm422_vm0, %v1193_v9 }
  0x1d   : > { %1116 = vmatprep.mubr.msk.bf16.mxu0 %vm422_vm0, %v1194_v10  ;;  %1148 = vmatprep.mubr.msk.bf16.mxu1 %vm422_vm0, %v1195_v11 }
  0x24   : > { %1117 = vmatmul.mubr.msk.bf16.gmra.mxu0 %vm422_vm0, %v1196_v12  ;;  %1149 = vmatmul.mubr.msk.bf16.gmra.mxu1 %vm422_vm0, %v1197_v13 }
  0x25   : > { %1120 = vmatprep.mubr.msk.bf16.mxu0 %vm422_vm0, %v1198_v14  ;;  %1152 = vmatprep.mubr.msk.bf16.mxu1 %vm422_vm0, %v1199_v15 }
  0x2c   : > { %1121 = vmatmul.mubr.msk.bf16.gmra.mxu0 %vm422_vm0, %v1200_v16  ;;  %1153 = vmatmul.mubr.msk.bf16.gmra.mxu1 %vm422_vm0, %v1201_v17 }
  0x2d   : > { %1124 = vmatprep.mubr.msk.bf16.mxu0 %vm422_vm0, %v1202_v18  ;;  %1156 = vmatprep.mubr.msk.bf16.mxu1 %vm422_vm0, %v1203_v19 }
  0x34   : > { %1125 = vmatmul.mubr.msk.bf16.gmra.mxu0 %vm422_vm0, %v1204_v20  ;;  %1157 = vmatmul.mubr.msk.bf16.gmra.mxu1 %vm422_vm0, %v1205_v21 }
  0x35   : > { %1128 = vmatprep.mubr.msk.bf16.mxu0 %vm422_vm0, %v1206_v22  ;;  %1160 = vmatprep.mubr.msk.bf16.mxu1 %vm422_vm0, %v1207_v23 }
  0x3c   : > { %1129 = vmatmul.mubr.msk.bf16.gmra.mxu0 %vm422_vm0, %v1208_v24  ;;  %1161 = vmatmul.mubr.msk.bf16.gmra.mxu1 %vm422_vm0, %v1209_v25 }
  0x3d   : > { %1132 = vmatprep.mubr.msk.bf16.mxu0 %vm422_vm0, %v1210_v26  ;;  %1164 = vmatprep.mubr.msk.bf16.mxu1 %vm422_vm0, %v1211_v27 }
  0x44   : > { %1133 = vmatmul.mubr.msk.bf16.gmra.mxu0 %vm422_vm0, %v1212_v28  ;;  %1165 = vmatmul.mubr.msk.bf16.gmra.mxu1 %vm422_vm0, %v1213_v29 }
  0x45   : > { %1136 = vmatprep.mubr.msk.bf16.mxu0 %vm422_vm0, %v1214_v30  ;;  %1168 = vmatprep.mubr.msk.bf16.mxu1 %vm422_vm0, %v1215_v31 }
  0x4c   : > { %1137 = vmatmul.mubr.msk.bf16.gmra.mxu0 %vm422_vm0, %v1216_v32  ;;  %1169 = vmatmul.mubr.msk.bf16.gmra.mxu1 %vm422_vm0, %v1217_v33 }
  0xd4   : > { %v1110_v35 = vpop.f32.mrf.mxu0  ;;  %v1142_v37 = vpop.f32.mrf.mxu1 }
  0xd5   : > { %v562_v36 = vadd.f32 %v1110_v35, %v1463_v34  ;;  %v690_v38 = vadd.f32 %v1142_v37, %v1463_v34 }
  0xd6   : > { %v553_v39 = vpop.f32.mrf.mxu0  ;;  %v681_v41 = vpop.f32.mrf.mxu1 }
  0xd7   : > { %1218 = vtanh.f32 %v562_v36  ;;  %v554_v40 = vadd.f32 %v1463_v34, %v553_v39  ;;  %v682_v42 = vadd.f32 %v1463_v34, %v681_v41 }
  0xd8   : > { %1220 = vtanh.f32 %v690_v38  ;;  %v1111_v43 = vpop.f32.mrf.mxu0  ;;  %v1143_v45 = vpop.f32.mrf.mxu1 }
  0xd9   : > { %1222 = vtanh.f32 %v554_v40  ;;  %v565_v44 = vadd.f32 %v1111_v43, %v1463_v34  ;;  %v693_v46 = vadd.f32 %v1143_v45, %v1463_v34 }
  0xda   : > { %1224 = vtanh.f32 %v682_v42  ;;  %v556_v47 = vpop.f32.mrf.mxu0  ;;  %v684_v49 = vpop.f32.mrf.mxu1 }
  0xdb   : > { %1226 = vtanh.f32 %v565_v44  ;;  %v557_v48 = vadd.f32 %v1463_v34, %v556_v47  ;;  %v685_v50 = vadd.f32 %v1463_v34, %v684_v49 }
  0xdc   : > { %1228 = vtanh.f32 %v693_v46  ;;  %v1114_v51 = vpop.f32.mrf.mxu0  ;;  %v1146_v53 = vpop.f32.mrf.mxu1 }
  0xdd   : > { %1230 = vtanh.f32 %v557_v48  ;;  %v578_v52 = vadd.f32 %v1114_v51, %v1463_v34  ;;  %v706_v54 = vadd.f32 %v1146_v53, %v1463_v34 }
  0xde   : > { %1232 = vtanh.f32 %v685_v50  ;;  %v569_v55 = vpop.f32.mrf.mxu0  ;;  %v697_v57 = vpop.f32.mrf.mxu1 }
  0xdf   : > { %1234 = vtanh.f32 %v578_v52  ;;  %v570_v56 = vadd.f32 %v1463_v34, %v569_v55  ;;  %v698_v58 = vadd.f32 %v1463_v34, %v697_v57 }
  0xe0   : > { %1236 = vtanh.f32 %v706_v54  ;;  %v1115_v59 = vpop.f32.mrf.mxu0  ;;  %v1147_v61 = vpop.f32.mrf.mxu1 }
  0xe1   : > { %1238 = vtanh.f32 %v570_v56  ;;  %v581_v60 = vadd.f32 %v1115_v59, %v1463_v34  ;;  %v709_v62 = vadd.f32 %v1147_v61, %v1463_v34 }
  0xe2   : > { %1240 = vtanh.f32 %v698_v58  ;;  %v572_v63 = vpop.f32.mrf.mxu0  ;;  %v700_v1 = vpop.f32.mrf.mxu1 }
  0xe3   : > { %1242 = vtanh.f32 %v581_v60  ;;  %v573_v0 = vadd.f32 %v1463_v34, %v572_v63  ;;  %v701_v3 = vadd.f32 %v1463_v34, %v700_v1 }
  0xe4   : > { %v1219_v2 = vpop.eup %1218  ;;  %1244 = vtanh.f32 %v709_v62  ;;  %v1118_v4 = vpop.f32.mrf.mxu0 }
  0xe5   : > { %v1221_v5 = vpop.eup %1220  ;;  %874 = vst [vmem:[%s1482_s28 + $0x10] sm:$0xff] %v1219_v2  ;;  %1246 = vtanh.f32 %v573_v0  ;;  %v594_v6 = vadd.f32 %v1118_v4, %v1463_v34  ;;  %v1150_v7 = vpop.f32.mrf.mxu1 }
  0xe6   : > { %v1223_v8 = vpop.eup %1222  ;;  %906 = vst [vmem:[%s1482_s28 + $0x110] sm:$0xff] %v1221_v5  ;;  %1248 = vtanh.f32 %v701_v3  ;;  %v722_v9 = vadd.f32 %v1150_v7, %v1463_v34  ;;  %v585_v10 = vpop.f32.mrf.mxu0 }
  0xe7   : > { %v1225_v11 = vpop.eup %1224  ;;  %872 = vst [vmem:[%s1482_s28] sm:$0xff] %v1223_v8  ;;  %1250 = vtanh.f32 %v594_v6  ;;  %v586_v12 = vadd.f32 %v1463_v34, %v585_v10  ;;  %v713_v13 = vpop.f32.mrf.mxu1 }
  0xe8   : > { %v1227_v14 = vpop.eup %1226  ;;  %904 = vst [vmem:[%s1482_s28 + $0x100] sm:$0xff] %v1225_v11  ;;  %1252 = vtanh.f32 %v722_v9  ;;  %v714_v15 = vadd.f32 %v1463_v34, %v713_v13  ;;  %v1119_v16 = vpop.f32.mrf.mxu0 }
  0xe9   : > { %v1229_v17 = vpop.eup %1228  ;;  %875 = vst [vmem:[%s1482_s28 + $0x18] sm:$0xff] %v1227_v14  ;;  %1254 = vtanh.f32 %v586_v12  ;;  %v597_v18 = vadd.f32 %v1119_v16, %v1463_v34  ;;  %v1151_v19 = vpop.f32.mrf.mxu1 }
  0xea   : > { %v1231_v20 = vpop.eup %1230  ;;  %907 = vst [vmem:[%s1482_s28 + $0x118] sm:$0xff] %v1229_v17  ;;  %1256 = vtanh.f32 %v714_v15  ;;  %v725_v21 = vadd.f32 %v1151_v19, %v1463_v34  ;;  %v588_v22 = vpop.f32.mrf.mxu0 }
  0xeb   : > { %v1233_v23 = vpop.eup %1232  ;;  %873 = vst [vmem:[%s1482_s28 + $0x8] sm:$0xff] %v1231_v20  ;;  %1258 = vtanh.f32 %v597_v18  ;;  %v589_v24 = vadd.f32 %v1463_v34, %v588_v22  ;;  %v716_v25 = vpop.f32.mrf.mxu1 }
  0xec   : > { %v1235_v26 = vpop.eup %1234  ;;  %905 = vst [vmem:[%s1482_s28 + $0x108] sm:$0xff] %v1233_v23  ;;  %1260 = vtanh.f32 %v725_v21  ;;  %v717_v27 = vadd.f32 %v1463_v34, %v716_v25  ;;  %v1122_v28 = vpop.f32.mrf.mxu0 }
  0xed   : > { %v1237_v29 = vpop.eup %1236  ;;  %878 = vst [vmem:[%s1482_s28 + $0x30] sm:$0xff] %v1235_v26  ;;  %1262 = vtanh.f32 %v589_v24  ;;  %v610_v30 = vadd.f32 %v1122_v28, %v1463_v34  ;;  %v1154_v31 = vpop.f32.mrf.mxu1 }
  0xee   : > { %v1239_v32 = vpop.eup %1238  ;;  %910 = vst [vmem:[%s1482_s28 + $0x130] sm:$0xff] %v1237_v29  ;;  %1264 = vtanh.f32 %v717_v27  ;;  %v738_v33 = vadd.f32 %v1154_v31, %v1463_v34  ;;  %v601_v35 = vpop.f32.mrf.mxu0 }
  0xef   : > { %v1241_v36 = vpop.eup %1240  ;;  %876 = vst [vmem:[%s1482_s28 + $0x20] sm:$0xff] %v1239_v32  ;;  %1266 = vtanh.f32 %v610_v30  ;;  %v602_v37 = vadd.f32 %v1463_v34, %v601_v35  ;;  %v729_v38 = vpop.f32.mrf.mxu1 }
  0xf0   : > { %v1243_v39 = vpop.eup %1242  ;;  %908 = vst [vmem:[%s1482_s28 + $0x120] sm:$0xff] %v1241_v36  ;;  %1268 = vtanh.f32 %v738_v33  ;;  %v730_v40 = vadd.f32 %v1463_v34, %v729_v38  ;;  %v1123_v41 = vpop.f32.mrf.mxu0 }
  0xf1   : > { %v1245_v42 = vpop.eup %1244  ;;  %879 = vst [vmem:[%s1482_s28 + $0x38] sm:$0xff] %v1243_v39  ;;  %1270 = vtanh.f32 %v602_v37  ;;  %v613_v43 = vadd.f32 %v1123_v41, %v1463_v34  ;;  %v1155_v44 = vpop.f32.mrf.mxu1 }
  0xf2   : > { %v1247_v45 = vpop.eup %1246  ;;  %911 = vst [vmem:[%s1482_s28 + $0x138] sm:$0xff] %v1245_v42  ;;  %1272 = vtanh.f32 %v730_v40  ;;  %v741_v46 = vadd.f32 %v1155_v44, %v1463_v34  ;;  %v604_v47 = vpop.f32.mrf.mxu0 }
  0xf3   : > { %v1249_v48 = vpop.eup %1248  ;;  %877 = vst [vmem:[%s1482_s28 + $0x28] sm:$0xff] %v1247_v45  ;;  %1274 = vtanh.f32 %v613_v43  ;;  %v605_v49 = vadd.f32 %v1463_v34, %v604_v47  ;;  %v732_v50 = vpop.f32.mrf.mxu1 }
  0xf4   : > { %v1251_v51 = vpop.eup %1250  ;;  %909 = vst [vmem:[%s1482_s28 + $0x128] sm:$0xff] %v1249_v48  ;;  %1276 = vtanh.f32 %v741_v46  ;;  %v733_v52 = vadd.f32 %v1463_v34, %v732_v50  ;;  %v1126_v53 = vpop.f32.mrf.mxu0 }
  0xf5   : > { %v1253_v54 = vpop.eup %1252  ;;  %882 = vst [vmem:[%s1482_s28 + $0x50] sm:$0xff] %v1251_v51  ;;  %1278 = vtanh.f32 %v605_v49  ;;  %v626_v55 = vadd.f32 %v1126_v53, %v1463_v34  ;;  %v1158_v56 = vpop.f32.mrf.mxu1 }
  0xf6   : > { %v1255_v57 = vpop.eup %1254  ;;  %914 = vst [vmem:[%s1482_s28 + $0x150] sm:$0xff] %v1253_v54  ;;  %1280 = vtanh.f32 %v733_v52  ;;  %v754_v58 = vadd.f32 %v1158_v56, %v1463_v34  ;;  %v617_v59 = vpop.f32.mrf.mxu0 }
  0xf7   : > { %v1257_v60 = vpop.eup %1256  ;;  %880 = vst [vmem:[%s1482_s28 + $0x40] sm:$0xff] %v1255_v57  ;;  %1282 = vtanh.f32 %v626_v55  ;;  %v618_v61 = vadd.f32 %v1463_v34, %v617_v59  ;;  %v745_v62 = vpop.f32.mrf.mxu1 }
  0xf8   : > { %v1259_v63 = vpop.eup %1258  ;;  %912 = vst [vmem:[%s1482_s28 + $0x140] sm:$0xff] %v1257_v60  ;;  %1284 = vtanh.f32 %v754_v58  ;;  %v746_v0 = vadd.f32 %v1463_v34, %v745_v62  ;;  %v1127_v1 = vpop.f32.mrf.mxu0 }
  0xf9   : > { %v1261_v2 = vpop.eup %1260  ;;  %883 = vst [vmem:[%s1482_s28 + $0x58] sm:$0xff] %v1259_v63  ;;  %1286 = vtanh.f32 %v618_v61  ;;  %v629_v3 = vadd.f32 %v1127_v1, %v1463_v34  ;;  %v1159_v4 = vpop.f32.mrf.mxu1 }
  0xfa   : > { %v1263_v5 = vpop.eup %1262  ;;  %915 = vst [vmem:[%s1482_s28 + $0x158] sm:$0xff] %v1261_v2  ;;  %1288 = vtanh.f32 %v746_v0  ;;  %v757_v6 = vadd.f32 %v1159_v4, %v1463_v34  ;;  %v620_v7 = vpop.f32.mrf.mxu0 }
  0xfb   : > { %v1265_v8 = vpop.eup %1264  ;;  %881 = vst [vmem:[%s1482_s28 + $0x48] sm:$0xff] %v1263_v5  ;;  %1290 = vtanh.f32 %v629_v3  ;;  %v621_v9 = vadd.f32 %v1463_v34, %v620_v7  ;;  %v748_v10 = vpop.f32.mrf.mxu1 }
  0xfc   : > { %v1267_v11 = vpop.eup %1266  ;;  %913 = vst [vmem:[%s1482_s28 + $0x148] sm:$0xff] %v1265_v8  ;;  %1292 = vtanh.f32 %v757_v6  ;;  %v749_v12 = vadd.f32 %v1463_v34, %v748_v10  ;;  %v1130_v13 = vpop.f32.mrf.mxu0 }
  0xfd   : > { %v1269_v14 = vpop.eup %1268  ;;  %886 = vst [vmem:[%s1482_s28 + $0x70] sm:$0xff] %v1267_v11  ;;  %1294 = vtanh.f32 %v621_v9  ;;  %v642_v15 = vadd.f32 %v1130_v13, %v1463_v34  ;;  %v1162_v16 = vpop.f32.mrf.mxu1 }
  0xfe   : > { %v1271_v17 = vpop.eup %1270  ;;  %918 = vst [vmem:[%s1482_s28 + $0x170] sm:$0xff] %v1269_v14  ;;  %1296 = vtanh.f32 %v749_v12  ;;  %v770_v18 = vadd.f32 %v1162_v16, %v1463_v34  ;;  %v633_v19 = vpop.f32.mrf.mxu0 }
  0xff   : > { %v1273_v20 = vpop.eup %1272  ;;  %884 = vst [vmem:[%s1482_s28 + $0x60] sm:$0xff] %v1271_v17  ;;  %1298 = vtanh.f32 %v642_v15  ;;  %v634_v21 = vadd.f32 %v1463_v34, %v633_v19  ;;  %v761_v22 = vpop.f32.mrf.mxu1 }
 0x100   : > { %v1275_v23 = vpop.eup %1274  ;;  %916 = vst [vmem:[%s1482_s28 + $0x160] sm:$0xff] %v1273_v20  ;;  %1300 = vtanh.f32 %v770_v18  ;;  %v762_v24 = vadd.f32 %v1463_v34, %v761_v22  ;;  %v1131_v25 = vpop.f32.mrf.mxu0 }
 0x101   : > { %v1277_v26 = vpop.eup %1276  ;;  %887 = vst [vmem:[%s1482_s28 + $0x78] sm:$0xff] %v1275_v23  ;;  %1302 = vtanh.f32 %v634_v21  ;;  %v645_v27 = vadd.f32 %v1131_v25, %v1463_v34  ;;  %v1163_v28 = vpop.f32.mrf.mxu1 }
 0x102   : > { %v1279_v29 = vpop.eup %1278  ;;  %919 = vst [vmem:[%s1482_s28 + $0x178] sm:$0xff] %v1277_v26  ;;  %1304 = vtanh.f32 %v762_v24  ;;  %v773_v30 = vadd.f32 %v1163_v28, %v1463_v34  ;;  %v636_v31 = vpop.f32.mrf.mxu0 }
 0x103   : > { %v1281_v32 = vpop.eup %1280  ;;  %885 = vst [vmem:[%s1482_s28 + $0x68] sm:$0xff] %v1279_v29  ;;  %1306 = vtanh.f32 %v645_v27  ;;  %v637_v33 = vadd.f32 %v1463_v34, %v636_v31  ;;  %v764_v35 = vpop.f32.mrf.mxu1 }
 0x104   : > { %v1283_v36 = vpop.eup %1282  ;;  %917 = vst [vmem:[%s1482_s28 + $0x168] sm:$0xff] %v1281_v32  ;;  %1308 = vtanh.f32 %v773_v30  ;;  %v765_v37 = vadd.f32 %v1463_v34, %v764_v35  ;;  %v1134_v38 = vpop.f32.mrf.mxu0 }
 0x105   : > { %v1285_v39 = vpop.eup %1284  ;;  %890 = vst [vmem:[%s1482_s28 + $0x90] sm:$0xff] %v1283_v36  ;;  %1310 = vtanh.f32 %v637_v33  ;;  %v658_v40 = vadd.f32 %v1134_v38, %v1463_v34  ;;  %v1166_v41 = vpop.f32.mrf.mxu1 }
 0x106   : > { %v1287_v42 = vpop.eup %1286  ;;  %922 = vst [vmem:[%s1482_s28 + $0x190] sm:$0xff] %v1285_v39  ;;  %1312 = vtanh.f32 %v765_v37  ;;  %v786_v43 = vadd.f32 %v1166_v41, %v1463_v34  ;;  %v649_v44 = vpop.f32.mrf.mxu0 }
 0x107   : > { %v1289_v45 = vpop.eup %1288  ;;  %888 = vst [vmem:[%s1482_s28 + $0x80] sm:$0xff] %v1287_v42  ;;  %1314 = vtanh.f32 %v658_v40  ;;  %v650_v46 = vadd.f32 %v1463_v34, %v649_v44  ;;  %v777_v47 = vpop.f32.mrf.mxu1 }
 0x108   : > { %v1291_v48 = vpop.eup %1290  ;;  %920 = vst [vmem:[%s1482_s28 + $0x180] sm:$0xff] %v1289_v45  ;;  %1316 = vtanh.f32 %v786_v43  ;;  %v778_v49 = vadd.f32 %v1463_v34, %v777_v47  ;;  %v1135_v50 = vpop.f32.mrf.mxu0 }
 0x109   : > { %v1293_v51 = vpop.eup %1292  ;;  %891 = vst [vmem:[%s1482_s28 + $0x98] sm:$0xff] %v1291_v48  ;;  %1318 = vtanh.f32 %v650_v46  ;;  %v661_v52 = vadd.f32 %v1135_v50, %v1463_v34  ;;  %v1167_v53 = vpop.f32.mrf.mxu1 }
 0x10a   : > { %v1295_v54 = vpop.eup %1294  ;;  %923 = vst [vmem:[%s1482_s28 + $0x198] sm:$0xff] %v1293_v51  ;;  %1320 = vtanh.f32 %v778_v49  ;;  %v789_v55 = vadd.f32 %v1167_v53, %v1463_v34  ;;  %v652_v56 = vpop.f32.mrf.mxu0 }
 0x10b   : > { %v1297_v57 = vpop.eup %1296  ;;  %889 = vst [vmem:[%s1482_s28 + $0x88] sm:$0xff] %v1295_v54  ;;  %1322 = vtanh.f32 %v661_v52  ;;  %v653_v58 = vadd.f32 %v1463_v34, %v652_v56  ;;  %v780_v59 = vpop.f32.mrf.mxu1 }
 0x10c   : > { %v1299_v60 = vpop.eup %1298  ;;  %921 = vst [vmem:[%s1482_s28 + $0x188] sm:$0xff] %v1297_v57  ;;  %1324 = vtanh.f32 %v789_v55  ;;  %v781_v61 = vadd.f32 %v1463_v34, %v780_v59  ;;  %v1138_v62 = vpop.f32.mrf.mxu0 }
 0x10d   : > { %v1301_v63 = vpop.eup %1300  ;;  %894 = vst [vmem:[%s1482_s28 + $0xb0] sm:$0xff] %v1299_v60  ;;  %1326 = vtanh.f32 %v653_v58  ;;  %v674_v0 = vadd.f32 %v1138_v62, %v1463_v34  ;;  %v1170_v1 = vpop.f32.mrf.mxu1 }
 0x10e   : > { %v1303_v2 = vpop.eup %1302  ;;  %926 = vst [vmem:[%s1482_s28 + $0x1b0] sm:$0xff] %v1301_v63  ;;  %1328 = vtanh.f32 %v781_v61  ;;  %v802_v3 = vadd.f32 %v1170_v1, %v1463_v34  ;;  %v665_v4 = vpop.f32.mrf.mxu0 }
 0x10f   : > { %v1305_v5 = vpop.eup %1304  ;;  %892 = vst [vmem:[%s1482_s28 + $0xa0] sm:$0xff] %v1303_v2  ;;  %1330 = vtanh.f32 %v674_v0  ;;  %v666_v6 = vadd.f32 %v1463_v34, %v665_v4  ;;  %v793_v7 = vpop.f32.mrf.mxu1 }
 0x110   : > { %v1307_v8 = vpop.eup %1306  ;;  %924 = vst [vmem:[%s1482_s28 + $0x1a0] sm:$0xff] %v1305_v5  ;;  %1332 = vtanh.f32 %v802_v3  ;;  %v794_v9 = vadd.f32 %v1463_v34, %v793_v7  ;;  %v1139_v10 = vpop.f32.mrf.mxu0 }
 0x111   : > { %v1309_v11 = vpop.eup %1308  ;;  %895 = vst [vmem:[%s1482_s28 + $0xb8] sm:$0xff] %v1307_v8  ;;  %1334 = vtanh.f32 %v666_v6  ;;  %v677_v12 = vadd.f32 %v1139_v10, %v1463_v34  ;;  %v1171_v13 = vpop.f32.mrf.mxu1 }
 0x112   : > { %v1311_v14 = vpop.eup %1310  ;;  %927 = vst [vmem:[%s1482_s28 + $0x1b8] sm:$0xff] %v1309_v11  ;;  %1336 = vtanh.f32 %v794_v9  ;;  %v805_v15 = vadd.f32 %v1171_v13, %v1463_v34  ;;  %v668_v16 = vpop.f32.mrf.mxu0 }
 0x113   : > { %v1313_v17 = vpop.eup %1312  ;;  %893 = vst [vmem:[%s1482_s28 + $0xa8] sm:$0xff] %v1311_v14  ;;  %1338 = vtanh.f32 %v677_v12  ;;  %v669_v18 = vadd.f32 %v1463_v34, %v668_v16  ;;  %v796_v19 = vpop.f32.mrf.mxu1 }
 0x114   : > { %v1315_v20 = vpop.eup %1314  ;;  %925 = vst [vmem:[%s1482_s28 + $0x1a8] sm:$0xff] %v1313_v17  ;;  %1340 = vtanh.f32 %v805_v15  ;;  %v797_v21 = vadd.f32 %v1463_v34, %v796_v19 }
 0x115   : > { %v1317_v22 = vpop.eup %1316  ;;  %898 = vst [vmem:[%s1482_s28 + $0xd0] sm:$0xff] %v1315_v20  ;;  %1342 = vtanh.f32 %v669_v18 }
 0x116   : > { %v1319_v23 = vpop.eup %1318  ;;  %930 = vst [vmem:[%s1482_s28 + $0x1d0] sm:$0xff] %v1317_v22  ;;  %1344 = vtanh.f32 %v797_v21 }
 0x117   : > { %v1321_v24 = vpop.eup %1320  ;;  %896 = vst [vmem:[%s1482_s28 + $0xc0] sm:$0xff] %v1319_v23 }
 0x118   : > { %v1323_v25 = vpop.eup %1322  ;;  %928 = vst [vmem:[%s1482_s28 + $0x1c0] sm:$0xff] %v1321_v24 }
 0x119   : > { %v1325_v26 = vpop.eup %1324  ;;  %899 = vst [vmem:[%s1482_s28 + $0xd8] sm:$0xff] %v1323_v25 }
 0x11a   : > { %v1327_v34 = vpop.eup %1326  ;;  %931 = vst [vmem:[%s1482_s28 + $0x1d8] sm:$0xff] %v1325_v26 }
 0x11b   : > { %v1329_v27 = vpop.eup %1328  ;;  %897 = vst [vmem:[%s1482_s28 + $0xc8] sm:$0xff] %v1327_v34 }
 0x11c   : > { %v1331_v28 = vpop.eup %1330  ;;  %929 = vst [vmem:[%s1482_s28 + $0x1c8] sm:$0xff] %v1329_v27 }
 0x11d   : > { %v1333_v29 = vpop.eup %1332  ;;  %902 = vst [vmem:[%s1482_s28 + $0xf0] sm:$0xff] %v1331_v28 }
 0x11e   : > { %v1335_v30 = vpop.eup %1334  ;;  %934 = vst [vmem:[%s1482_s28 + $0x1f0] sm:$0xff] %v1333_v29 }
 0x11f   : > { %v1337_v31 = vpop.eup %1336  ;;  %900 = vst [vmem:[%s1482_s28 + $0xe0] sm:$0xff] %v1335_v30 }
 0x120   : > { %v1339_v32 = vpop.eup %1338  ;;  %932 = vst [vmem:[%s1482_s28 + $0x1e0] sm:$0xff] %v1337_v31 }
 0x121   : > { %v1341_v33 = vpop.eup %1340  ;;  %903 = vst [vmem:[%s1482_s28 + $0xf8] sm:$0xff] %v1339_v32 }
 0x122   : > { %v1343_v35 = vpop.eup %1342  ;;  %935 = vst [vmem:[%s1482_s28 + $0x1f8] sm:$0xff] %v1341_v33 }
 0x123   : > { %v1345_v36 = vpop.eup %1344  ;;  %901 = vst [vmem:[%s1482_s28 + $0xe8] sm:$0xff] %v1343_v35 }
 0x124   : > { %933 = vst [vmem:[%s1482_s28 + $0x1e8] sm:$0xff] %v1345_v36 }
 0x125 PF: > { %s13_s12 = sadd.s32 1, %s1352_s12  }
 0x126   : > { %p10_p4 = scmp.ge.s32.totalorder %s13_s12, 6  }
 0x128   :  { %12 = sbr.rel (!%p10_p4) target bundleno = 1 (0x1), region = 62 }

</bundles_post_ra>
